<compile_context>
chip_gen: v7x
topology: tpu7x:2x2x1
jax: 0.10.0
libtpu: 0.0.40
codegen_flags: <defaults>
</compile_context>

<pallas_src>
import jax
import jax.numpy as jnp
from jax import lax
from jax.experimental import pallas as pl
from jax.experimental.pallas import tpu as pltpu

# ---- static model config (consistent with the forward's reshape to (B, 30, -1)) ----
B = 2            # batch
C_IN = 1         # conv input channels
C_OUT = 4        # conv output channels
IMG_H = 8        # input height
IMG_W = 30       # input width -> becomes the sequence length after permute/reshape
KH = KW = 3      # conv kernel, stride 1, padding 1 (spatial preserved)
SEQ = IMG_W      # 30
FEAT = C_OUT * IMG_H   # 32 : flattened (C, H) per timestep
HID = 32         # LSTM hidden size
GATES = 4 * HID  # 128
NCLS = 4         # n_classes


# ======================= fully fused kernel =======================
# Refs:
#   x_ref    : (B, IMG_H, IMG_W)  raw input (unit channel dim squeezed)   [VMEM]
#   wconv_ref: (C_OUT*C_IN*KH*KW,) conv weights, flat, natural order      [SMEM]
#   bconv_ref: (C_OUT,)            conv bias                              [SMEM]
#   wih_ref  : (FEAT, 4*HID)       LSTM input weights  (pre-transposed)   [VMEM]
#   whh_ref  : (HID, 4*HID)        LSTM hidden weights (pre-transposed)   [VMEM]
#   bgate_ref: (1, 4*HID)          b_ih + b_hh (pre-folded)               [VMEM]
#   wfc_ref  : (HID, NCLS)         FC weights (pre-transposed)            [VMEM]
#   bfc_ref  : (1, NCLS)           FC bias                                [VMEM]
#   out_ref  : (B, NCLS)           output                                 [VMEM]
def fused_kernel(x_ref, wconv_ref, bconv_ref, wih_ref, whh_ref, bgate_ref,
                 wfc_ref, bfc_ref, out_ref):
    f32 = jnp.float32

    # ---- stage 1: conv3x3 + ReLU, feature assembled lane/sublane-packed, then
    #      ONE (2*SEQ, FEAT) @ (FEAT, 4*HID) MXU matmul for the input projection. ----
    zrow = jnp.zeros((1, IMG_W), f32)
    zcol = jnp.zeros((IMG_H + 2, 1), f32)
    feat_t_cols = []
    for b in range(B):
        xb = x_ref[b]                                             # (8, 30) one vreg
        # zero-pad to (10, 32) with value concats (no XLA-side pad launch)
        xpad = jnp.concatenate(
            [zcol, jnp.concatenate([zrow, xb, zrow], axis=0), zcol], axis=1)
        # 9 taps x 4 channels: scalar(SMEM) * single-vreg (8,30) multiply-adds
        accs = [None] * C_OUT
        for kh in range(KH):
            for kw in range(KW):
                shifted = lax.slice(xpad, (kh, kw), (kh + IMG_H, kw + IMG_W))  # (8,30)
                for c in range(C_OUT):
                    w = wconv_ref[c * KH * KW + kh * KW + kw]
                    contrib = shifted * w
                    accs[c] = contrib if accs[c] is None else accs[c] + contrib
        planes = [jnp.maximum(accs[c] + bconv_ref[c], 0.0) for c in range(C_OUT)]
        # rows = c*IMG_H + h  (matches permute(0,3,1,2).reshape layout), cols = t
        feat_t_cols.append(jnp.concatenate(planes, axis=0))        # (FEAT, SEQ)
    feat_t = jnp.concatenate(feat_t_cols, axis=1)                  # (FEAT, B*SEQ)
    feat = feat_t.T                                                # (B*SEQ, FEAT), row = b*SEQ + t
    gx = jnp.dot(feat, wih_ref[...],
                 preferred_element_type=f32) + bgate_ref[...]      # (B*SEQ, 4*HID)

    # ---- stage 2: LSTM recurrence, fully unrolled with static indices; only the
    #      h-matmul + elementwise gate update are on the serial chain. ----
    whh = whh_ref[...]                                             # hoist weight load
    h = jnp.zeros((B, HID), f32)
    c = jnp.zeros((B, HID), f32)
    for t in range(SEQ):
        # static row slices of the prologue-computed gx value: off the serial chain
        gx_t = jnp.concatenate([gx[t:t + 1, :], gx[SEQ + t:SEQ + t + 1, :]], axis=0)
        gates = gx_t + jnp.dot(h, whh, preferred_element_type=f32)  # (B, 4*HID)
        sig = jax.nn.sigmoid(gates)       # full-vreg EUP op
        tnh = jnp.tanh(gates)             # full-vreg EUP op
        i_g = sig[:, 0 * HID:1 * HID]     # PyTorch gate order: i, f, g, o
        f_g = sig[:, 1 * HID:2 * HID]
        g_g = tnh[:, 2 * HID:3 * HID]
        o_g = sig[:, 3 * HID:4 * HID]
        c = f_g * c + i_g * g_g
        h = o_g * jnp.tanh(c)

    # ---- stage 3: final Linear on the last hidden state ----
    out_ref[...] = (jnp.dot(h, wfc_ref[...], preferred_element_type=f32)
                    + bfc_ref[...])


# ----------------- one-time parameter preparation (outside the jitted forward) -----------------
def prepare_params(params):
    return {
        "wconv": params["w_conv"].reshape(-1),            # (C_OUT*C_IN*KH*KW,)
        "bconv": params["b_conv"],                        # (C_OUT,)
        "wih_t": params["w_ih"].T,                        # (FEAT, 4*HID)
        "whh_t": params["w_hh"].T,                        # (HID, 4*HID)
        "bgate": (params["b_ih"] + params["b_hh"])[None, :],   # (1, 4*HID)
        "wfc_t": params["w_fc"].T,                        # (HID, NCLS)
        "bfc":   params["b_fc"][None, :],                 # (1, NCLS)
    }


@jax.jit
def cnn2d_feed_lstm(x, prep):
    # Single launch: everything (pad, conv+ReLU, permute/reshape layout, LSTM, FC)
    # runs inside ONE pallas_call.  The reshape below only drops the unit channel
    # dim (bitcast, no copy / no extra fusion).
    x3 = x.reshape(B, IMG_H, IMG_W)
    return pl.pallas_call(
        fused_kernel,
        out_shape=jax.ShapeDtypeStruct((B, NCLS), jnp.float32),
        in_specs=[
            pl.BlockSpec(memory_space=pltpu.MemorySpace.VMEM),      # x
            pl.BlockSpec(memory_space=pltpu.MemorySpace.SMEM),      # conv weights (scalars)
            pl.BlockSpec(memory_space=pltpu.MemorySpace.SMEM),      # conv bias (scalars)
            pl.BlockSpec(memory_space=pltpu.MemorySpace.VMEM),      # wih_t
            pl.BlockSpec(memory_space=pltpu.MemorySpace.VMEM),      # whh_t
            pl.BlockSpec(memory_space=pltpu.MemorySpace.VMEM),      # gate bias
            pl.BlockSpec(memory_space=pltpu.MemorySpace.VMEM),      # wfc_t
            pl.BlockSpec(memory_space=pltpu.MemorySpace.VMEM),      # fc bias
        ],
        out_specs=pl.BlockSpec(memory_space=pltpu.MemorySpace.VMEM),
    )(x3, prep["wconv"], prep["bconv"], prep["wih_t"], prep["whh_t"],
      prep["bgate"], prep["wfc_t"], prep["bfc"])


# ------------------------- pure-JAX reference -------------------------
def reference(x, p):
    out = lax.conv_general_dilated(x, p["w_conv"], (1, 1), "SAME",
                                   dimension_numbers=("NCHW", "OIHW", "NCHW"))
    feat = jnp.maximum(out + p["b_conv"][None, :, None, None], 0.0)
    seq = jnp.transpose(feat, (0, 3, 1, 2)).reshape(B, SEQ, FEAT)

    def step(carry, x_t):
        h, c = carry
        gates = x_t @ p["w_ih"].T + h @ p["w_hh"].T + p["b_ih"] + p["b_hh"]
        i, f, g, o = jnp.split(gates, 4, axis=-1)
        i, f, o = jax.nn.sigmoid(i), jax.nn.sigmoid(f), jax.nn.sigmoid(o)
        g = jnp.tanh(g)
        c = f * c + i * g
        h = o * jnp.tanh(c)
        return (h, c), None

    h0 = jnp.zeros((B, HID), jnp.float32)
    c0 = jnp.zeros((B, HID), jnp.float32)
    (hT, _), _ = lax.scan(step, (h0, c0), jnp.transpose(seq, (1, 0, 2)))
    return hT @ p["w_fc"].T + p["b_fc"]


if __name__ == "__main__":
    key = jax.random.PRNGKey(0)
    ks = jax.random.split(key, 9)
    params = {
        "w_conv": 0.3 * jax.random.normal(ks[0], (C_OUT, C_IN, KH, KW), jnp.float32),
        "b_conv": 0.1 * jax.random.normal(ks[1], (C_OUT,), jnp.float32),
        "w_ih":   0.2 * jax.random.normal(ks[2], (4 * HID, FEAT), jnp.float32),
        "w_hh":   0.2 * jax.random.normal(ks[3], (4 * HID, HID), jnp.float32),
        "b_ih":   0.1 * jax.random.normal(ks[4], (4 * HID,), jnp.float32),
        "b_hh":   0.1 * jax.random.normal(ks[5], (4 * HID,), jnp.float32),
        "w_fc":   0.2 * jax.random.normal(ks[6], (NCLS, HID), jnp.float32),
        "b_fc":   0.1 * jax.random.normal(ks[7], (NCLS,), jnp.float32),
    }
    x = jax.random.normal(ks[8], (B, C_IN, IMG_H, IMG_W), jnp.float32)

    prep = prepare_params(params)          # one-time weight re-layout, outside the forward
    out = jax.block_until_ready(cnn2d_feed_lstm(x, prep))
    ref = reference(x, params)

    assert out.shape == (B, NCLS), out.shape
    assert jnp.allclose(out, ref, atol=1e-3, rtol=1e-3), (out, ref)
    print("KERNEL_OK")
</pallas_src>

<mosaic_0001>
module attributes {stable_mosaic.version = 11 : i64} {
  func.func @fused_kernel(%arg0: memref<2x8x30xf32, #tpu.memory_space<vmem>>, %arg1: memref<36xf32, #tpu.memory_space<smem>>, %arg2: memref<4xf32, #tpu.memory_space<smem>>, %arg3: memref<32x128xf32, #tpu.memory_space<vmem>>, %arg4: memref<32x128xf32, #tpu.memory_space<vmem>>, %arg5: memref<1x128xf32, #tpu.memory_space<vmem>>, %arg6: memref<32x4xf32, #tpu.memory_space<vmem>>, %arg7: memref<1x4xf32, #tpu.memory_space<vmem>>, %arg8: memref<2x4xf32, #tpu.memory_space<vmem>>) attributes {dimension_semantics = [], scalar_prefetch = 0 : i64, scratch_operands = 0 : i64, tpu.core_type = #tpu.core_type<tc>} {
    %cst = arith.constant 0.000000e+00 : f32
    %0 = vector.broadcast %cst : f32 to vector<1x30xf32>
    %cst_0 = arith.constant 0.000000e+00 : f32
    %1 = vector.broadcast %cst_0 : f32 to vector<10x1xf32>
    %c0 = arith.constant 0 : index
    %c0_1 = arith.constant 0 : index
    %c0_2 = arith.constant 0 : index
    %2 = vector.load %arg0[%c0, %c0_1, %c0_2] : memref<2x8x30xf32, #tpu.memory_space<vmem>>, vector<1x8x30xf32>
    %3 = vector.shape_cast %2 : vector<1x8x30xf32> to vector<8x30xf32>
    %4 = tpu.concatenate %0, %3, %0 in 0 : vector<1x30xf32>, vector<8x30xf32>, vector<1x30xf32> -> vector<10x30xf32>
    %5 = tpu.concatenate %1, %4, %1 in 1 : vector<10x1xf32>, vector<10x30xf32>, vector<10x1xf32> -> vector<10x32xf32>
    %6 = vector.extract_strided_slice %5 {offsets = [0, 0], sizes = [8, 30], strides = [1, 1]} : vector<10x32xf32> to vector<8x30xf32>
    %c0_3 = arith.constant 0 : index
    %7 = memref.load %arg1[%c0_3] : memref<36xf32, #tpu.memory_space<smem>>
    %8 = vector.broadcast %7 : f32 to vector<8x30xf32>
    %9 = arith.mulf %6, %8 : vector<8x30xf32>
    %c9 = arith.constant 9 : index
    %10 = memref.load %arg1[%c9] : memref<36xf32, #tpu.memory_space<smem>>
    %11 = vector.broadcast %10 : f32 to vector<8x30xf32>
    %12 = arith.mulf %6, %11 : vector<8x30xf32>
    %c18 = arith.constant 18 : index
    %13 = memref.load %arg1[%c18] : memref<36xf32, #tpu.memory_space<smem>>
    %14 = vector.broadcast %13 : f32 to vector<8x30xf32>
    %15 = arith.mulf %6, %14 : vector<8x30xf32>
    %c27 = arith.constant 27 : index
    %16 = memref.load %arg1[%c27] : memref<36xf32, #tpu.memory_space<smem>>
    %17 = vector.broadcast %16 : f32 to vector<8x30xf32>
    %18 = arith.mulf %6, %17 : vector<8x30xf32>
    %19 = vector.extract_strided_slice %5 {offsets = [0, 1], sizes = [8, 30], strides = [1, 1]} : vector<10x32xf32> to vector<8x30xf32>
    %c1 = arith.constant 1 : index
    %20 = memref.load %arg1[%c1] : memref<36xf32, #tpu.memory_space<smem>>
    %21 = vector.broadcast %20 : f32 to vector<8x30xf32>
    %22 = arith.mulf %19, %21 : vector<8x30xf32>
    %23 = arith.addf %9, %22 : vector<8x30xf32>
    %c10 = arith.constant 10 : index
    %24 = memref.load %arg1[%c10] : memref<36xf32, #tpu.memory_space<smem>>
    %25 = vector.broadcast %24 : f32 to vector<8x30xf32>
    %26 = arith.mulf %19, %25 : vector<8x30xf32>
    %27 = arith.addf %12, %26 : vector<8x30xf32>
    %c19 = arith.constant 19 : index
    %28 = memref.load %arg1[%c19] : memref<36xf32, #tpu.memory_space<smem>>
    %29 = vector.broadcast %28 : f32 to vector<8x30xf32>
    %30 = arith.mulf %19, %29 : vector<8x30xf32>
    %31 = arith.addf %15, %30 : vector<8x30xf32>
    %c28 = arith.constant 28 : index
    %32 = memref.load %arg1[%c28] : memref<36xf32, #tpu.memory_space<smem>>
    %33 = vector.broadcast %32 : f32 to vector<8x30xf32>
    %34 = arith.mulf %19, %33 : vector<8x30xf32>
    %35 = arith.addf %18, %34 : vector<8x30xf32>
    %36 = vector.extract_strided_slice %5 {offsets = [0, 2], sizes = [8, 30], strides = [1, 1]} : vector<10x32xf32> to vector<8x30xf32>
    %c2 = arith.constant 2 : index
    %37 = memref.load %arg1[%c2] : memref<36xf32, #tpu.memory_space<smem>>
    %38 = vector.broadcast %37 : f32 to vector<8x30xf32>
    %39 = arith.mulf %36, %38 : vector<8x30xf32>
    %40 = arith.addf %23, %39 : vector<8x30xf32>
    %c11 = arith.constant 11 : index
    %41 = memref.load %arg1[%c11] : memref<36xf32, #tpu.memory_space<smem>>
    %42 = vector.broadcast %41 : f32 to vector<8x30xf32>
    %43 = arith.mulf %36, %42 : vector<8x30xf32>
    %44 = arith.addf %27, %43 : vector<8x30xf32>
    %c20 = arith.constant 20 : index
    %45 = memref.load %arg1[%c20] : memref<36xf32, #tpu.memory_space<smem>>
    %46 = vector.broadcast %45 : f32 to vector<8x30xf32>
    %47 = arith.mulf %36, %46 : vector<8x30xf32>
    %48 = arith.addf %31, %47 : vector<8x30xf32>
    %c29 = arith.constant 29 : index
    %49 = memref.load %arg1[%c29] : memref<36xf32, #tpu.memory_space<smem>>
    %50 = vector.broadcast %49 : f32 to vector<8x30xf32>
    %51 = arith.mulf %36, %50 : vector<8x30xf32>
    %52 = arith.addf %35, %51 : vector<8x30xf32>
    %53 = vector.extract_strided_slice %5 {offsets = [1, 0], sizes = [8, 30], strides = [1, 1]} : vector<10x32xf32> to vector<8x30xf32>
    %c3 = arith.constant 3 : index
    %54 = memref.load %arg1[%c3] : memref<36xf32, #tpu.memory_space<smem>>
    %55 = vector.broadcast %54 : f32 to vector<8x30xf32>
    %56 = arith.mulf %53, %55 : vector<8x30xf32>
    %57 = arith.addf %40, %56 : vector<8x30xf32>
    %c12 = arith.constant 12 : index
    %58 = memref.load %arg1[%c12] : memref<36xf32, #tpu.memory_space<smem>>
    %59 = vector.broadcast %58 : f32 to vector<8x30xf32>
    %60 = arith.mulf %53, %59 : vector<8x30xf32>
    %61 = arith.addf %44, %60 : vector<8x30xf32>
    %c21 = arith.constant 21 : index
    %62 = memref.load %arg1[%c21] : memref<36xf32, #tpu.memory_space<smem>>
    %63 = vector.broadcast %62 : f32 to vector<8x30xf32>
    %64 = arith.mulf %53, %63 : vector<8x30xf32>
    %65 = arith.addf %48, %64 : vector<8x30xf32>
    %c30 = arith.constant 30 : index
    %66 = memref.load %arg1[%c30] : memref<36xf32, #tpu.memory_space<smem>>
    %67 = vector.broadcast %66 : f32 to vector<8x30xf32>
    %68 = arith.mulf %53, %67 : vector<8x30xf32>
    %69 = arith.addf %52, %68 : vector<8x30xf32>
    %70 = vector.extract_strided_slice %5 {offsets = [1, 1], sizes = [8, 30], strides = [1, 1]} : vector<10x32xf32> to vector<8x30xf32>
    %c4 = arith.constant 4 : index
    %71 = memref.load %arg1[%c4] : memref<36xf32, #tpu.memory_space<smem>>
    %72 = vector.broadcast %71 : f32 to vector<8x30xf32>
    %73 = arith.mulf %70, %72 : vector<8x30xf32>
    %74 = arith.addf %57, %73 : vector<8x30xf32>
    %c13 = arith.constant 13 : index
    %75 = memref.load %arg1[%c13] : memref<36xf32, #tpu.memory_space<smem>>
    %76 = vector.broadcast %75 : f32 to vector<8x30xf32>
    %77 = arith.mulf %70, %76 : vector<8x30xf32>
    %78 = arith.addf %61, %77 : vector<8x30xf32>
    %c22 = arith.constant 22 : index
    %79 = memref.load %arg1[%c22] : memref<36xf32, #tpu.memory_space<smem>>
    %80 = vector.broadcast %79 : f32 to vector<8x30xf32>
    %81 = arith.mulf %70, %80 : vector<8x30xf32>
    %82 = arith.addf %65, %81 : vector<8x30xf32>
    %c31 = arith.constant 31 : index
    %83 = memref.load %arg1[%c31] : memref<36xf32, #tpu.memory_space<smem>>
    %84 = vector.broadcast %83 : f32 to vector<8x30xf32>
    %85 = arith.mulf %70, %84 : vector<8x30xf32>
    %86 = arith.addf %69, %85 : vector<8x30xf32>
    %87 = vector.extract_strided_slice %5 {offsets = [1, 2], sizes = [8, 30], strides = [1, 1]} : vector<10x32xf32> to vector<8x30xf32>
    %c5 = arith.constant 5 : index
    %88 = memref.load %arg1[%c5] : memref<36xf32, #tpu.memory_space<smem>>
    %89 = vector.broadcast %88 : f32 to vector<8x30xf32>
    %90 = arith.mulf %87, %89 : vector<8x30xf32>
    %91 = arith.addf %74, %90 : vector<8x30xf32>
    %c14 = arith.constant 14 : index
    %92 = memref.load %arg1[%c14] : memref<36xf32, #tpu.memory_space<smem>>
    %93 = vector.broadcast %92 : f32 to vector<8x30xf32>
    %94 = arith.mulf %87, %93 : vector<8x30xf32>
    %95 = arith.addf %78, %94 : vector<8x30xf32>
    %c23 = arith.constant 23 : index
    %96 = memref.load %arg1[%c23] : memref<36xf32, #tpu.memory_space<smem>>
    %97 = vector.broadcast %96 : f32 to vector<8x30xf32>
    %98 = arith.mulf %87, %97 : vector<8x30xf32>
    %99 = arith.addf %82, %98 : vector<8x30xf32>
    %c32 = arith.constant 32 : index
    %100 = memref.load %arg1[%c32] : memref<36xf32, #tpu.memory_space<smem>>
    %101 = vector.broadcast %100 : f32 to vector<8x30xf32>
    %102 = arith.mulf %87, %101 : vector<8x30xf32>
    %103 = arith.addf %86, %102 : vector<8x30xf32>
    %104 = vector.extract_strided_slice %5 {offsets = [2, 0], sizes = [8, 30], strides = [1, 1]} : vector<10x32xf32> to vector<8x30xf32>
    %c6 = arith.constant 6 : index
    %105 = memref.load %arg1[%c6] : memref<36xf32, #tpu.memory_space<smem>>
    %106 = vector.broadcast %105 : f32 to vector<8x30xf32>
    %107 = arith.mulf %104, %106 : vector<8x30xf32>
    %108 = arith.addf %91, %107 : vector<8x30xf32>
    %c15 = arith.constant 15 : index
    %109 = memref.load %arg1[%c15] : memref<36xf32, #tpu.memory_space<smem>>
    %110 = vector.broadcast %109 : f32 to vector<8x30xf32>
    %111 = arith.mulf %104, %110 : vector<8x30xf32>
    %112 = arith.addf %95, %111 : vector<8x30xf32>
    %c24 = arith.constant 24 : index
    %113 = memref.load %arg1[%c24] : memref<36xf32, #tpu.memory_space<smem>>
    %114 = vector.broadcast %113 : f32 to vector<8x30xf32>
    %115 = arith.mulf %104, %114 : vector<8x30xf32>
    %116 = arith.addf %99, %115 : vector<8x30xf32>
    %c33 = arith.constant 33 : index
    %117 = memref.load %arg1[%c33] : memref<36xf32, #tpu.memory_space<smem>>
    %118 = vector.broadcast %117 : f32 to vector<8x30xf32>
    %119 = arith.mulf %104, %118 : vector<8x30xf32>
    %120 = arith.addf %103, %119 : vector<8x30xf32>
    %121 = vector.extract_strided_slice %5 {offsets = [2, 1], sizes = [8, 30], strides = [1, 1]} : vector<10x32xf32> to vector<8x30xf32>
    %c7 = arith.constant 7 : index
    %122 = memref.load %arg1[%c7] : memref<36xf32, #tpu.memory_space<smem>>
    %123 = vector.broadcast %122 : f32 to vector<8x30xf32>
    %124 = arith.mulf %121, %123 : vector<8x30xf32>
    %125 = arith.addf %108, %124 : vector<8x30xf32>
    %c16 = arith.constant 16 : index
    %126 = memref.load %arg1[%c16] : memref<36xf32, #tpu.memory_space<smem>>
    %127 = vector.broadcast %126 : f32 to vector<8x30xf32>
    %128 = arith.mulf %121, %127 : vector<8x30xf32>
    %129 = arith.addf %112, %128 : vector<8x30xf32>
    %c25 = arith.constant 25 : index
    %130 = memref.load %arg1[%c25] : memref<36xf32, #tpu.memory_space<smem>>
    %131 = vector.broadcast %130 : f32 to vector<8x30xf32>
    %132 = arith.mulf %121, %131 : vector<8x30xf32>
    %133 = arith.addf %116, %132 : vector<8x30xf32>
    %c34 = arith.constant 34 : index
    %134 = memref.load %arg1[%c34] : memref<36xf32, #tpu.memory_space<smem>>
    %135 = vector.broadcast %134 : f32 to vector<8x30xf32>
    %136 = arith.mulf %121, %135 : vector<8x30xf32>
    %137 = arith.addf %120, %136 : vector<8x30xf32>
    %138 = vector.extract_strided_slice %5 {offsets = [2, 2], sizes = [8, 30], strides = [1, 1]} : vector<10x32xf32> to vector<8x30xf32>
    %c8 = arith.constant 8 : index
    %139 = memref.load %arg1[%c8] : memref<36xf32, #tpu.memory_space<smem>>
    %140 = vector.broadcast %139 : f32 to vector<8x30xf32>
    %141 = arith.mulf %138, %140 : vector<8x30xf32>
    %142 = arith.addf %125, %141 : vector<8x30xf32>
    %c17 = arith.constant 17 : index
    %143 = memref.load %arg1[%c17] : memref<36xf32, #tpu.memory_space<smem>>
    %144 = vector.broadcast %143 : f32 to vector<8x30xf32>
    %145 = arith.mulf %138, %144 : vector<8x30xf32>
    %146 = arith.addf %129, %145 : vector<8x30xf32>
    %c26 = arith.constant 26 : index
    %147 = memref.load %arg1[%c26] : memref<36xf32, #tpu.memory_space<smem>>
    %148 = vector.broadcast %147 : f32 to vector<8x30xf32>
    %149 = arith.mulf %138, %148 : vector<8x30xf32>
    %150 = arith.addf %133, %149 : vector<8x30xf32>
    %c35 = arith.constant 35 : index
    %151 = memref.load %arg1[%c35] : memref<36xf32, #tpu.memory_space<smem>>
    %152 = vector.broadcast %151 : f32 to vector<8x30xf32>
    %153 = arith.mulf %138, %152 : vector<8x30xf32>
    %154 = arith.addf %137, %153 : vector<8x30xf32>
    %c0_4 = arith.constant 0 : index
    %155 = memref.load %arg2[%c0_4] : memref<4xf32, #tpu.memory_space<smem>>
    %156 = vector.broadcast %155 : f32 to vector<8x30xf32>
    %157 = arith.addf %142, %156 : vector<8x30xf32>
    %cst_5 = arith.constant 0.000000e+00 : f32
    %158 = vector.broadcast %cst_5 : f32 to vector<8x30xf32>
    %159 = arith.maximumf %157, %158 : vector<8x30xf32>
    %c1_6 = arith.constant 1 : index
    %160 = memref.load %arg2[%c1_6] : memref<4xf32, #tpu.memory_space<smem>>
    %161 = vector.broadcast %160 : f32 to vector<8x30xf32>
    %162 = arith.addf %146, %161 : vector<8x30xf32>
    %cst_7 = arith.constant 0.000000e+00 : f32
    %163 = vector.broadcast %cst_7 : f32 to vector<8x30xf32>
    %164 = arith.maximumf %162, %163 : vector<8x30xf32>
    %c2_8 = arith.constant 2 : index
    %165 = memref.load %arg2[%c2_8] : memref<4xf32, #tpu.memory_space<smem>>
    %166 = vector.broadcast %165 : f32 to vector<8x30xf32>
    %167 = arith.addf %150, %166 : vector<8x30xf32>
    %cst_9 = arith.constant 0.000000e+00 : f32
    %168 = vector.broadcast %cst_9 : f32 to vector<8x30xf32>
    %169 = arith.maximumf %167, %168 : vector<8x30xf32>
    %c3_10 = arith.constant 3 : index
    %170 = memref.load %arg2[%c3_10] : memref<4xf32, #tpu.memory_space<smem>>
    %171 = vector.broadcast %170 : f32 to vector<8x30xf32>
    %172 = arith.addf %154, %171 : vector<8x30xf32>
    %cst_11 = arith.constant 0.000000e+00 : f32
    %173 = vector.broadcast %cst_11 : f32 to vector<8x30xf32>
    %174 = arith.maximumf %172, %173 : vector<8x30xf32>
    %175 = tpu.concatenate %159, %164, %169, %174 in 0 : vector<8x30xf32>, vector<8x30xf32>, vector<8x30xf32>, vector<8x30xf32> -> vector<32x30xf32>
    %c1_12 = arith.constant 1 : index
    %c0_13 = arith.constant 0 : index
    %c0_14 = arith.constant 0 : index
    %176 = vector.load %arg0[%c1_12, %c0_13, %c0_14] : memref<2x8x30xf32, #tpu.memory_space<vmem>>, vector<1x8x30xf32>
    %177 = vector.shape_cast %176 : vector<1x8x30xf32> to vector<8x30xf32>
    %178 = tpu.concatenate %0, %177, %0 in 0 : vector<1x30xf32>, vector<8x30xf32>, vector<1x30xf32> -> vector<10x30xf32>
    %179 = tpu.concatenate %1, %178, %1 in 1 : vector<10x1xf32>, vector<10x30xf32>, vector<10x1xf32> -> vector<10x32xf32>
    %180 = vector.extract_strided_slice %179 {offsets = [0, 0], sizes = [8, 30], strides = [1, 1]} : vector<10x32xf32> to vector<8x30xf32>
    %c0_15 = arith.constant 0 : index
    %181 = memref.load %arg1[%c0_15] : memref<36xf32, #tpu.memory_space<smem>>
    %182 = vector.broadcast %181 : f32 to vector<8x30xf32>
    %183 = arith.mulf %180, %182 : vector<8x30xf32>
    %c9_16 = arith.constant 9 : index
    %184 = memref.load %arg1[%c9_16] : memref<36xf32, #tpu.memory_space<smem>>
    %185 = vector.broadcast %184 : f32 to vector<8x30xf32>
    %186 = arith.mulf %180, %185 : vector<8x30xf32>
    %c18_17 = arith.constant 18 : index
    %187 = memref.load %arg1[%c18_17] : memref<36xf32, #tpu.memory_space<smem>>
    %188 = vector.broadcast %187 : f32 to vector<8x30xf32>
    %189 = arith.mulf %180, %188 : vector<8x30xf32>
    %c27_18 = arith.constant 27 : index
    %190 = memref.load %arg1[%c27_18] : memref<36xf32, #tpu.memory_space<smem>>
    %191 = vector.broadcast %190 : f32 to vector<8x30xf32>
    %192 = arith.mulf %180, %191 : vector<8x30xf32>
    %193 = vector.extract_strided_slice %179 {offsets = [0, 1], sizes = [8, 30], strides = [1, 1]} : vector<10x32xf32> to vector<8x30xf32>
    %c1_19 = arith.constant 1 : index
    %194 = memref.load %arg1[%c1_19] : memref<36xf32, #tpu.memory_space<smem>>
    %195 = vector.broadcast %194 : f32 to vector<8x30xf32>
    %196 = arith.mulf %193, %195 : vector<8x30xf32>
    %197 = arith.addf %183, %196 : vector<8x30xf32>
    %c10_20 = arith.constant 10 : index
    %198 = memref.load %arg1[%c10_20] : memref<36xf32, #tpu.memory_space<smem>>
    %199 = vector.broadcast %198 : f32 to vector<8x30xf32>
    %200 = arith.mulf %193, %199 : vector<8x30xf32>
    %201 = arith.addf %186, %200 : vector<8x30xf32>
    %c19_21 = arith.constant 19 : index
    %202 = memref.load %arg1[%c19_21] : memref<36xf32, #tpu.memory_space<smem>>
    %203 = vector.broadcast %202 : f32 to vector<8x30xf32>
    %204 = arith.mulf %193, %203 : vector<8x30xf32>
    %205 = arith.addf %189, %204 : vector<8x30xf32>
    %c28_22 = arith.constant 28 : index
    %206 = memref.load %arg1[%c28_22] : memref<36xf32, #tpu.memory_space<smem>>
    %207 = vector.broadcast %206 : f32 to vector<8x30xf32>
    %208 = arith.mulf %193, %207 : vector<8x30xf32>
    %209 = arith.addf %192, %208 : vector<8x30xf32>
    %210 = vector.extract_strided_slice %179 {offsets = [0, 2], sizes = [8, 30], strides = [1, 1]} : vector<10x32xf32> to vector<8x30xf32>
    %c2_23 = arith.constant 2 : index
    %211 = memref.load %arg1[%c2_23] : memref<36xf32, #tpu.memory_space<smem>>
    %212 = vector.broadcast %211 : f32 to vector<8x30xf32>
    %213 = arith.mulf %210, %212 : vector<8x30xf32>
    %214 = arith.addf %197, %213 : vector<8x30xf32>
    %c11_24 = arith.constant 11 : index
    %215 = memref.load %arg1[%c11_24] : memref<36xf32, #tpu.memory_space<smem>>
    %216 = vector.broadcast %215 : f32 to vector<8x30xf32>
    %217 = arith.mulf %210, %216 : vector<8x30xf32>
    %218 = arith.addf %201, %217 : vector<8x30xf32>
    %c20_25 = arith.constant 20 : index
    %219 = memref.load %arg1[%c20_25] : memref<36xf32, #tpu.memory_space<smem>>
    %220 = vector.broadcast %219 : f32 to vector<8x30xf32>
    %221 = arith.mulf %210, %220 : vector<8x30xf32>
    %222 = arith.addf %205, %221 : vector<8x30xf32>
    %c29_26 = arith.constant 29 : index
    %223 = memref.load %arg1[%c29_26] : memref<36xf32, #tpu.memory_space<smem>>
    %224 = vector.broadcast %223 : f32 to vector<8x30xf32>
    %225 = arith.mulf %210, %224 : vector<8x30xf32>
    %226 = arith.addf %209, %225 : vector<8x30xf32>
    %227 = vector.extract_strided_slice %179 {offsets = [1, 0], sizes = [8, 30], strides = [1, 1]} : vector<10x32xf32> to vector<8x30xf32>
    %c3_27 = arith.constant 3 : index
    %228 = memref.load %arg1[%c3_27] : memref<36xf32, #tpu.memory_space<smem>>
    %229 = vector.broadcast %228 : f32 to vector<8x30xf32>
    %230 = arith.mulf %227, %229 : vector<8x30xf32>
    %231 = arith.addf %214, %230 : vector<8x30xf32>
    %c12_28 = arith.constant 12 : index
    %232 = memref.load %arg1[%c12_28] : memref<36xf32, #tpu.memory_space<smem>>
    %233 = vector.broadcast %232 : f32 to vector<8x30xf32>
    %234 = arith.mulf %227, %233 : vector<8x30xf32>
    %235 = arith.addf %218, %234 : vector<8x30xf32>
    %c21_29 = arith.constant 21 : index
    %236 = memref.load %arg1[%c21_29] : memref<36xf32, #tpu.memory_space<smem>>
    %237 = vector.broadcast %236 : f32 to vector<8x30xf32>
    %238 = arith.mulf %227, %237 : vector<8x30xf32>
    %239 = arith.addf %222, %238 : vector<8x30xf32>
    %c30_30 = arith.constant 30 : index
    %240 = memref.load %arg1[%c30_30] : memref<36xf32, #tpu.memory_space<smem>>
    %241 = vector.broadcast %240 : f32 to vector<8x30xf32>
    %242 = arith.mulf %227, %241 : vector<8x30xf32>
    %243 = arith.addf %226, %242 : vector<8x30xf32>
    %244 = vector.extract_strided_slice %179 {offsets = [1, 1], sizes = [8, 30], strides = [1, 1]} : vector<10x32xf32> to vector<8x30xf32>
    %c4_31 = arith.constant 4 : index
    %245 = memref.load %arg1[%c4_31] : memref<36xf32, #tpu.memory_space<smem>>
    %246 = vector.broadcast %245 : f32 to vector<8x30xf32>
    %247 = arith.mulf %244, %246 : vector<8x30xf32>
    %248 = arith.addf %231, %247 : vector<8x30xf32>
    %c13_32 = arith.constant 13 : index
    %249 = memref.load %arg1[%c13_32] : memref<36xf32, #tpu.memory_space<smem>>
    %250 = vector.broadcast %249 : f32 to vector<8x30xf32>
    %251 = arith.mulf %244, %250 : vector<8x30xf32>
    %252 = arith.addf %235, %251 : vector<8x30xf32>
    %c22_33 = arith.constant 22 : index
    %253 = memref.load %arg1[%c22_33] : memref<36xf32, #tpu.memory_space<smem>>
    %254 = vector.broadcast %253 : f32 to vector<8x30xf32>
    %255 = arith.mulf %244, %254 : vector<8x30xf32>
    %256 = arith.addf %239, %255 : vector<8x30xf32>
    %c31_34 = arith.constant 31 : index
    %257 = memref.load %arg1[%c31_34] : memref<36xf32, #tpu.memory_space<smem>>
    %258 = vector.broadcast %257 : f32 to vector<8x30xf32>
    %259 = arith.mulf %244, %258 : vector<8x30xf32>
    %260 = arith.addf %243, %259 : vector<8x30xf32>
    %261 = vector.extract_strided_slice %179 {offsets = [1, 2], sizes = [8, 30], strides = [1, 1]} : vector<10x32xf32> to vector<8x30xf32>
    %c5_35 = arith.constant 5 : index
    %262 = memref.load %arg1[%c5_35] : memref<36xf32, #tpu.memory_space<smem>>
    %263 = vector.broadcast %262 : f32 to vector<8x30xf32>
    %264 = arith.mulf %261, %263 : vector<8x30xf32>
    %265 = arith.addf %248, %264 : vector<8x30xf32>
    %c14_36 = arith.constant 14 : index
    %266 = memref.load %arg1[%c14_36] : memref<36xf32, #tpu.memory_space<smem>>
    %267 = vector.broadcast %266 : f32 to vector<8x30xf32>
    %268 = arith.mulf %261, %267 : vector<8x30xf32>
    %269 = arith.addf %252, %268 : vector<8x30xf32>
    %c23_37 = arith.constant 23 : index
    %270 = memref.load %arg1[%c23_37] : memref<36xf32, #tpu.memory_space<smem>>
    %271 = vector.broadcast %270 : f32 to vector<8x30xf32>
    %272 = arith.mulf %261, %271 : vector<8x30xf32>
    %273 = arith.addf %256, %272 : vector<8x30xf32>
    %c32_38 = arith.constant 32 : index
    %274 = memref.load %arg1[%c32_38] : memref<36xf32, #tpu.memory_space<smem>>
    %275 = vector.broadcast %274 : f32 to vector<8x30xf32>
    %276 = arith.mulf %261, %275 : vector<8x30xf32>
    %277 = arith.addf %260, %276 : vector<8x30xf32>
    %278 = vector.extract_strided_slice %179 {offsets = [2, 0], sizes = [8, 30], strides = [1, 1]} : vector<10x32xf32> to vector<8x30xf32>
    %c6_39 = arith.constant 6 : index
    %279 = memref.load %arg1[%c6_39] : memref<36xf32, #tpu.memory_space<smem>>
    %280 = vector.broadcast %279 : f32 to vector<8x30xf32>
    %281 = arith.mulf %278, %280 : vector<8x30xf32>
    %282 = arith.addf %265, %281 : vector<8x30xf32>
    %c15_40 = arith.constant 15 : index
    %283 = memref.load %arg1[%c15_40] : memref<36xf32, #tpu.memory_space<smem>>
    %284 = vector.broadcast %283 : f32 to vector<8x30xf32>
    %285 = arith.mulf %278, %284 : vector<8x30xf32>
    %286 = arith.addf %269, %285 : vector<8x30xf32>
    %c24_41 = arith.constant 24 : index
    %287 = memref.load %arg1[%c24_41] : memref<36xf32, #tpu.memory_space<smem>>
    %288 = vector.broadcast %287 : f32 to vector<8x30xf32>
    %289 = arith.mulf %278, %288 : vector<8x30xf32>
    %290 = arith.addf %273, %289 : vector<8x30xf32>
    %c33_42 = arith.constant 33 : index
    %291 = memref.load %arg1[%c33_42] : memref<36xf32, #tpu.memory_space<smem>>
    %292 = vector.broadcast %291 : f32 to vector<8x30xf32>
    %293 = arith.mulf %278, %292 : vector<8x30xf32>
    %294 = arith.addf %277, %293 : vector<8x30xf32>
    %295 = vector.extract_strided_slice %179 {offsets = [2, 1], sizes = [8, 30], strides = [1, 1]} : vector<10x32xf32> to vector<8x30xf32>
    %c7_43 = arith.constant 7 : index
    %296 = memref.load %arg1[%c7_43] : memref<36xf32, #tpu.memory_space<smem>>
    %297 = vector.broadcast %296 : f32 to vector<8x30xf32>
    %298 = arith.mulf %295, %297 : vector<8x30xf32>
    %299 = arith.addf %282, %298 : vector<8x30xf32>
    %c16_44 = arith.constant 16 : index
    %300 = memref.load %arg1[%c16_44] : memref<36xf32, #tpu.memory_space<smem>>
    %301 = vector.broadcast %300 : f32 to vector<8x30xf32>
    %302 = arith.mulf %295, %301 : vector<8x30xf32>
    %303 = arith.addf %286, %302 : vector<8x30xf32>
    %c25_45 = arith.constant 25 : index
    %304 = memref.load %arg1[%c25_45] : memref<36xf32, #tpu.memory_space<smem>>
    %305 = vector.broadcast %304 : f32 to vector<8x30xf32>
    %306 = arith.mulf %295, %305 : vector<8x30xf32>
    %307 = arith.addf %290, %306 : vector<8x30xf32>
    %c34_46 = arith.constant 34 : index
    %308 = memref.load %arg1[%c34_46] : memref<36xf32, #tpu.memory_space<smem>>
    %309 = vector.broadcast %308 : f32 to vector<8x30xf32>
    %310 = arith.mulf %295, %309 : vector<8x30xf32>
    %311 = arith.addf %294, %310 : vector<8x30xf32>
    %312 = vector.extract_strided_slice %179 {offsets = [2, 2], sizes = [8, 30], strides = [1, 1]} : vector<10x32xf32> to vector<8x30xf32>
    %c8_47 = arith.constant 8 : index
    %313 = memref.load %arg1[%c8_47] : memref<36xf32, #tpu.memory_space<smem>>
    %314 = vector.broadcast %313 : f32 to vector<8x30xf32>
    %315 = arith.mulf %312, %314 : vector<8x30xf32>
    %316 = arith.addf %299, %315 : vector<8x30xf32>
    %c17_48 = arith.constant 17 : index
    %317 = memref.load %arg1[%c17_48] : memref<36xf32, #tpu.memory_space<smem>>
    %318 = vector.broadcast %317 : f32 to vector<8x30xf32>
    %319 = arith.mulf %312, %318 : vector<8x30xf32>
    %320 = arith.addf %303, %319 : vector<8x30xf32>
    %c26_49 = arith.constant 26 : index
    %321 = memref.load %arg1[%c26_49] : memref<36xf32, #tpu.memory_space<smem>>
    %322 = vector.broadcast %321 : f32 to vector<8x30xf32>
    %323 = arith.mulf %312, %322 : vector<8x30xf32>
    %324 = arith.addf %307, %323 : vector<8x30xf32>
    %c35_50 = arith.constant 35 : index
    %325 = memref.load %arg1[%c35_50] : memref<36xf32, #tpu.memory_space<smem>>
    %326 = vector.broadcast %325 : f32 to vector<8x30xf32>
    %327 = arith.mulf %312, %326 : vector<8x30xf32>
    %328 = arith.addf %311, %327 : vector<8x30xf32>
    %c0_51 = arith.constant 0 : index
    %329 = memref.load %arg2[%c0_51] : memref<4xf32, #tpu.memory_space<smem>>
    %330 = vector.broadcast %329 : f32 to vector<8x30xf32>
    %331 = arith.addf %316, %330 : vector<8x30xf32>
    %cst_52 = arith.constant 0.000000e+00 : f32
    %332 = vector.broadcast %cst_52 : f32 to vector<8x30xf32>
    %333 = arith.maximumf %331, %332 : vector<8x30xf32>
    %c1_53 = arith.constant 1 : index
    %334 = memref.load %arg2[%c1_53] : memref<4xf32, #tpu.memory_space<smem>>
    %335 = vector.broadcast %334 : f32 to vector<8x30xf32>
    %336 = arith.addf %320, %335 : vector<8x30xf32>
    %cst_54 = arith.constant 0.000000e+00 : f32
    %337 = vector.broadcast %cst_54 : f32 to vector<8x30xf32>
    %338 = arith.maximumf %336, %337 : vector<8x30xf32>
    %c2_55 = arith.constant 2 : index
    %339 = memref.load %arg2[%c2_55] : memref<4xf32, #tpu.memory_space<smem>>
    %340 = vector.broadcast %339 : f32 to vector<8x30xf32>
    %341 = arith.addf %324, %340 : vector<8x30xf32>
    %cst_56 = arith.constant 0.000000e+00 : f32
    %342 = vector.broadcast %cst_56 : f32 to vector<8x30xf32>
    %343 = arith.maximumf %341, %342 : vector<8x30xf32>
    %c3_57 = arith.constant 3 : index
    %344 = memref.load %arg2[%c3_57] : memref<4xf32, #tpu.memory_space<smem>>
    %345 = vector.broadcast %344 : f32 to vector<8x30xf32>
    %346 = arith.addf %328, %345 : vector<8x30xf32>
    %cst_58 = arith.constant 0.000000e+00 : f32
    %347 = vector.broadcast %cst_58 : f32 to vector<8x30xf32>
    %348 = arith.maximumf %346, %347 : vector<8x30xf32>
    %349 = tpu.concatenate %333, %338, %343, %348 in 0 : vector<8x30xf32>, vector<8x30xf32>, vector<8x30xf32>, vector<8x30xf32> -> vector<32x30xf32>
    %350 = tpu.concatenate %175, %349 in 1 : vector<32x30xf32>, vector<32x30xf32> -> vector<32x60xf32>
    %351 = tpu.transpose %350, [1, 0] : vector<32x60xf32> -> vector<60x32xf32>
    %c0_59 = arith.constant 0 : index
    %c0_60 = arith.constant 0 : index
    %352 = vector.load %arg3[%c0_59, %c0_60] : memref<32x128xf32, #tpu.memory_space<vmem>>, vector<32x128xf32>
    %cst_61 = arith.constant dense<0.000000e+00> : vector<60x128xf32>
    %353 = tpu.matmul %351, %352, %cst_61 {dimension_numbers = #tpu.dot_dimension_numbers<[1], [0], [0], [1], [0, 0, 1, 1], [], []>} : vector<60x32xf32>, vector<32x128xf32>, vector<60x128xf32> -> vector<60x128xf32>
    %c0_62 = arith.constant 0 : index
    %c0_63 = arith.constant 0 : index
    %354 = vector.load %arg5[%c0_62, %c0_63] : memref<1x128xf32, #tpu.memory_space<vmem>>, vector<1x128xf32>
    %355 = vector.broadcast %354 : vector<1x128xf32> to vector<60x128xf32>
    %356 = arith.addf %353, %355 : vector<60x128xf32>
    %c0_64 = arith.constant 0 : index
    %c0_65 = arith.constant 0 : index
    %357 = vector.load %arg4[%c0_64, %c0_65] : memref<32x128xf32, #tpu.memory_space<vmem>>, vector<32x128xf32>
    %cst_66 = arith.constant 0.000000e+00 : f32
    %358 = vector.broadcast %cst_66 : f32 to vector<2x32xf32>
    %cst_67 = arith.constant 0.000000e+00 : f32
    %359 = vector.broadcast %cst_67 : f32 to vector<2x32xf32>
    %360 = vector.extract_strided_slice %356 {offsets = [0, 0], sizes = [1, 128], strides = [1, 1]} : vector<60x128xf32> to vector<1x128xf32>
    %361 = vector.extract_strided_slice %356 {offsets = [30, 0], sizes = [1, 128], strides = [1, 1]} : vector<60x128xf32> to vector<1x128xf32>
    %362 = tpu.concatenate %360, %361 in 0 : vector<1x128xf32>, vector<1x128xf32> -> vector<2x128xf32>
    %cst_68 = arith.constant dense<0.000000e+00> : vector<2x128xf32>
    %363 = tpu.matmul %358, %357, %cst_68 {dimension_numbers = #tpu.dot_dimension_numbers<[1], [0], [0], [1], [0, 0, 1, 1], [], []>} : vector<2x32xf32>, vector<32x128xf32>, vector<2x128xf32> -> vector<2x128xf32>
    %364 = arith.addf %362, %363 : vector<2x128xf32>
    %365 = arith.negf %364 : vector<2x128xf32>
    %366 = math.exp %365 : vector<2x128xf32>
    %cst_69 = arith.constant 1.000000e+00 : f32
    %367 = vector.broadcast %cst_69 : f32 to vector<2x128xf32>
    %368 = arith.addf %367, %366 : vector<2x128xf32>
    %369 = arith.divf %367, %368 : vector<2x128xf32>
    %370 = math.tanh %364 : vector<2x128xf32>
    %371 = vector.extract_strided_slice %369 {offsets = [0, 0], sizes = [2, 32], strides = [1, 1]} : vector<2x128xf32> to vector<2x32xf32>
    %372 = vector.extract_strided_slice %369 {offsets = [0, 32], sizes = [2, 32], strides = [1, 1]} : vector<2x128xf32> to vector<2x32xf32>
    %373 = vector.extract_strided_slice %370 {offsets = [0, 64], sizes = [2, 32], strides = [1, 1]} : vector<2x128xf32> to vector<2x32xf32>
    %374 = vector.extract_strided_slice %369 {offsets = [0, 96], sizes = [2, 32], strides = [1, 1]} : vector<2x128xf32> to vector<2x32xf32>
    %375 = arith.mulf %372, %359 : vector<2x32xf32>
    %376 = arith.mulf %371, %373 : vector<2x32xf32>
    %377 = arith.addf %375, %376 : vector<2x32xf32>
    %378 = math.tanh %377 : vector<2x32xf32>
    %379 = arith.mulf %374, %378 : vector<2x32xf32>
    %380 = vector.extract_strided_slice %356 {offsets = [1, 0], sizes = [1, 128], strides = [1, 1]} : vector<60x128xf32> to vector<1x128xf32>
    %381 = vector.extract_strided_slice %356 {offsets = [31, 0], sizes = [1, 128], strides = [1, 1]} : vector<60x128xf32> to vector<1x128xf32>
    %382 = tpu.concatenate %380, %381 in 0 : vector<1x128xf32>, vector<1x128xf32> -> vector<2x128xf32>
    %cst_70 = arith.constant dense<0.000000e+00> : vector<2x128xf32>
    %383 = tpu.matmul %379, %357, %cst_70 {dimension_numbers = #tpu.dot_dimension_numbers<[1], [0], [0], [1], [0, 0, 1, 1], [], []>} : vector<2x32xf32>, vector<32x128xf32>, vector<2x128xf32> -> vector<2x128xf32>
    %384 = arith.addf %382, %383 : vector<2x128xf32>
    %385 = arith.negf %384 : vector<2x128xf32>
    %386 = math.exp %385 : vector<2x128xf32>
    %cst_71 = arith.constant 1.000000e+00 : f32
    %387 = vector.broadcast %cst_71 : f32 to vector<2x128xf32>
    %388 = arith.addf %387, %386 : vector<2x128xf32>
    %389 = arith.divf %387, %388 : vector<2x128xf32>
    %390 = math.tanh %384 : vector<2x128xf32>
    %391 = vector.extract_strided_slice %389 {offsets = [0, 0], sizes = [2, 32], strides = [1, 1]} : vector<2x128xf32> to vector<2x32xf32>
    %392 = vector.extract_strided_slice %389 {offsets = [0, 32], sizes = [2, 32], strides = [1, 1]} : vector<2x128xf32> to vector<2x32xf32>
    %393 = vector.extract_strided_slice %390 {offsets = [0, 64], sizes = [2, 32], strides = [1, 1]} : vector<2x128xf32> to vector<2x32xf32>
    %394 = vector.extract_strided_slice %389 {offsets = [0, 96], sizes = [2, 32], strides = [1, 1]} : vector<2x128xf32> to vector<2x32xf32>
    %395 = arith.mulf %392, %377 : vector<2x32xf32>
    %396 = arith.mulf %391, %393 : vector<2x32xf32>
    %397 = arith.addf %395, %396 : vector<2x32xf32>
    %398 = math.tanh %397 : vector<2x32xf32>
    %399 = arith.mulf %394, %398 : vector<2x32xf32>
    %400 = vector.extract_strided_slice %356 {offsets = [2, 0], sizes = [1, 128], strides = [1, 1]} : vector<60x128xf32> to vector<1x128xf32>
    %401 = vector.extract_strided_slice %356 {offsets = [32, 0], sizes = [1, 128], strides = [1, 1]} : vector<60x128xf32> to vector<1x128xf32>
    %402 = tpu.concatenate %400, %401 in 0 : vector<1x128xf32>, vector<1x128xf32> -> vector<2x128xf32>
    %cst_72 = arith.constant dense<0.000000e+00> : vector<2x128xf32>
    %403 = tpu.matmul %399, %357, %cst_72 {dimension_numbers = #tpu.dot_dimension_numbers<[1], [0], [0], [1], [0, 0, 1, 1], [], []>} : vector<2x32xf32>, vector<32x128xf32>, vector<2x128xf32> -> vector<2x128xf32>
    %404 = arith.addf %402, %403 : vector<2x128xf32>
    %405 = arith.negf %404 : vector<2x128xf32>
    %406 = math.exp %405 : vector<2x128xf32>
    %cst_73 = arith.constant 1.000000e+00 : f32
    %407 = vector.broadcast %cst_73 : f32 to vector<2x128xf32>
    %408 = arith.addf %407, %406 : vector<2x128xf32>
    %409 = arith.divf %407, %408 : vector<2x128xf32>
    %410 = math.tanh %404 : vector<2x128xf32>
    %411 = vector.extract_strided_slice %409 {offsets = [0, 0], sizes = [2, 32], strides = [1, 1]} : vector<2x128xf32> to vector<2x32xf32>
    %412 = vector.extract_strided_slice %409 {offsets = [0, 32], sizes = [2, 32], strides = [1, 1]} : vector<2x128xf32> to vector<2x32xf32>
    %413 = vector.extract_strided_slice %410 {offsets = [0, 64], sizes = [2, 32], strides = [1, 1]} : vector<2x128xf32> to vector<2x32xf32>
    %414 = vector.extract_strided_slice %409 {offsets = [0, 96], sizes = [2, 32], strides = [1, 1]} : vector<2x128xf32> to vector<2x32xf32>
    %415 = arith.mulf %412, %397 : vector<2x32xf32>
    %416 = arith.mulf %411, %413 : vector<2x32xf32>
    %417 = arith.addf %415, %416 : vector<2x32xf32>
    %418 = math.tanh %417 : vector<2x32xf32>
    %419 = arith.mulf %414, %418 : vector<2x32xf32>
    %420 = vector.extract_strided_slice %356 {offsets = [3, 0], sizes = [1, 128], strides = [1, 1]} : vector<60x128xf32> to vector<1x128xf32>
    %421 = vector.extract_strided_slice %356 {offsets = [33, 0], sizes = [1, 128], strides = [1, 1]} : vector<60x128xf32> to vector<1x128xf32>
    %422 = tpu.concatenate %420, %421 in 0 : vector<1x128xf32>, vector<1x128xf32> -> vector<2x128xf32>
    %cst_74 = arith.constant dense<0.000000e+00> : vector<2x128xf32>
    %423 = tpu.matmul %419, %357, %cst_74 {dimension_numbers = #tpu.dot_dimension_numbers<[1], [0], [0], [1], [0, 0, 1, 1], [], []>} : vector<2x32xf32>, vector<32x128xf32>, vector<2x128xf32> -> vector<2x128xf32>
    %424 = arith.addf %422, %423 : vector<2x128xf32>
    %425 = arith.negf %424 : vector<2x128xf32>
    %426 = math.exp %425 : vector<2x128xf32>
    %cst_75 = arith.constant 1.000000e+00 : f32
    %427 = vector.broadcast %cst_75 : f32 to vector<2x128xf32>
    %428 = arith.addf %427, %426 : vector<2x128xf32>
    %429 = arith.divf %427, %428 : vector<2x128xf32>
    %430 = math.tanh %424 : vector<2x128xf32>
    %431 = vector.extract_strided_slice %429 {offsets = [0, 0], sizes = [2, 32], strides = [1, 1]} : vector<2x128xf32> to vector<2x32xf32>
    %432 = vector.extract_strided_slice %429 {offsets = [0, 32], sizes = [2, 32], strides = [1, 1]} : vector<2x128xf32> to vector<2x32xf32>
    %433 = vector.extract_strided_slice %430 {offsets = [0, 64], sizes = [2, 32], strides = [1, 1]} : vector<2x128xf32> to vector<2x32xf32>
    %434 = vector.extract_strided_slice %429 {offsets = [0, 96], sizes = [2, 32], strides = [1, 1]} : vector<2x128xf32> to vector<2x32xf32>
    %435 = arith.mulf %432, %417 : vector<2x32xf32>
    %436 = arith.mulf %431, %433 : vector<2x32xf32>
    %437 = arith.addf %435, %436 : vector<2x32xf32>
    %438 = math.tanh %437 : vector<2x32xf32>
    %439 = arith.mulf %434, %438 : vector<2x32xf32>
    %440 = vector.extract_strided_slice %356 {offsets = [4, 0], sizes = [1, 128], strides = [1, 1]} : vector<60x128xf32> to vector<1x128xf32>
    %441 = vector.extract_strided_slice %356 {offsets = [34, 0], sizes = [1, 128], strides = [1, 1]} : vector<60x128xf32> to vector<1x128xf32>
    %442 = tpu.concatenate %440, %441 in 0 : vector<1x128xf32>, vector<1x128xf32> -> vector<2x128xf32>
    %cst_76 = arith.constant dense<0.000000e+00> : vector<2x128xf32>
    %443 = tpu.matmul %439, %357, %cst_76 {dimension_numbers = #tpu.dot_dimension_numbers<[1], [0], [0], [1], [0, 0, 1, 1], [], []>} : vector<2x32xf32>, vector<32x128xf32>, vector<2x128xf32> -> vector<2x128xf32>
    %444 = arith.addf %442, %443 : vector<2x128xf32>
    %445 = arith.negf %444 : vector<2x128xf32>
    %446 = math.exp %445 : vector<2x128xf32>
    %cst_77 = arith.constant 1.000000e+00 : f32
    %447 = vector.broadcast %cst_77 : f32 to vector<2x128xf32>
    %448 = arith.addf %447, %446 : vector<2x128xf32>
    %449 = arith.divf %447, %448 : vector<2x128xf32>
    %450 = math.tanh %444 : vector<2x128xf32>
    %451 = vector.extract_strided_slice %449 {offsets = [0, 0], sizes = [2, 32], strides = [1, 1]} : vector<2x128xf32> to vector<2x32xf32>
    %452 = vector.extract_strided_slice %449 {offsets = [0, 32], sizes = [2, 32], strides = [1, 1]} : vector<2x128xf32> to vector<2x32xf32>
    %453 = vector.extract_strided_slice %450 {offsets = [0, 64], sizes = [2, 32], strides = [1, 1]} : vector<2x128xf32> to vector<2x32xf32>
    %454 = vector.extract_strided_slice %449 {offsets = [0, 96], sizes = [2, 32], strides = [1, 1]} : vector<2x128xf32> to vector<2x32xf32>
    %455 = arith.mulf %452, %437 : vector<2x32xf32>
    %456 = arith.mulf %451, %453 : vector<2x32xf32>
    %457 = arith.addf %455, %456 : vector<2x32xf32>
    %458 = math.tanh %457 : vector<2x32xf32>
    %459 = arith.mulf %454, %458 : vector<2x32xf32>
    %460 = vector.extract_strided_slice %356 {offsets = [5, 0], sizes = [1, 128], strides = [1, 1]} : vector<60x128xf32> to vector<1x128xf32>
    %461 = vector.extract_strided_slice %356 {offsets = [35, 0], sizes = [1, 128], strides = [1, 1]} : vector<60x128xf32> to vector<1x128xf32>
    %462 = tpu.concatenate %460, %461 in 0 : vector<1x128xf32>, vector<1x128xf32> -> vector<2x128xf32>
    %cst_78 = arith.constant dense<0.000000e+00> : vector<2x128xf32>
    %463 = tpu.matmul %459, %357, %cst_78 {dimension_numbers = #tpu.dot_dimension_numbers<[1], [0], [0], [1], [0, 0, 1, 1], [], []>} : vector<2x32xf32>, vector<32x128xf32>, vector<2x128xf32> -> vector<2x128xf32>
    %464 = arith.addf %462, %463 : vector<2x128xf32>
    %465 = arith.negf %464 : vector<2x128xf32>
    %466 = math.exp %465 : vector<2x128xf32>
    %cst_79 = arith.constant 1.000000e+00 : f32
    %467 = vector.broadcast %cst_79 : f32 to vector<2x128xf32>
    %468 = arith.addf %467, %466 : vector<2x128xf32>
    %469 = arith.divf %467, %468 : vector<2x128xf32>
    %470 = math.tanh %464 : vector<2x128xf32>
    %471 = vector.extract_strided_slice %469 {offsets = [0, 0], sizes = [2, 32], strides = [1, 1]} : vector<2x128xf32> to vector<2x32xf32>
    %472 = vector.extract_strided_slice %469 {offsets = [0, 32], sizes = [2, 32], strides = [1, 1]} : vector<2x128xf32> to vector<2x32xf32>
    %473 = vector.extract_strided_slice %470 {offsets = [0, 64], sizes = [2, 32], strides = [1, 1]} : vector<2x128xf32> to vector<2x32xf32>
    %474 = vector.extract_strided_slice %469 {offsets = [0, 96], sizes = [2, 32], strides = [1, 1]} : vector<2x128xf32> to vector<2x32xf32>
    %475 = arith.mulf %472, %457 : vector<2x32xf32>
    %476 = arith.mulf %471, %473 : vector<2x32xf32>
    %477 = arith.addf %475, %476 : vector<2x32xf32>
    %478 = math.tanh %477 : vector<2x32xf32>
    %479 = arith.mulf %474, %478 : vector<2x32xf32>
    %480 = vector.extract_strided_slice %356 {offsets = [6, 0], sizes = [1, 128], strides = [1, 1]} : vector<60x128xf32> to vector<1x128xf32>
    %481 = vector.extract_strided_slice %356 {offsets = [36, 0], sizes = [1, 128], strides = [1, 1]} : vector<60x128xf32> to vector<1x128xf32>
    %482 = tpu.concatenate %480, %481 in 0 : vector<1x128xf32>, vector<1x128xf32> -> vector<2x128xf32>
    %cst_80 = arith.constant dense<0.000000e+00> : vector<2x128xf32>
    %483 = tpu.matmul %479, %357, %cst_80 {dimension_numbers = #tpu.dot_dimension_numbers<[1], [0], [0], [1], [0, 0, 1, 1], [], []>} : vector<2x32xf32>, vector<32x128xf32>, vector<2x128xf32> -> vector<2x128xf32>
    %484 = arith.addf %482, %483 : vector<2x128xf32>
    %485 = arith.negf %484 : vector<2x128xf32>
    %486 = math.exp %485 : vector<2x128xf32>
    %cst_81 = arith.constant 1.000000e+00 : f32
    %487 = vector.broadcast %cst_81 : f32 to vector<2x128xf32>
    %488 = arith.addf %487, %486 : vector<2x128xf32>
    %489 = arith.divf %487, %488 : vector<2x128xf32>
    %490 = math.tanh %484 : vector<2x128xf32>
    %491 = vector.extract_strided_slice %489 {offsets = [0, 0], sizes = [2, 32], strides = [1, 1]} : vector<2x128xf32> to vector<2x32xf32>
    %492 = vector.extract_strided_slice %489 {offsets = [0, 32], sizes = [2, 32], strides = [1, 1]} : vector<2x128xf32> to vector<2x32xf32>
    %493 = vector.extract_strided_slice %490 {offsets = [0, 64], sizes = [2, 32], strides = [1, 1]} : vector<2x128xf32> to vector<2x32xf32>
    %494 = vector.extract_strided_slice %489 {offsets = [0, 96], sizes = [2, 32], strides = [1, 1]} : vector<2x128xf32> to vector<2x32xf32>
    %495 = arith.mulf %492, %477 : vector<2x32xf32>
    %496 = arith.mulf %491, %493 : vector<2x32xf32>
    %497 = arith.addf %495, %496 : vector<2x32xf32>
    %498 = math.tanh %497 : vector<2x32xf32>
    %499 = arith.mulf %494, %498 : vector<2x32xf32>
    %500 = vector.extract_strided_slice %356 {offsets = [7, 0], sizes = [1, 128], strides = [1, 1]} : vector<60x128xf32> to vector<1x128xf32>
    %501 = vector.extract_strided_slice %356 {offsets = [37, 0], sizes = [1, 128], strides = [1, 1]} : vector<60x128xf32> to vector<1x128xf32>
    %502 = tpu.concatenate %500, %501 in 0 : vector<1x128xf32>, vector<1x128xf32> -> vector<2x128xf32>
    %cst_82 = arith.constant dense<0.000000e+00> : vector<2x128xf32>
    %503 = tpu.matmul %499, %357, %cst_82 {dimension_numbers = #tpu.dot_dimension_numbers<[1], [0], [0], [1], [0, 0, 1, 1], [], []>} : vector<2x32xf32>, vector<32x128xf32>, vector<2x128xf32> -> vector<2x128xf32>
    %504 = arith.addf %502, %503 : vector<2x128xf32>
    %505 = arith.negf %504 : vector<2x128xf32>
    %506 = math.exp %505 : vector<2x128xf32>
    %cst_83 = arith.constant 1.000000e+00 : f32
    %507 = vector.broadcast %cst_83 : f32 to vector<2x128xf32>
    %508 = arith.addf %507, %506 : vector<2x128xf32>
    %509 = arith.divf %507, %508 : vector<2x128xf32>
    %510 = math.tanh %504 : vector<2x128xf32>
    %511 = vector.extract_strided_slice %509 {offsets = [0, 0], sizes = [2, 32], strides = [1, 1]} : vector<2x128xf32> to vector<2x32xf32>
    %512 = vector.extract_strided_slice %509 {offsets = [0, 32], sizes = [2, 32], strides = [1, 1]} : vector<2x128xf32> to vector<2x32xf32>
    %513 = vector.extract_strided_slice %510 {offsets = [0, 64], sizes = [2, 32], strides = [1, 1]} : vector<2x128xf32> to vector<2x32xf32>
    %514 = vector.extract_strided_slice %509 {offsets = [0, 96], sizes = [2, 32], strides = [1, 1]} : vector<2x128xf32> to vector<2x32xf32>
    %515 = arith.mulf %512, %497 : vector<2x32xf32>
    %516 = arith.mulf %511, %513 : vector<2x32xf32>
    %517 = arith.addf %515, %516 : vector<2x32xf32>
    %518 = math.tanh %517 : vector<2x32xf32>
    %519 = arith.mulf %514, %518 : vector<2x32xf32>
    %520 = vector.extract_strided_slice %356 {offsets = [8, 0], sizes = [1, 128], strides = [1, 1]} : vector<60x128xf32> to vector<1x128xf32>
    %521 = vector.extract_strided_slice %356 {offsets = [38, 0], sizes = [1, 128], strides = [1, 1]} : vector<60x128xf32> to vector<1x128xf32>
    %522 = tpu.concatenate %520, %521 in 0 : vector<1x128xf32>, vector<1x128xf32> -> vector<2x128xf32>
    %cst_84 = arith.constant dense<0.000000e+00> : vector<2x128xf32>
    %523 = tpu.matmul %519, %357, %cst_84 {dimension_numbers = #tpu.dot_dimension_numbers<[1], [0], [0], [1], [0, 0, 1, 1], [], []>} : vector<2x32xf32>, vector<32x128xf32>, vector<2x128xf32> -> vector<2x128xf32>
    %524 = arith.addf %522, %523 : vector<2x128xf32>
    %525 = arith.negf %524 : vector<2x128xf32>
    %526 = math.exp %525 : vector<2x128xf32>
    %cst_85 = arith.constant 1.000000e+00 : f32
    %527 = vector.broadcast %cst_85 : f32 to vector<2x128xf32>
    %528 = arith.addf %527, %526 : vector<2x128xf32>
    %529 = arith.divf %527, %528 : vector<2x128xf32>
    %530 = math.tanh %524 : vector<2x128xf32>
    %531 = vector.extract_strided_slice %529 {offsets = [0, 0], sizes = [2, 32], strides = [1, 1]} : vector<2x128xf32> to vector<2x32xf32>
    %532 = vector.extract_strided_slice %529 {offsets = [0, 32], sizes = [2, 32], strides = [1, 1]} : vector<2x128xf32> to vector<2x32xf32>
    %533 = vector.extract_strided_slice %530 {offsets = [0, 64], sizes = [2, 32], strides = [1, 1]} : vector<2x128xf32> to vector<2x32xf32>
    %534 = vector.extract_strided_slice %529 {offsets = [0, 96], sizes = [2, 32], strides = [1, 1]} : vector<2x128xf32> to vector<2x32xf32>
    %535 = arith.mulf %532, %517 : vector<2x32xf32>
    %536 = arith.mulf %531, %533 : vector<2x32xf32>
    %537 = arith.addf %535, %536 : vector<2x32xf32>
    %538 = math.tanh %537 : vector<2x32xf32>
    %539 = arith.mulf %534, %538 : vector<2x32xf32>
    %540 = vector.extract_strided_slice %356 {offsets = [9, 0], sizes = [1, 128], strides = [1, 1]} : vector<60x128xf32> to vector<1x128xf32>
    %541 = vector.extract_strided_slice %356 {offsets = [39, 0], sizes = [1, 128], strides = [1, 1]} : vector<60x128xf32> to vector<1x128xf32>
    %542 = tpu.concatenate %540, %541 in 0 : vector<1x128xf32>, vector<1x128xf32> -> vector<2x128xf32>
    %cst_86 = arith.constant dense<0.000000e+00> : vector<2x128xf32>
    %543 = tpu.matmul %539, %357, %cst_86 {dimension_numbers = #tpu.dot_dimension_numbers<[1], [0], [0], [1], [0, 0, 1, 1], [], []>} : vector<2x32xf32>, vector<32x128xf32>, vector<2x128xf32> -> vector<2x128xf32>
    %544 = arith.addf %542, %543 : vector<2x128xf32>
    %545 = arith.negf %544 : vector<2x128xf32>
    %546 = math.exp %545 : vector<2x128xf32>
    %cst_87 = arith.constant 1.000000e+00 : f32
    %547 = vector.broadcast %cst_87 : f32 to vector<2x128xf32>
    %548 = arith.addf %547, %546 : vector<2x128xf32>
    %549 = arith.divf %547, %548 : vector<2x128xf32>
    %550 = math.tanh %544 : vector<2x128xf32>
    %551 = vector.extract_strided_slice %549 {offsets = [0, 0], sizes = [2, 32], strides = [1, 1]} : vector<2x128xf32> to vector<2x32xf32>
    %552 = vector.extract_strided_slice %549 {offsets = [0, 32], sizes = [2, 32], strides = [1, 1]} : vector<2x128xf32> to vector<2x32xf32>
    %553 = vector.extract_strided_slice %550 {offsets = [0, 64], sizes = [2, 32], strides = [1, 1]} : vector<2x128xf32> to vector<2x32xf32>
    %554 = vector.extract_strided_slice %549 {offsets = [0, 96], sizes = [2, 32], strides = [1, 1]} : vector<2x128xf32> to vector<2x32xf32>
    %555 = arith.mulf %552, %537 : vector<2x32xf32>
    %556 = arith.mulf %551, %553 : vector<2x32xf32>
    %557 = arith.addf %555, %556 : vector<2x32xf32>
    %558 = math.tanh %557 : vector<2x32xf32>
    %559 = arith.mulf %554, %558 : vector<2x32xf32>
    %560 = vector.extract_strided_slice %356 {offsets = [10, 0], sizes = [1, 128], strides = [1, 1]} : vector<60x128xf32> to vector<1x128xf32>
    %561 = vector.extract_strided_slice %356 {offsets = [40, 0], sizes = [1, 128], strides = [1, 1]} : vector<60x128xf32> to vector<1x128xf32>
    %562 = tpu.concatenate %560, %561 in 0 : vector<1x128xf32>, vector<1x128xf32> -> vector<2x128xf32>
    %cst_88 = arith.constant dense<0.000000e+00> : vector<2x128xf32>
    %563 = tpu.matmul %559, %357, %cst_88 {dimension_numbers = #tpu.dot_dimension_numbers<[1], [0], [0], [1], [0, 0, 1, 1], [], []>} : vector<2x32xf32>, vector<32x128xf32>, vector<2x128xf32> -> vector<2x128xf32>
    %564 = arith.addf %562, %563 : vector<2x128xf32>
    %565 = arith.negf %564 : vector<2x128xf32>
    %566 = math.exp %565 : vector<2x128xf32>
    %cst_89 = arith.constant 1.000000e+00 : f32
    %567 = vector.broadcast %cst_89 : f32 to vector<2x128xf32>
    %568 = arith.addf %567, %566 : vector<2x128xf32>
    %569 = arith.divf %567, %568 : vector<2x128xf32>
    %570 = math.tanh %564 : vector<2x128xf32>
    %571 = vector.extract_strided_slice %569 {offsets = [0, 0], sizes = [2, 32], strides = [1, 1]} : vector<2x128xf32> to vector<2x32xf32>
    %572 = vector.extract_strided_slice %569 {offsets = [0, 32], sizes = [2, 32], strides = [1, 1]} : vector<2x128xf32> to vector<2x32xf32>
    %573 = vector.extract_strided_slice %570 {offsets = [0, 64], sizes = [2, 32], strides = [1, 1]} : vector<2x128xf32> to vector<2x32xf32>
    %574 = vector.extract_strided_slice %569 {offsets = [0, 96], sizes = [2, 32], strides = [1, 1]} : vector<2x128xf32> to vector<2x32xf32>
    %575 = arith.mulf %572, %557 : vector<2x32xf32>
    %576 = arith.mulf %571, %573 : vector<2x32xf32>
    %577 = arith.addf %575, %576 : vector<2x32xf32>
    %578 = math.tanh %577 : vector<2x32xf32>
    %579 = arith.mulf %574, %578 : vector<2x32xf32>
    %580 = vector.extract_strided_slice %356 {offsets = [11, 0], sizes = [1, 128], strides = [1, 1]} : vector<60x128xf32> to vector<1x128xf32>
    %581 = vector.extract_strided_slice %356 {offsets = [41, 0], sizes = [1, 128], strides = [1, 1]} : vector<60x128xf32> to vector<1x128xf32>
    %582 = tpu.concatenate %580, %581 in 0 : vector<1x128xf32>, vector<1x128xf32> -> vector<2x128xf32>
    %cst_90 = arith.constant dense<0.000000e+00> : vector<2x128xf32>
    %583 = tpu.matmul %579, %357, %cst_90 {dimension_numbers = #tpu.dot_dimension_numbers<[1], [0], [0], [1], [0, 0, 1, 1], [], []>} : vector<2x32xf32>, vector<32x128xf32>, vector<2x128xf32> -> vector<2x128xf32>
    %584 = arith.addf %582, %583 : vector<2x128xf32>
    %585 = arith.negf %584 : vector<2x128xf32>
    %586 = math.exp %585 : vector<2x128xf32>
    %cst_91 = arith.constant 1.000000e+00 : f32
    %587 = vector.broadcast %cst_91 : f32 to vector<2x128xf32>
    %588 = arith.addf %587, %586 : vector<2x128xf32>
    %589 = arith.divf %587, %588 : vector<2x128xf32>
    %590 = math.tanh %584 : vector<2x128xf32>
    %591 = vector.extract_strided_slice %589 {offsets = [0, 0], sizes = [2, 32], strides = [1, 1]} : vector<2x128xf32> to vector<2x32xf32>
    %592 = vector.extract_strided_slice %589 {offsets = [0, 32], sizes = [2, 32], strides = [1, 1]} : vector<2x128xf32> to vector<2x32xf32>
    %593 = vector.extract_strided_slice %590 {offsets = [0, 64], sizes = [2, 32], strides = [1, 1]} : vector<2x128xf32> to vector<2x32xf32>
    %594 = vector.extract_strided_slice %589 {offsets = [0, 96], sizes = [2, 32], strides = [1, 1]} : vector<2x128xf32> to vector<2x32xf32>
    %595 = arith.mulf %592, %577 : vector<2x32xf32>
    %596 = arith.mulf %591, %593 : vector<2x32xf32>
    %597 = arith.addf %595, %596 : vector<2x32xf32>
    %598 = math.tanh %597 : vector<2x32xf32>
    %599 = arith.mulf %594, %598 : vector<2x32xf32>
    %600 = vector.extract_strided_slice %356 {offsets = [12, 0], sizes = [1, 128], strides = [1, 1]} : vector<60x128xf32> to vector<1x128xf32>
    %601 = vector.extract_strided_slice %356 {offsets = [42, 0], sizes = [1, 128], strides = [1, 1]} : vector<60x128xf32> to vector<1x128xf32>
    %602 = tpu.concatenate %600, %601 in 0 : vector<1x128xf32>, vector<1x128xf32> -> vector<2x128xf32>
    %cst_92 = arith.constant dense<0.000000e+00> : vector<2x128xf32>
    %603 = tpu.matmul %599, %357, %cst_92 {dimension_numbers = #tpu.dot_dimension_numbers<[1], [0], [0], [1], [0, 0, 1, 1], [], []>} : vector<2x32xf32>, vector<32x128xf32>, vector<2x128xf32> -> vector<2x128xf32>
    %604 = arith.addf %602, %603 : vector<2x128xf32>
    %605 = arith.negf %604 : vector<2x128xf32>
    %606 = math.exp %605 : vector<2x128xf32>
    %cst_93 = arith.constant 1.000000e+00 : f32
    %607 = vector.broadcast %cst_93 : f32 to vector<2x128xf32>
    %608 = arith.addf %607, %606 : vector<2x128xf32>
    %609 = arith.divf %607, %608 : vector<2x128xf32>
    %610 = math.tanh %604 : vector<2x128xf32>
    %611 = vector.extract_strided_slice %609 {offsets = [0, 0], sizes = [2, 32], strides = [1, 1]} : vector<2x128xf32> to vector<2x32xf32>
    %612 = vector.extract_strided_slice %609 {offsets = [0, 32], sizes = [2, 32], strides = [1, 1]} : vector<2x128xf32> to vector<2x32xf32>
    %613 = vector.extract_strided_slice %610 {offsets = [0, 64], sizes = [2, 32], strides = [1, 1]} : vector<2x128xf32> to vector<2x32xf32>
    %614 = vector.extract_strided_slice %609 {offsets = [0, 96], sizes = [2, 32], strides = [1, 1]} : vector<2x128xf32> to vector<2x32xf32>
    %615 = arith.mulf %612, %597 : vector<2x32xf32>
    %616 = arith.mulf %611, %613 : vector<2x32xf32>
    %617 = arith.addf %615, %616 : vector<2x32xf32>
    %618 = math.tanh %617 : vector<2x32xf32>
    %619 = arith.mulf %614, %618 : vector<2x32xf32>
    %620 = vector.extract_strided_slice %356 {offsets = [13, 0], sizes = [1, 128], strides = [1, 1]} : vector<60x128xf32> to vector<1x128xf32>
    %621 = vector.extract_strided_slice %356 {offsets = [43, 0], sizes = [1, 128], strides = [1, 1]} : vector<60x128xf32> to vector<1x128xf32>
    %622 = tpu.concatenate %620, %621 in 0 : vector<1x128xf32>, vector<1x128xf32> -> vector<2x128xf32>
    %cst_94 = arith.constant dense<0.000000e+00> : vector<2x128xf32>
    %623 = tpu.matmul %619, %357, %cst_94 {dimension_numbers = #tpu.dot_dimension_numbers<[1], [0], [0], [1], [0, 0, 1, 1], [], []>} : vector<2x32xf32>, vector<32x128xf32>, vector<2x128xf32> -> vector<2x128xf32>
    %624 = arith.addf %622, %623 : vector<2x128xf32>
    %625 = arith.negf %624 : vector<2x128xf32>
    %626 = math.exp %625 : vector<2x128xf32>
    %cst_95 = arith.constant 1.000000e+00 : f32
    %627 = vector.broadcast %cst_95 : f32 to vector<2x128xf32>
    %628 = arith.addf %627, %626 : vector<2x128xf32>
    %629 = arith.divf %627, %628 : vector<2x128xf32>
    %630 = math.tanh %624 : vector<2x128xf32>
    %631 = vector.extract_strided_slice %629 {offsets = [0, 0], sizes = [2, 32], strides = [1, 1]} : vector<2x128xf32> to vector<2x32xf32>
    %632 = vector.extract_strided_slice %629 {offsets = [0, 32], sizes = [2, 32], strides = [1, 1]} : vector<2x128xf32> to vector<2x32xf32>
    %633 = vector.extract_strided_slice %630 {offsets = [0, 64], sizes = [2, 32], strides = [1, 1]} : vector<2x128xf32> to vector<2x32xf32>
    %634 = vector.extract_strided_slice %629 {offsets = [0, 96], sizes = [2, 32], strides = [1, 1]} : vector<2x128xf32> to vector<2x32xf32>
    %635 = arith.mulf %632, %617 : vector<2x32xf32>
    %636 = arith.mulf %631, %633 : vector<2x32xf32>
    %637 = arith.addf %635, %636 : vector<2x32xf32>
    %638 = math.tanh %637 : vector<2x32xf32>
    %639 = arith.mulf %634, %638 : vector<2x32xf32>
    %640 = vector.extract_strided_slice %356 {offsets = [14, 0], sizes = [1, 128], strides = [1, 1]} : vector<60x128xf32> to vector<1x128xf32>
    %641 = vector.extract_strided_slice %356 {offsets = [44, 0], sizes = [1, 128], strides = [1, 1]} : vector<60x128xf32> to vector<1x128xf32>
    %642 = tpu.concatenate %640, %641 in 0 : vector<1x128xf32>, vector<1x128xf32> -> vector<2x128xf32>
    %cst_96 = arith.constant dense<0.000000e+00> : vector<2x128xf32>
    %643 = tpu.matmul %639, %357, %cst_96 {dimension_numbers = #tpu.dot_dimension_numbers<[1], [0], [0], [1], [0, 0, 1, 1], [], []>} : vector<2x32xf32>, vector<32x128xf32>, vector<2x128xf32> -> vector<2x128xf32>
    %644 = arith.addf %642, %643 : vector<2x128xf32>
    %645 = arith.negf %644 : vector<2x128xf32>
    %646 = math.exp %645 : vector<2x128xf32>
    %cst_97 = arith.constant 1.000000e+00 : f32
    %647 = vector.broadcast %cst_97 : f32 to vector<2x128xf32>
    %648 = arith.addf %647, %646 : vector<2x128xf32>
    %649 = arith.divf %647, %648 : vector<2x128xf32>
    %650 = math.tanh %644 : vector<2x128xf32>
    %651 = vector.extract_strided_slice %649 {offsets = [0, 0], sizes = [2, 32], strides = [1, 1]} : vector<2x128xf32> to vector<2x32xf32>
    %652 = vector.extract_strided_slice %649 {offsets = [0, 32], sizes = [2, 32], strides = [1, 1]} : vector<2x128xf32> to vector<2x32xf32>
    %653 = vector.extract_strided_slice %650 {offsets = [0, 64], sizes = [2, 32], strides = [1, 1]} : vector<2x128xf32> to vector<2x32xf32>
    %654 = vector.extract_strided_slice %649 {offsets = [0, 96], sizes = [2, 32], strides = [1, 1]} : vector<2x128xf32> to vector<2x32xf32>
    %655 = arith.mulf %652, %637 : vector<2x32xf32>
    %656 = arith.mulf %651, %653 : vector<2x32xf32>
    %657 = arith.addf %655, %656 : vector<2x32xf32>
    %658 = math.tanh %657 : vector<2x32xf32>
    %659 = arith.mulf %654, %658 : vector<2x32xf32>
    %660 = vector.extract_strided_slice %356 {offsets = [15, 0], sizes = [1, 128], strides = [1, 1]} : vector<60x128xf32> to vector<1x128xf32>
    %661 = vector.extract_strided_slice %356 {offsets = [45, 0], sizes = [1, 128], strides = [1, 1]} : vector<60x128xf32> to vector<1x128xf32>
    %662 = tpu.concatenate %660, %661 in 0 : vector<1x128xf32>, vector<1x128xf32> -> vector<2x128xf32>
    %cst_98 = arith.constant dense<0.000000e+00> : vector<2x128xf32>
    %663 = tpu.matmul %659, %357, %cst_98 {dimension_numbers = #tpu.dot_dimension_numbers<[1], [0], [0], [1], [0, 0, 1, 1], [], []>} : vector<2x32xf32>, vector<32x128xf32>, vector<2x128xf32> -> vector<2x128xf32>
    %664 = arith.addf %662, %663 : vector<2x128xf32>
    %665 = arith.negf %664 : vector<2x128xf32>
    %666 = math.exp %665 : vector<2x128xf32>
    %cst_99 = arith.constant 1.000000e+00 : f32
    %667 = vector.broadcast %cst_99 : f32 to vector<2x128xf32>
    %668 = arith.addf %667, %666 : vector<2x128xf32>
    %669 = arith.divf %667, %668 : vector<2x128xf32>
    %670 = math.tanh %664 : vector<2x128xf32>
    %671 = vector.extract_strided_slice %669 {offsets = [0, 0], sizes = [2, 32], strides = [1, 1]} : vector<2x128xf32> to vector<2x32xf32>
    %672 = vector.extract_strided_slice %669 {offsets = [0, 32], sizes = [2, 32], strides = [1, 1]} : vector<2x128xf32> to vector<2x32xf32>
    %673 = vector.extract_strided_slice %670 {offsets = [0, 64], sizes = [2, 32], strides = [1, 1]} : vector<2x128xf32> to vector<2x32xf32>
    %674 = vector.extract_strided_slice %669 {offsets = [0, 96], sizes = [2, 32], strides = [1, 1]} : vector<2x128xf32> to vector<2x32xf32>
    %675 = arith.mulf %672, %657 : vector<2x32xf32>
    %676 = arith.mulf %671, %673 : vector<2x32xf32>
    %677 = arith.addf %675, %676 : vector<2x32xf32>
    %678 = math.tanh %677 : vector<2x32xf32>
    %679 = arith.mulf %674, %678 : vector<2x32xf32>
    %680 = vector.extract_strided_slice %356 {offsets = [16, 0], sizes = [1, 128], strides = [1, 1]} : vector<60x128xf32> to vector<1x128xf32>
    %681 = vector.extract_strided_slice %356 {offsets = [46, 0], sizes = [1, 128], strides = [1, 1]} : vector<60x128xf32> to vector<1x128xf32>
    %682 = tpu.concatenate %680, %681 in 0 : vector<1x128xf32>, vector<1x128xf32> -> vector<2x128xf32>
    %cst_100 = arith.constant dense<0.000000e+00> : vector<2x128xf32>
    %683 = tpu.matmul %679, %357, %cst_100 {dimension_numbers = #tpu.dot_dimension_numbers<[1], [0], [0], [1], [0, 0, 1, 1], [], []>} : vector<2x32xf32>, vector<32x128xf32>, vector<2x128xf32> -> vector<2x128xf32>
    %684 = arith.addf %682, %683 : vector<2x128xf32>
    %685 = arith.negf %684 : vector<2x128xf32>
    %686 = math.exp %685 : vector<2x128xf32>
    %cst_101 = arith.constant 1.000000e+00 : f32
    %687 = vector.broadcast %cst_101 : f32 to vector<2x128xf32>
    %688 = arith.addf %687, %686 : vector<2x128xf32>
    %689 = arith.divf %687, %688 : vector<2x128xf32>
    %690 = math.tanh %684 : vector<2x128xf32>
    %691 = vector.extract_strided_slice %689 {offsets = [0, 0], sizes = [2, 32], strides = [1, 1]} : vector<2x128xf32> to vector<2x32xf32>
    %692 = vector.extract_strided_slice %689 {offsets = [0, 32], sizes = [2, 32], strides = [1, 1]} : vector<2x128xf32> to vector<2x32xf32>
    %693 = vector.extract_strided_slice %690 {offsets = [0, 64], sizes = [2, 32], strides = [1, 1]} : vector<2x128xf32> to vector<2x32xf32>
    %694 = vector.extract_strided_slice %689 {offsets = [0, 96], sizes = [2, 32], strides = [1, 1]} : vector<2x128xf32> to vector<2x32xf32>
    %695 = arith.mulf %692, %677 : vector<2x32xf32>
    %696 = arith.mulf %691, %693 : vector<2x32xf32>
    %697 = arith.addf %695, %696 : vector<2x32xf32>
    %698 = math.tanh %697 : vector<2x32xf32>
    %699 = arith.mulf %694, %698 : vector<2x32xf32>
    %700 = vector.extract_strided_slice %356 {offsets = [17, 0], sizes = [1, 128], strides = [1, 1]} : vector<60x128xf32> to vector<1x128xf32>
    %701 = vector.extract_strided_slice %356 {offsets = [47, 0], sizes = [1, 128], strides = [1, 1]} : vector<60x128xf32> to vector<1x128xf32>
    %702 = tpu.concatenate %700, %701 in 0 : vector<1x128xf32>, vector<1x128xf32> -> vector<2x128xf32>
    %cst_102 = arith.constant dense<0.000000e+00> : vector<2x128xf32>
    %703 = tpu.matmul %699, %357, %cst_102 {dimension_numbers = #tpu.dot_dimension_numbers<[1], [0], [0], [1], [0, 0, 1, 1], [], []>} : vector<2x32xf32>, vector<32x128xf32>, vector<2x128xf32> -> vector<2x128xf32>
    %704 = arith.addf %702, %703 : vector<2x128xf32>
    %705 = arith.negf %704 : vector<2x128xf32>
    %706 = math.exp %705 : vector<2x128xf32>
    %cst_103 = arith.constant 1.000000e+00 : f32
    %707 = vector.broadcast %cst_103 : f32 to vector<2x128xf32>
    %708 = arith.addf %707, %706 : vector<2x128xf32>
    %709 = arith.divf %707, %708 : vector<2x128xf32>
    %710 = math.tanh %704 : vector<2x128xf32>
    %711 = vector.extract_strided_slice %709 {offsets = [0, 0], sizes = [2, 32], strides = [1, 1]} : vector<2x128xf32> to vector<2x32xf32>
    %712 = vector.extract_strided_slice %709 {offsets = [0, 32], sizes = [2, 32], strides = [1, 1]} : vector<2x128xf32> to vector<2x32xf32>
    %713 = vector.extract_strided_slice %710 {offsets = [0, 64], sizes = [2, 32], strides = [1, 1]} : vector<2x128xf32> to vector<2x32xf32>
    %714 = vector.extract_strided_slice %709 {offsets = [0, 96], sizes = [2, 32], strides = [1, 1]} : vector<2x128xf32> to vector<2x32xf32>
    %715 = arith.mulf %712, %697 : vector<2x32xf32>
    %716 = arith.mulf %711, %713 : vector<2x32xf32>
    %717 = arith.addf %715, %716 : vector<2x32xf32>
    %718 = math.tanh %717 : vector<2x32xf32>
    %719 = arith.mulf %714, %718 : vector<2x32xf32>
    %720 = vector.extract_strided_slice %356 {offsets = [18, 0], sizes = [1, 128], strides = [1, 1]} : vector<60x128xf32> to vector<1x128xf32>
    %721 = vector.extract_strided_slice %356 {offsets = [48, 0], sizes = [1, 128], strides = [1, 1]} : vector<60x128xf32> to vector<1x128xf32>
    %722 = tpu.concatenate %720, %721 in 0 : vector<1x128xf32>, vector<1x128xf32> -> vector<2x128xf32>
    %cst_104 = arith.constant dense<0.000000e+00> : vector<2x128xf32>
    %723 = tpu.matmul %719, %357, %cst_104 {dimension_numbers = #tpu.dot_dimension_numbers<[1], [0], [0], [1], [0, 0, 1, 1], [], []>} : vector<2x32xf32>, vector<32x128xf32>, vector<2x128xf32> -> vector<2x128xf32>
    %724 = arith.addf %722, %723 : vector<2x128xf32>
    %725 = arith.negf %724 : vector<2x128xf32>
    %726 = math.exp %725 : vector<2x128xf32>
    %cst_105 = arith.constant 1.000000e+00 : f32
    %727 = vector.broadcast %cst_105 : f32 to vector<2x128xf32>
    %728 = arith.addf %727, %726 : vector<2x128xf32>
    %729 = arith.divf %727, %728 : vector<2x128xf32>
    %730 = math.tanh %724 : vector<2x128xf32>
    %731 = vector.extract_strided_slice %729 {offsets = [0, 0], sizes = [2, 32], strides = [1, 1]} : vector<2x128xf32> to vector<2x32xf32>
    %732 = vector.extract_strided_slice %729 {offsets = [0, 32], sizes = [2, 32], strides = [1, 1]} : vector<2x128xf32> to vector<2x32xf32>
    %733 = vector.extract_strided_slice %730 {offsets = [0, 64], sizes = [2, 32], strides = [1, 1]} : vector<2x128xf32> to vector<2x32xf32>
    %734 = vector.extract_strided_slice %729 {offsets = [0, 96], sizes = [2, 32], strides = [1, 1]} : vector<2x128xf32> to vector<2x32xf32>
    %735 = arith.mulf %732, %717 : vector<2x32xf32>
    %736 = arith.mulf %731, %733 : vector<2x32xf32>
    %737 = arith.addf %735, %736 : vector<2x32xf32>
    %738 = math.tanh %737 : vector<2x32xf32>
    %739 = arith.mulf %734, %738 : vector<2x32xf32>
    %740 = vector.extract_strided_slice %356 {offsets = [19, 0], sizes = [1, 128], strides = [1, 1]} : vector<60x128xf32> to vector<1x128xf32>
    %741 = vector.extract_strided_slice %356 {offsets = [49, 0], sizes = [1, 128], strides = [1, 1]} : vector<60x128xf32> to vector<1x128xf32>
    %742 = tpu.concatenate %740, %741 in 0 : vector<1x128xf32>, vector<1x128xf32> -> vector<2x128xf32>
    %cst_106 = arith.constant dense<0.000000e+00> : vector<2x128xf32>
    %743 = tpu.matmul %739, %357, %cst_106 {dimension_numbers = #tpu.dot_dimension_numbers<[1], [0], [0], [1], [0, 0, 1, 1], [], []>} : vector<2x32xf32>, vector<32x128xf32>, vector<2x128xf32> -> vector<2x128xf32>
    %744 = arith.addf %742, %743 : vector<2x128xf32>
    %745 = arith.negf %744 : vector<2x128xf32>
    %746 = math.exp %745 : vector<2x128xf32>
    %cst_107 = arith.constant 1.000000e+00 : f32
    %747 = vector.broadcast %cst_107 : f32 to vector<2x128xf32>
    %748 = arith.addf %747, %746 : vector<2x128xf32>
    %749 = arith.divf %747, %748 : vector<2x128xf32>
    %750 = math.tanh %744 : vector<2x128xf32>
    %751 = vector.extract_strided_slice %749 {offsets = [0, 0], sizes = [2, 32], strides = [1, 1]} : vector<2x128xf32> to vector<2x32xf32>
    %752 = vector.extract_strided_slice %749 {offsets = [0, 32], sizes = [2, 32], strides = [1, 1]} : vector<2x128xf32> to vector<2x32xf32>
    %753 = vector.extract_strided_slice %750 {offsets = [0, 64], sizes = [2, 32], strides = [1, 1]} : vector<2x128xf32> to vector<2x32xf32>
    %754 = vector.extract_strided_slice %749 {offsets = [0, 96], sizes = [2, 32], strides = [1, 1]} : vector<2x128xf32> to vector<2x32xf32>
    %755 = arith.mulf %752, %737 : vector<2x32xf32>
    %756 = arith.mulf %751, %753 : vector<2x32xf32>
    %757 = arith.addf %755, %756 : vector<2x32xf32>
    %758 = math.tanh %757 : vector<2x32xf32>
    %759 = arith.mulf %754, %758 : vector<2x32xf32>
    %760 = vector.extract_strided_slice %356 {offsets = [20, 0], sizes = [1, 128], strides = [1, 1]} : vector<60x128xf32> to vector<1x128xf32>
    %761 = vector.extract_strided_slice %356 {offsets = [50, 0], sizes = [1, 128], strides = [1, 1]} : vector<60x128xf32> to vector<1x128xf32>
    %762 = tpu.concatenate %760, %761 in 0 : vector<1x128xf32>, vector<1x128xf32> -> vector<2x128xf32>
    %cst_108 = arith.constant dense<0.000000e+00> : vector<2x128xf32>
    %763 = tpu.matmul %759, %357, %cst_108 {dimension_numbers = #tpu.dot_dimension_numbers<[1], [0], [0], [1], [0, 0, 1, 1], [], []>} : vector<2x32xf32>, vector<32x128xf32>, vector<2x128xf32> -> vector<2x128xf32>
    %764 = arith.addf %762, %763 : vector<2x128xf32>
    %765 = arith.negf %764 : vector<2x128xf32>
    %766 = math.exp %765 : vector<2x128xf32>
    %cst_109 = arith.constant 1.000000e+00 : f32
    %767 = vector.broadcast %cst_109 : f32 to vector<2x128xf32>
    %768 = arith.addf %767, %766 : vector<2x128xf32>
    %769 = arith.divf %767, %768 : vector<2x128xf32>
    %770 = math.tanh %764 : vector<2x128xf32>
    %771 = vector.extract_strided_slice %769 {offsets = [0, 0], sizes = [2, 32], strides = [1, 1]} : vector<2x128xf32> to vector<2x32xf32>
    %772 = vector.extract_strided_slice %769 {offsets = [0, 32], sizes = [2, 32], strides = [1, 1]} : vector<2x128xf32> to vector<2x32xf32>
    %773 = vector.extract_strided_slice %770 {offsets = [0, 64], sizes = [2, 32], strides = [1, 1]} : vector<2x128xf32> to vector<2x32xf32>
    %774 = vector.extract_strided_slice %769 {offsets = [0, 96], sizes = [2, 32], strides = [1, 1]} : vector<2x128xf32> to vector<2x32xf32>
    %775 = arith.mulf %772, %757 : vector<2x32xf32>
    %776 = arith.mulf %771, %773 : vector<2x32xf32>
    %777 = arith.addf %775, %776 : vector<2x32xf32>
    %778 = math.tanh %777 : vector<2x32xf32>
    %779 = arith.mulf %774, %778 : vector<2x32xf32>
    %780 = vector.extract_strided_slice %356 {offsets = [21, 0], sizes = [1, 128], strides = [1, 1]} : vector<60x128xf32> to vector<1x128xf32>
    %781 = vector.extract_strided_slice %356 {offsets = [51, 0], sizes = [1, 128], strides = [1, 1]} : vector<60x128xf32> to vector<1x128xf32>
    %782 = tpu.concatenate %780, %781 in 0 : vector<1x128xf32>, vector<1x128xf32> -> vector<2x128xf32>
    %cst_110 = arith.constant dense<0.000000e+00> : vector<2x128xf32>
    %783 = tpu.matmul %779, %357, %cst_110 {dimension_numbers = #tpu.dot_dimension_numbers<[1], [0], [0], [1], [0, 0, 1, 1], [], []>} : vector<2x32xf32>, vector<32x128xf32>, vector<2x128xf32> -> vector<2x128xf32>
    %784 = arith.addf %782, %783 : vector<2x128xf32>
    %785 = arith.negf %784 : vector<2x128xf32>
    %786 = math.exp %785 : vector<2x128xf32>
    %cst_111 = arith.constant 1.000000e+00 : f32
    %787 = vector.broadcast %cst_111 : f32 to vector<2x128xf32>
    %788 = arith.addf %787, %786 : vector<2x128xf32>
    %789 = arith.divf %787, %788 : vector<2x128xf32>
    %790 = math.tanh %784 : vector<2x128xf32>
    %791 = vector.extract_strided_slice %789 {offsets = [0, 0], sizes = [2, 32], strides = [1, 1]} : vector<2x128xf32> to vector<2x32xf32>
    %792 = vector.extract_strided_slice %789 {offsets = [0, 32], sizes = [2, 32], strides = [1, 1]} : vector<2x128xf32> to vector<2x32xf32>
    %793 = vector.extract_strided_slice %790 {offsets = [0, 64], sizes = [2, 32], strides = [1, 1]} : vector<2x128xf32> to vector<2x32xf32>
    %794 = vector.extract_strided_slice %789 {offsets = [0, 96], sizes = [2, 32], strides = [1, 1]} : vector<2x128xf32> to vector<2x32xf32>
    %795 = arith.mulf %792, %777 : vector<2x32xf32>
    %796 = arith.mulf %791, %793 : vector<2x32xf32>
    %797 = arith.addf %795, %796 : vector<2x32xf32>
    %798 = math.tanh %797 : vector<2x32xf32>
    %799 = arith.mulf %794, %798 : vector<2x32xf32>
    %800 = vector.extract_strided_slice %356 {offsets = [22, 0], sizes = [1, 128], strides = [1, 1]} : vector<60x128xf32> to vector<1x128xf32>
    %801 = vector.extract_strided_slice %356 {offsets = [52, 0], sizes = [1, 128], strides = [1, 1]} : vector<60x128xf32> to vector<1x128xf32>
    %802 = tpu.concatenate %800, %801 in 0 : vector<1x128xf32>, vector<1x128xf32> -> vector<2x128xf32>
    %cst_112 = arith.constant dense<0.000000e+00> : vector<2x128xf32>
    %803 = tpu.matmul %799, %357, %cst_112 {dimension_numbers = #tpu.dot_dimension_numbers<[1], [0], [0], [1], [0, 0, 1, 1], [], []>} : vector<2x32xf32>, vector<32x128xf32>, vector<2x128xf32> -> vector<2x128xf32>
    %804 = arith.addf %802, %803 : vector<2x128xf32>
    %805 = arith.negf %804 : vector<2x128xf32>
    %806 = math.exp %805 : vector<2x128xf32>
    %cst_113 = arith.constant 1.000000e+00 : f32
    %807 = vector.broadcast %cst_113 : f32 to vector<2x128xf32>
    %808 = arith.addf %807, %806 : vector<2x128xf32>
    %809 = arith.divf %807, %808 : vector<2x128xf32>
    %810 = math.tanh %804 : vector<2x128xf32>
    %811 = vector.extract_strided_slice %809 {offsets = [0, 0], sizes = [2, 32], strides = [1, 1]} : vector<2x128xf32> to vector<2x32xf32>
    %812 = vector.extract_strided_slice %809 {offsets = [0, 32], sizes = [2, 32], strides = [1, 1]} : vector<2x128xf32> to vector<2x32xf32>
    %813 = vector.extract_strided_slice %810 {offsets = [0, 64], sizes = [2, 32], strides = [1, 1]} : vector<2x128xf32> to vector<2x32xf32>
    %814 = vector.extract_strided_slice %809 {offsets = [0, 96], sizes = [2, 32], strides = [1, 1]} : vector<2x128xf32> to vector<2x32xf32>
    %815 = arith.mulf %812, %797 : vector<2x32xf32>
    %816 = arith.mulf %811, %813 : vector<2x32xf32>
    %817 = arith.addf %815, %816 : vector<2x32xf32>
    %818 = math.tanh %817 : vector<2x32xf32>
    %819 = arith.mulf %814, %818 : vector<2x32xf32>
    %820 = vector.extract_strided_slice %356 {offsets = [23, 0], sizes = [1, 128], strides = [1, 1]} : vector<60x128xf32> to vector<1x128xf32>
    %821 = vector.extract_strided_slice %356 {offsets = [53, 0], sizes = [1, 128], strides = [1, 1]} : vector<60x128xf32> to vector<1x128xf32>
    %822 = tpu.concatenate %820, %821 in 0 : vector<1x128xf32>, vector<1x128xf32> -> vector<2x128xf32>
    %cst_114 = arith.constant dense<0.000000e+00> : vector<2x128xf32>
    %823 = tpu.matmul %819, %357, %cst_114 {dimension_numbers = #tpu.dot_dimension_numbers<[1], [0], [0], [1], [0, 0, 1, 1], [], []>} : vector<2x32xf32>, vector<32x128xf32>, vector<2x128xf32> -> vector<2x128xf32>
    %824 = arith.addf %822, %823 : vector<2x128xf32>
    %825 = arith.negf %824 : vector<2x128xf32>
    %826 = math.exp %825 : vector<2x128xf32>
    %cst_115 = arith.constant 1.000000e+00 : f32
    %827 = vector.broadcast %cst_115 : f32 to vector<2x128xf32>
    %828 = arith.addf %827, %826 : vector<2x128xf32>
    %829 = arith.divf %827, %828 : vector<2x128xf32>
    %830 = math.tanh %824 : vector<2x128xf32>
    %831 = vector.extract_strided_slice %829 {offsets = [0, 0], sizes = [2, 32], strides = [1, 1]} : vector<2x128xf32> to vector<2x32xf32>
    %832 = vector.extract_strided_slice %829 {offsets = [0, 32], sizes = [2, 32], strides = [1, 1]} : vector<2x128xf32> to vector<2x32xf32>
    %833 = vector.extract_strided_slice %830 {offsets = [0, 64], sizes = [2, 32], strides = [1, 1]} : vector<2x128xf32> to vector<2x32xf32>
    %834 = vector.extract_strided_slice %829 {offsets = [0, 96], sizes = [2, 32], strides = [1, 1]} : vector<2x128xf32> to vector<2x32xf32>
    %835 = arith.mulf %832, %817 : vector<2x32xf32>
    %836 = arith.mulf %831, %833 : vector<2x32xf32>
    %837 = arith.addf %835, %836 : vector<2x32xf32>
    %838 = math.tanh %837 : vector<2x32xf32>
    %839 = arith.mulf %834, %838 : vector<2x32xf32>
    %840 = vector.extract_strided_slice %356 {offsets = [24, 0], sizes = [1, 128], strides = [1, 1]} : vector<60x128xf32> to vector<1x128xf32>
    %841 = vector.extract_strided_slice %356 {offsets = [54, 0], sizes = [1, 128], strides = [1, 1]} : vector<60x128xf32> to vector<1x128xf32>
    %842 = tpu.concatenate %840, %841 in 0 : vector<1x128xf32>, vector<1x128xf32> -> vector<2x128xf32>
    %cst_116 = arith.constant dense<0.000000e+00> : vector<2x128xf32>
    %843 = tpu.matmul %839, %357, %cst_116 {dimension_numbers = #tpu.dot_dimension_numbers<[1], [0], [0], [1], [0, 0, 1, 1], [], []>} : vector<2x32xf32>, vector<32x128xf32>, vector<2x128xf32> -> vector<2x128xf32>
    %844 = arith.addf %842, %843 : vector<2x128xf32>
    %845 = arith.negf %844 : vector<2x128xf32>
    %846 = math.exp %845 : vector<2x128xf32>
    %cst_117 = arith.constant 1.000000e+00 : f32
    %847 = vector.broadcast %cst_117 : f32 to vector<2x128xf32>
    %848 = arith.addf %847, %846 : vector<2x128xf32>
    %849 = arith.divf %847, %848 : vector<2x128xf32>
    %850 = math.tanh %844 : vector<2x128xf32>
    %851 = vector.extract_strided_slice %849 {offsets = [0, 0], sizes = [2, 32], strides = [1, 1]} : vector<2x128xf32> to vector<2x32xf32>
    %852 = vector.extract_strided_slice %849 {offsets = [0, 32], sizes = [2, 32], strides = [1, 1]} : vector<2x128xf32> to vector<2x32xf32>
    %853 = vector.extract_strided_slice %850 {offsets = [0, 64], sizes = [2, 32], strides = [1, 1]} : vector<2x128xf32> to vector<2x32xf32>
    %854 = vector.extract_strided_slice %849 {offsets = [0, 96], sizes = [2, 32], strides = [1, 1]} : vector<2x128xf32> to vector<2x32xf32>
    %855 = arith.mulf %852, %837 : vector<2x32xf32>
    %856 = arith.mulf %851, %853 : vector<2x32xf32>
    %857 = arith.addf %855, %856 : vector<2x32xf32>
    %858 = math.tanh %857 : vector<2x32xf32>
    %859 = arith.mulf %854, %858 : vector<2x32xf32>
    %860 = vector.extract_strided_slice %356 {offsets = [25, 0], sizes = [1, 128], strides = [1, 1]} : vector<60x128xf32> to vector<1x128xf32>
    %861 = vector.extract_strided_slice %356 {offsets = [55, 0], sizes = [1, 128], strides = [1, 1]} : vector<60x128xf32> to vector<1x128xf32>
    %862 = tpu.concatenate %860, %861 in 0 : vector<1x128xf32>, vector<1x128xf32> -> vector<2x128xf32>
    %cst_118 = arith.constant dense<0.000000e+00> : vector<2x128xf32>
    %863 = tpu.matmul %859, %357, %cst_118 {dimension_numbers = #tpu.dot_dimension_numbers<[1], [0], [0], [1], [0, 0, 1, 1], [], []>} : vector<2x32xf32>, vector<32x128xf32>, vector<2x128xf32> -> vector<2x128xf32>
    %864 = arith.addf %862, %863 : vector<2x128xf32>
    %865 = arith.negf %864 : vector<2x128xf32>
    %866 = math.exp %865 : vector<2x128xf32>
    %cst_119 = arith.constant 1.000000e+00 : f32
    %867 = vector.broadcast %cst_119 : f32 to vector<2x128xf32>
    %868 = arith.addf %867, %866 : vector<2x128xf32>
    %869 = arith.divf %867, %868 : vector<2x128xf32>
    %870 = math.tanh %864 : vector<2x128xf32>
    %871 = vector.extract_strided_slice %869 {offsets = [0, 0], sizes = [2, 32], strides = [1, 1]} : vector<2x128xf32> to vector<2x32xf32>
    %872 = vector.extract_strided_slice %869 {offsets = [0, 32], sizes = [2, 32], strides = [1, 1]} : vector<2x128xf32> to vector<2x32xf32>
    %873 = vector.extract_strided_slice %870 {offsets = [0, 64], sizes = [2, 32], strides = [1, 1]} : vector<2x128xf32> to vector<2x32xf32>
    %874 = vector.extract_strided_slice %869 {offsets = [0, 96], sizes = [2, 32], strides = [1, 1]} : vector<2x128xf32> to vector<2x32xf32>
    %875 = arith.mulf %872, %857 : vector<2x32xf32>
    %876 = arith.mulf %871, %873 : vector<2x32xf32>
    %877 = arith.addf %875, %876 : vector<2x32xf32>
    %878 = math.tanh %877 : vector<2x32xf32>
    %879 = arith.mulf %874, %878 : vector<2x32xf32>
    %880 = vector.extract_strided_slice %356 {offsets = [26, 0], sizes = [1, 128], strides = [1, 1]} : vector<60x128xf32> to vector<1x128xf32>
    %881 = vector.extract_strided_slice %356 {offsets = [56, 0], sizes = [1, 128], strides = [1, 1]} : vector<60x128xf32> to vector<1x128xf32>
    %882 = tpu.concatenate %880, %881 in 0 : vector<1x128xf32>, vector<1x128xf32> -> vector<2x128xf32>
    %cst_120 = arith.constant dense<0.000000e+00> : vector<2x128xf32>
    %883 = tpu.matmul %879, %357, %cst_120 {dimension_numbers = #tpu.dot_dimension_numbers<[1], [0], [0], [1], [0, 0, 1, 1], [], []>} : vector<2x32xf32>, vector<32x128xf32>, vector<2x128xf32> -> vector<2x128xf32>
    %884 = arith.addf %882, %883 : vector<2x128xf32>
    %885 = arith.negf %884 : vector<2x128xf32>
    %886 = math.exp %885 : vector<2x128xf32>
    %cst_121 = arith.constant 1.000000e+00 : f32
    %887 = vector.broadcast %cst_121 : f32 to vector<2x128xf32>
    %888 = arith.addf %887, %886 : vector<2x128xf32>
    %889 = arith.divf %887, %888 : vector<2x128xf32>
    %890 = math.tanh %884 : vector<2x128xf32>
    %891 = vector.extract_strided_slice %889 {offsets = [0, 0], sizes = [2, 32], strides = [1, 1]} : vector<2x128xf32> to vector<2x32xf32>
    %892 = vector.extract_strided_slice %889 {offsets = [0, 32], sizes = [2, 32], strides = [1, 1]} : vector<2x128xf32> to vector<2x32xf32>
    %893 = vector.extract_strided_slice %890 {offsets = [0, 64], sizes = [2, 32], strides = [1, 1]} : vector<2x128xf32> to vector<2x32xf32>
    %894 = vector.extract_strided_slice %889 {offsets = [0, 96], sizes = [2, 32], strides = [1, 1]} : vector<2x128xf32> to vector<2x32xf32>
    %895 = arith.mulf %892, %877 : vector<2x32xf32>
    %896 = arith.mulf %891, %893 : vector<2x32xf32>
    %897 = arith.addf %895, %896 : vector<2x32xf32>
    %898 = math.tanh %897 : vector<2x32xf32>
    %899 = arith.mulf %894, %898 : vector<2x32xf32>
    %900 = vector.extract_strided_slice %356 {offsets = [27, 0], sizes = [1, 128], strides = [1, 1]} : vector<60x128xf32> to vector<1x128xf32>
    %901 = vector.extract_strided_slice %356 {offsets = [57, 0], sizes = [1, 128], strides = [1, 1]} : vector<60x128xf32> to vector<1x128xf32>
    %902 = tpu.concatenate %900, %901 in 0 : vector<1x128xf32>, vector<1x128xf32> -> vector<2x128xf32>
    %cst_122 = arith.constant dense<0.000000e+00> : vector<2x128xf32>
    %903 = tpu.matmul %899, %357, %cst_122 {dimension_numbers = #tpu.dot_dimension_numbers<[1], [0], [0], [1], [0, 0, 1, 1], [], []>} : vector<2x32xf32>, vector<32x128xf32>, vector<2x128xf32> -> vector<2x128xf32>
    %904 = arith.addf %902, %903 : vector<2x128xf32>
    %905 = arith.negf %904 : vector<2x128xf32>
    %906 = math.exp %905 : vector<2x128xf32>
    %cst_123 = arith.constant 1.000000e+00 : f32
    %907 = vector.broadcast %cst_123 : f32 to vector<2x128xf32>
    %908 = arith.addf %907, %906 : vector<2x128xf32>
    %909 = arith.divf %907, %908 : vector<2x128xf32>
    %910 = math.tanh %904 : vector<2x128xf32>
    %911 = vector.extract_strided_slice %909 {offsets = [0, 0], sizes = [2, 32], strides = [1, 1]} : vector<2x128xf32> to vector<2x32xf32>
    %912 = vector.extract_strided_slice %909 {offsets = [0, 32], sizes = [2, 32], strides = [1, 1]} : vector<2x128xf32> to vector<2x32xf32>
    %913 = vector.extract_strided_slice %910 {offsets = [0, 64], sizes = [2, 32], strides = [1, 1]} : vector<2x128xf32> to vector<2x32xf32>
    %914 = vector.extract_strided_slice %909 {offsets = [0, 96], sizes = [2, 32], strides = [1, 1]} : vector<2x128xf32> to vector<2x32xf32>
    %915 = arith.mulf %912, %897 : vector<2x32xf32>
    %916 = arith.mulf %911, %913 : vector<2x32xf32>
    %917 = arith.addf %915, %916 : vector<2x32xf32>
    %918 = math.tanh %917 : vector<2x32xf32>
    %919 = arith.mulf %914, %918 : vector<2x32xf32>
    %920 = vector.extract_strided_slice %356 {offsets = [28, 0], sizes = [1, 128], strides = [1, 1]} : vector<60x128xf32> to vector<1x128xf32>
    %921 = vector.extract_strided_slice %356 {offsets = [58, 0], sizes = [1, 128], strides = [1, 1]} : vector<60x128xf32> to vector<1x128xf32>
    %922 = tpu.concatenate %920, %921 in 0 : vector<1x128xf32>, vector<1x128xf32> -> vector<2x128xf32>
    %cst_124 = arith.constant dense<0.000000e+00> : vector<2x128xf32>
    %923 = tpu.matmul %919, %357, %cst_124 {dimension_numbers = #tpu.dot_dimension_numbers<[1], [0], [0], [1], [0, 0, 1, 1], [], []>} : vector<2x32xf32>, vector<32x128xf32>, vector<2x128xf32> -> vector<2x128xf32>
    %924 = arith.addf %922, %923 : vector<2x128xf32>
    %925 = arith.negf %924 : vector<2x128xf32>
    %926 = math.exp %925 : vector<2x128xf32>
    %cst_125 = arith.constant 1.000000e+00 : f32
    %927 = vector.broadcast %cst_125 : f32 to vector<2x128xf32>
    %928 = arith.addf %927, %926 : vector<2x128xf32>
    %929 = arith.divf %927, %928 : vector<2x128xf32>
    %930 = math.tanh %924 : vector<2x128xf32>
    %931 = vector.extract_strided_slice %929 {offsets = [0, 0], sizes = [2, 32], strides = [1, 1]} : vector<2x128xf32> to vector<2x32xf32>
    %932 = vector.extract_strided_slice %929 {offsets = [0, 32], sizes = [2, 32], strides = [1, 1]} : vector<2x128xf32> to vector<2x32xf32>
    %933 = vector.extract_strided_slice %930 {offsets = [0, 64], sizes = [2, 32], strides = [1, 1]} : vector<2x128xf32> to vector<2x32xf32>
    %934 = vector.extract_strided_slice %929 {offsets = [0, 96], sizes = [2, 32], strides = [1, 1]} : vector<2x128xf32> to vector<2x32xf32>
    %935 = arith.mulf %932, %917 : vector<2x32xf32>
    %936 = arith.mulf %931, %933 : vector<2x32xf32>
    %937 = arith.addf %935, %936 : vector<2x32xf32>
    %938 = math.tanh %937 : vector<2x32xf32>
    %939 = arith.mulf %934, %938 : vector<2x32xf32>
    %940 = vector.extract_strided_slice %356 {offsets = [29, 0], sizes = [1, 128], strides = [1, 1]} : vector<60x128xf32> to vector<1x128xf32>
    %941 = vector.extract_strided_slice %356 {offsets = [59, 0], sizes = [1, 128], strides = [1, 1]} : vector<60x128xf32> to vector<1x128xf32>
    %942 = tpu.concatenate %940, %941 in 0 : vector<1x128xf32>, vector<1x128xf32> -> vector<2x128xf32>
    %cst_126 = arith.constant dense<0.000000e+00> : vector<2x128xf32>
    %943 = tpu.matmul %939, %357, %cst_126 {dimension_numbers = #tpu.dot_dimension_numbers<[1], [0], [0], [1], [0, 0, 1, 1], [], []>} : vector<2x32xf32>, vector<32x128xf32>, vector<2x128xf32> -> vector<2x128xf32>
    %944 = arith.addf %942, %943 : vector<2x128xf32>
    %945 = arith.negf %944 : vector<2x128xf32>
    %946 = math.exp %945 : vector<2x128xf32>
    %cst_127 = arith.constant 1.000000e+00 : f32
    %947 = vector.broadcast %cst_127 : f32 to vector<2x128xf32>
    %948 = arith.addf %947, %946 : vector<2x128xf32>
    %949 = arith.divf %947, %948 : vector<2x128xf32>
    %950 = math.tanh %944 : vector<2x128xf32>
    %951 = vector.extract_strided_slice %949 {offsets = [0, 0], sizes = [2, 32], strides = [1, 1]} : vector<2x128xf32> to vector<2x32xf32>
    %952 = vector.extract_strided_slice %949 {offsets = [0, 32], sizes = [2, 32], strides = [1, 1]} : vector<2x128xf32> to vector<2x32xf32>
    %953 = vector.extract_strided_slice %950 {offsets = [0, 64], sizes = [2, 32], strides = [1, 1]} : vector<2x128xf32> to vector<2x32xf32>
    %954 = vector.extract_strided_slice %949 {offsets = [0, 96], sizes = [2, 32], strides = [1, 1]} : vector<2x128xf32> to vector<2x32xf32>
    %955 = arith.mulf %952, %937 : vector<2x32xf32>
    %956 = arith.mulf %951, %953 : vector<2x32xf32>
    %957 = arith.addf %955, %956 : vector<2x32xf32>
    %958 = math.tanh %957 : vector<2x32xf32>
    %959 = arith.mulf %954, %958 : vector<2x32xf32>
    %c0_128 = arith.constant 0 : index
    %c0_129 = arith.constant 0 : index
    %960 = vector.load %arg6[%c0_128, %c0_129] : memref<32x4xf32, #tpu.memory_space<vmem>>, vector<32x4xf32>
    %cst_130 = arith.constant dense<0.000000e+00> : vector<2x4xf32>
    %961 = tpu.matmul %959, %960, %cst_130 {dimension_numbers = #tpu.dot_dimension_numbers<[1], [0], [0], [1], [0, 0, 1, 1], [], []>} : vector<2x32xf32>, vector<32x4xf32>, vector<2x4xf32> -> vector<2x4xf32>
    %c0_131 = arith.constant 0 : index
    %c0_132 = arith.constant 0 : index
    %962 = vector.load %arg7[%c0_131, %c0_132] : memref<1x4xf32, #tpu.memory_space<vmem>>, vector<1x4xf32>
    %963 = vector.broadcast %962 : vector<1x4xf32> to vector<2x4xf32>
    %964 = arith.addf %961, %963 : vector<2x4xf32>
    %c0_133 = arith.constant 0 : index
    %c0_134 = arith.constant 0 : index
    %965 = vector.load %arg8[%c0_133, %c0_134] : memref<2x4xf32, #tpu.memory_space<vmem>>, vector<2x4xf32>
    tpu.vector_store %arg8[%c0_133, %c0_134], %964 {strides = array<i32>} : memref<2x4xf32, #tpu.memory_space<vmem>>, vector<2x4xf32>,
    return
  }
}

</mosaic_0001>

<bundles_post_ra>
// kernel: cnn2d_feed_lstm.1
= control target key start
LH: loop header
LB: loop body
LE: loop exit
PB: predicated region body
PF: predicated region fallthrough
CT: control target
= control target key end

     0   :  { %13 = vsyncpa [#allocation5], 0  ;;  %s6727_s0 = inlined_call_operand.vmem [shape: f32[2,8,30], index: 0, kind: input, shape index: {}]   ;;  %s6728_s1 = inlined_call_operand.vmem [shape: f32[36], index: 1, kind: input, shape index: {}]   ;;  %s6729_s2 = inlined_call_operand.vmem [shape: f32[4], index: 2, kind: input, shape index: {}]   ;;  %s6730_s3 = inlined_call_operand.vmem [shape: f32[32,128], index: 3, kind: input, shape index: {}]   ;;  %s6731_s4 = inlined_call_operand.hbm [shape: f32[32,128], index: 4, kind: input, shape index: {}]   ;;  %s6732_s5 = inlined_call_operand.vmem [shape: f32[1,128], index: 5, kind: input, shape index: {}]   ;;  %s6733_s6 = inlined_call_operand.vmem [shape: f32[32,4], index: 6, kind: input, shape index: {}]   ;;  %s6734_s7 = inlined_call_operand.vmem [shape: f32[1,4], index: 7, kind: input, shape index: {}]   ;;  %s6735_s8 = inlined_call_operand.hbm [shape: f32[2,4], index: 8, kind: output, shape index: {}]  }
   0x1   :  { %14 = vsyncpa [#allocation7], 0 }
   0x2   :  { %15 = vsyncpa [#allocation3], 0 }
   0x3   :  { %16 = vsyncpa [#allocation4], 0  ;;  %s25_s29 = sshll.u32 %s6728_s1, 4  ;;  %s35_s10 = sshll.u32 %s6729_s2, 4  ;;  %s26_s29 = int_to_ptr.vmem [resolvable:$true] %s25_s29  ;;  %s36_s10 = int_to_ptr.vmem [resolvable:$true] %s35_s10 }
   0x4   :  { %s5334_s11 = scalar_lea.vmem %s26_s29, 16  ;;  %p5339_p1 = scmp.lt.s32.totalorder %s26_s29, %s26_s29 }
   0x5   :  { %p5335_p0 = scmp.ne.s32.totalorder %s26_s29, %s5334_s11  ;;  %p5340_p2 = scmp.lt.s32.totalorder %s5334_s11, %s5334_s11 }
   0x7   :  { %p5341_p3 = por %p5340_p2, %p5339_p1 }
   0x9   :  { %p5342_p4 = pnand %p5341_p3, %p5335_p0 }
   0xb   :  { %5345 = shalt.err (!%p5342_p4)
}
   0xc   :  { %s5410_s12 = smov [#allocation2]   ;;  %s5346_s13 = scalar_lea.vmem %s36_s10, 16 }
   0xd   :  { %28 = dma.vmem_to_smem %s26_s29, 16, %s5410_s12, [#allocation5]  }
   0xe   :  { %p5347_p5 = scmp.ne.s32.totalorder %s36_s10, %s5346_s13  ;;  %p5351_p6 = scmp.lt.s32.totalorder %s36_s10, %s36_s10 }
   0xf   :  { %p5352_p7 = scmp.lt.s32.totalorder %s5346_s13, %s5346_s13 }
  0x11   :  { %p5353_p8 = por %p5352_p7, %p5351_p6 }
  0x13   :  { %p5354_p9 = pnand %p5353_p8, %p5347_p5 }
  0x15   :  { %5357 = shalt.err (!%p5354_p9)
}
  0x16   :  { %s5411_s1 = smov [#allocation6]   ;;  %s5412_s2 = smov [#allocation8]  }
  0x17   :  { %38 = dma.vmem_to_smem %s36_s10, 16, %s5411_s1, [#allocation7]  }
  0x18   :  { %s46_s14 = sshll.u32 %s5412_s2, 4  ;;  %s5358_s17 = scalar_lea.hbm %s6731_s4, 512  ;;  %s47_s14 = int_to_ptr.vmem [resolvable:$true] %s46_s14 }
  0x19   :  { %p5359_p10 = scmp.ne.s32.totalorder %s6731_s4, %s5358_s17  ;;  %p5362_p11 = scmp.lt.u32.totalorder %s5358_s17, %s6731_s4 }
  0x1b   :  { %p5364_p12 = pnand %p5362_p11, %p5359_p10 }
  0x1d   :  { %5367 = shalt.err (!%p5364_p12)
}
  0x1e   :  { %s5368_s22 = scalar_lea.vmem %s47_s14, 512  ;;  %p5373_p0 = scmp.lt.s32.totalorder %s47_s14, %s47_s14 }
  0x1f   :  { %p5369_p13 = scmp.ne.s32.totalorder %s47_s14, %s5368_s22  ;;  %p5374_p1 = scmp.lt.s32.totalorder %s5368_s22, %s5368_s22 }
  0x21   :  { %p5375_p2 = por %p5374_p1, %p5373_p0 }
  0x23   :  { %p5376_p3 = pnand %p5375_p2, %p5369_p13 }
  0x25   :  { %5379 = shalt.err (!%p5376_p3)
}
  0x26   :  { %s5413_s23 = smov 128   ;;  %s5414_s24 = smov 8  }
  0x27   :  { %52 = dma.hbm_to_vmem [thread:$0]  %s6731_s4, 512, %s47_s14, [#allocation3], %s5413_s23, %s5413_s23, %s5414_s24  }
  0x28   :  { %5402 = dma.done.wait [#allocation5], 16  }
  0x29   :  { %5403 = vsyncadd [#allocation5], 4294967280 }
  0x2a   :  { %5404 = dma.done.wait [#allocation7], 16  }
  0x2b   :  { %5405 = vsyncadd [#allocation7], 4294967280 }
  0x2c   :  { %5406 = dma.done.wait [#allocation3], 512  }
  0x2d   :  { %5407 = vsyncadd [#allocation3], 4294966784 }
  0x2e   :  { %68 = sfence }
  0x2f   :  { %vm73_vm0 = vcmask 1040384   ;;  %v4286_v0 = vld [vmem:[%s6727_s0 + $0x8] sm:$0xff]  ;;  %v69_v1 = vld [vmem:[%s6727_s0] sm:$0xff]  ;;  %s5415_s4 = smov 1   ;;  %s5498_s9 = sld [smem:[#allocation2 + $0x1]]  ;;  %vm84_vm1 = vcmask 7168  }
  0x30   :  { %v483_v2 = vrot.slane %v4286_v0, 7  ;;  %v71_v3 = vrot.slane %v69_v1, 7  ;;  %s5500_s10 = sld [smem:[#allocation2 + $0xa]]  ;;  %s5504_s11 = sld [smem:[#allocation2 + $0x13]]  ;;  %vm87_vm2 = vcmask 252928   ;;  %vm172_vm3 = vcmask 1046528  }
  0x31   :  { %s5502_s0 = sld [smem:[#allocation2 + $0x2]]  ;;  %s5506_s12 = sld [smem:[#allocation2 + $0x4]]  ;;  %vm321_vm4 = vcmask 1045504   ;;  %vm823_vm5 = vcmask 244736   ;;  %vm5420_vm6 = vmmov 0   ;;  %vm871_vm7 = vcmask 261120  }
  0x32   :  { %v485_v4 = vsel %vm73_vm0, 0.0, %v483_v2  ;;  %v74_v5 = vsel %vm73_vm0, 0.0, %v71_v3  ;;  %v486_v6 = vsel %vm73_vm0, %v483_v2, 0.0  ;;  %v75_v7 = vsel %vm73_vm0, %v71_v3, 0.0  ;;  %s5510_s13 = sld [smem:[#allocation2 + $0xb]]  ;;  %s5512_s1 = sld [smem:[#allocation2 + $0x1c]] }
  0x33   :  { %489 = vrot.lane.b32.xlu0 %v485_v4, %s5415_s4  ;;  %78 = vrot.lane.b32.xlu1 %v74_v5, %s5415_s4  ;;  %s5515_s2 = sld [smem:[#allocation2 + $0x14]]  ;;  %s5517_s14 = sld [smem:[#allocation2 + $0x1d]]  ;;  %vm4229_vm8 = vcmask 25600  }
  0x34   :  { %s5522_s15 = sld [smem:[#allocation2 + $0xd]]  ;;  %s5532_s17 = sld [smem:[#allocation2 + $0x16]] }
  0x35   :  { %v103_v9 = vstv %s5498_s9  ;;  %s5524_s16 = sld [smem:[#allocation2 + $0x5]]  ;;  %s5534_s18 = sld [smem:[#allocation2 + $0xe]] }
  0x36   :  { %v111_v10 = vstv %s5500_s10  ;;  %v119_v17 = vstv %s5504_s11  ;;  %s5538_s19 = sld [smem:[#allocation2 + $0x1f]]  ;;  %s6736_s21 = smov 127  }
  0x37   :  { %491 = vrot.lane.b32.xlu0 %v486_v6, %s5415_s4  ;;  %80 = vrot.lane.b32.xlu1 %v75_v7, %s5415_s4  ;;  %v135_v16 = vstv %s5502_s0  ;;  %s5540_s20 = sld [smem:[#allocation2 + $0x17]]  ;;  %s5547_s23 = sld [smem:[#allocation2 + $0x20]]  ;;  %v5563_v22 = vstv %s5506_s12 }
  0x38   :  { %s5545_s22 = sld [smem:[#allocation2 + $0x7]]  ;;  %s5552_s24 = sld [smem:[#allocation2 + $0x10]]  ;;  %v143_v23 = vstv %s5510_s13  ;;  %v127_v24 = vstv %s5512_s1 }
  0x39   :  { %s5554_s25 = sld [smem:[#allocation2 + $0x8]]  ;;  %s5565_s26 = sld [smem:[#allocation2 + $0x19]]  ;;  %v151_v26 = vstv %s5515_s2  ;;  %v159_v28 = vstv %s5517_s14 }
  0x3a   :  { %s5567_s27 = sld [smem:[#allocation2 + $0x11]]  ;;  %s5417_s28 = smov 126   ;;  %v5584_v29 = vstv %s5522_s15  ;;  %v5598_v33 = vstv %s5532_s17 }
  0x3b   :  { %s5575_s29 = sld [smem:[#allocation2 + $0x22]]  ;;  %s5586_s4 = sld [smem:[#allocation2 + $0x23]]  ;;  %v5595_v32 = vstv %s5524_s16  ;;  %v5607_v36 = vstv %s5534_s18 }
  0x3c   :  { %s5577_s30 = sld [smem:[#allocation2 + $0x1a]]  ;;  %s5600_s12 = sld [smem:[#allocation2]]  ;;  %v5610_v37 = vstv %s5538_s19 }
  0x3d   :  { %s6738_s15 = smov 127   ;;  %v5615_v38 = vstv %s5540_s20  ;;  %s5620_s16 = sld [smem:[#allocation2 + $0x12]]  ;;  %v5627_v42 = vstv %s5547_s23 }
  0x3e   :  { %v5618_v39 = vstv %s5545_s22  ;;  %s5622_s17 = sld [smem:[#allocation2 + $0x1b]]  ;;  %v5630_v43 = vstv %s5552_s24  ;;  %s5659_s19 = sld [smem:[#allocation2 + $0xc]] }
  0x3f   :  { %v5636_v45 = vstv %s5554_s25  ;;  %v5639_v46 = vstv %s5565_s26  ;;  %s5644_s18 = sld [smem:[#allocation2 + $0x3]]  ;;  %s5661_s20 = sld [smem:[#allocation2 + $0x15]] }
  0x40   :  { %v5642_v47 = vstv %s5567_s27  ;;  %s5670_s22 = sld [smem:[#allocation2 + $0x1e]]  ;;  %s5681_s24 = sld [smem:[#allocation2 + $0xf]] }
  0x41   :  { %v5654_v52 = vstv %s5575_s29  ;;  %v5668_v57 = vstv %s5586_s4  ;;  %s5679_s23 = sld [smem:[#allocation2 + $0x6]]  ;;  %s5694_s25 = sld [smem:[#allocation2 + $0x18]] }
  0x42   :  { %v5657_v53 = vstv %s5577_s30  ;;  %v91_v60 = vstv %s5600_s12  ;;  %s5722_s26 = sld [smem:[#allocation2 + $0x21]]  ;;  %s6124_s9 = sld [smem:[#allocation6]] }
  0x43   :  { %v97_v2 = vstv %s5620_s16  ;;  %s6127_s10 = sld [smem:[#allocation6 + $0x1]]  ;;  %s6131_s0 = sld [smem:[#allocation6 + $0x2]] }
  0x44   :  { %v100_v3 = vstv %s5622_s17  ;;  %s6133_s11 = sld [smem:[#allocation6 + $0x3]]  ;;  %s5418_s13 = smov 30  }
  0x45   :  { %s5423_s12 = smov 32  }
  0xa5   :  { %v490_v8 = vpop.permute.xlu0 %489 }
  0xa6   :  { %v495_v11 = vsel %vm84_vm1, 0.0, %v490_v8 }
  0xa7   :  { %v5520_v12 = vsel %vm87_vm2, %v495_v11, 0.0 }
  0xa8   :  { %v503_v13 = vmul.f32 %v5520_v12, %v103_v9  ;;  %v509_v14 = vmul.f32 %v5520_v12, %v111_v10  ;;  %v527_v20 = vmul.f32 %v5520_v12, %v135_v16  ;;  %v515_v21 = vmul.f32 %v5520_v12, %v119_v17 }
  0xa9   :  { %v492_v15 = vpop.permute.xlu0 %491  ;;  %v587_v27 = vmul.f32 %v5520_v12, %v5563_v22  ;;  %v533_v30 = vmul.f32 %v5520_v12, %v143_v23  ;;  %v521_v31 = vmul.f32 %v5520_v12, %v127_v24  ;;  %v598_v41 = vmul.f32 %v5520_v12, %v5584_v29 }
  0xaa   :  { %v496_v18 = vsel %vm84_vm1, 0.0, %v492_v15  ;;  %505 = vrot.lane.b32.xlu0 %v503_v13, %s6736_s21  ;;  %511 = vrot.lane.b32.xlu1 %v509_v14, %s6736_s21  ;;  %v539_v44 = vmul.f32 %v5520_v12, %v151_v26  ;;  %v631_v55 = vmul.f32 %v5520_v12, %v5595_v32  ;;  %v609_v56 = vmul.f32 %v5520_v12, %v5598_v33 }
  0xab   :  { %v5550_v19 = vsel %vm87_vm2, %v496_v18, 0.0  ;;  %v591_v40 = vrot.slane %v587_v27, 1  ;;  %v602_v54 = vrot.slane %v598_v41, 1  ;;  %v545_v58 = vmul.f32 %v5520_v12, %v159_v28  ;;  %v79_v27 = vpop.permute.xlu1 %78 }
  0xac   :  { %v588_v25 = vmul.f32 %v5550_v19, %v5563_v22  ;;  %v599_v35 = vmul.f32 %v5550_v19, %v5584_v29  ;;  %v632_v50 = vmul.f32 %v5550_v19, %v5595_v32  ;;  %v610_v51 = vmul.f32 %v5550_v19, %v5598_v33 }
  0xad   :  { %v643_v59 = vmul.f32 %v5550_v19, %v5607_v36  ;;  %v621_v1 = vmul.f32 %v5550_v19, %v5610_v37  ;;  %v635_v4 = vrot.slane %v631_v55, 1  ;;  %v613_v5 = vrot.slane %v609_v56, 1 }
  0xae   :  { %529 = vrot.lane.b32.xlu0 %v527_v20, %s5417_s28  ;;  %517 = vrot.lane.b32.xlu1 %v515_v21, %s6736_s21  ;;  %s5602_s21 = sld [smem:[#allocation2 + $0x9]]  ;;  %v592_v34 = vrot.slane %v588_v25, 1  ;;  %v603_v49 = vrot.slane %v599_v35, 1  ;;  %v636_v63 = vrot.slane %v632_v50, 1  ;;  %v614_v0 = vrot.slane %v610_v51, 1 }
  0xaf   :  { %v642_v6 = vmul.f32 %v5520_v12, %v5607_v36  ;;  %v620_v7 = vmul.f32 %v5520_v12, %v5610_v37  ;;  %v647_v8 = vrot.slane %v643_v59, 1  ;;  %v654_v11 = vmul.f32 %v5550_v19, %v5615_v38 }
  0xb0   :  { %v593_v48 = vsel %vm172_vm3, %v591_v40, %v592_v34  ;;  %v604_v62 = vsel %vm172_vm3, %v602_v54, %v603_v49  ;;  %v712_v13 = vmul.f32 %v5550_v19, %v5618_v39  ;;  %v5701_v14 = vstv %s5644_s18 }
  0xb1   :  { %v637_v15 = vsel %vm172_vm3, %v635_v4, %v636_v63  ;;  %v615_v18 = vsel %vm172_vm3, %v613_v5, %v614_v0  ;;  %v625_v20 = vrot.slane %v621_v1, 1  ;;  %v653_v21 = vmul.f32 %v5520_v12, %v5615_v38  ;;  %v81_v0 = vpop.permute.xlu1 %80 }
  0xb2   :  { %535 = vrot.lane.b32.xlu0 %v533_v30, %s5417_s28  ;;  %523 = vrot.lane.b32.xlu1 %v521_v31, %s6738_s15  ;;  %v711_v25 = vmul.f32 %v5520_v12, %v5618_v39  ;;  %v5712_v30 = vstv %s5659_s19  ;;  %v5715_v31 = vstv %s5661_s20  ;;  %v646_v34 = vrot.slane %v642_v6, 1 }
  0xb3   :  { %v624_v35 = vrot.slane %v620_v7, 1  ;;  %v665_v40 = vmul.f32 %v5550_v19, %v5627_v42  ;;  %v5720_v41 = vstv %s5670_s22  ;;  %v5725_v49 = vstv %s5679_s23 }
  0xb4   :  { %v94_v61 = vstv %s5602_s21  ;;  %v5728_v50 = vstv %s5681_s24  ;;  %v648_v51 = vsel %vm172_vm3, %v646_v34, %v647_v8  ;;  %v657_v55 = vrot.slane %v653_v21, 1 }
  0xb5   :  { %v626_v54 = vsel %vm172_vm3, %v624_v35, %v625_v20  ;;  %v723_v56 = vmul.f32 %v5550_v19, %v5630_v43  ;;  %v664_v59 = vmul.f32 %v5520_v12, %v5627_v42  ;;  %v734_v63 = vmul.f32 %v5550_v19, %v5639_v46 }
  0xb6   :  { %541 = vrot.lane.b32.xlu0 %v539_v44, %s5417_s28  ;;  %594 = vrot.lane.b32.xlu1 %v593_v48, %s6738_s15  ;;  %v658_v44 = vrot.slane %v654_v11, 1  ;;  %v716_v48 = vrot.slane %v712_v13, 2  ;;  %v669_v1 = vrot.slane %v665_v40, 1  ;;  %v722_v4 = vmul.f32 %v5520_v12, %v5630_v43 }
  0xb7   :  { %v85_v5 = vsel %vm84_vm1, 0.0, %v79_v27  ;;  %v5746_v6 = vstv %s5694_s25  ;;  %v755_v11 = vmul.f32 %v5520_v12, %v5636_v45  ;;  %v733_v13 = vmul.f32 %v5520_v12, %v5639_v46 }
  0xb8   :  { %v659_v7 = vsel %vm172_vm3, %v657_v55, %v658_v44  ;;  %v745_v20 = vmul.f32 %v5550_v19, %v5654_v52  ;;  %v86_v21 = vsel %vm84_vm1, 0.0, %v81_v0  ;;  %v738_v34 = vrot.slane %v734_v63, 2 }
  0xb9   :  { %v766_v35 = vmul.f32 %v5520_v12, %v5642_v47  ;;  %v726_v40 = vrot.slane %v722_v4, 2  ;;  %v744_v44 = vmul.f32 %v5520_v12, %v5654_v52  ;;  %v759_v55 = vrot.slane %v755_v11, 2 }
  0xba   :  { %547 = vrot.lane.b32.xlu0 %v545_v58, %s5417_s28  ;;  %605 = vrot.lane.b32.xlu1 %v604_v62, %s6738_s15  ;;  %v715_v58 = vrot.slane %v711_v25, 2  ;;  %v756_v62 = vmul.f32 %v5550_v19, %v5636_v45  ;;  %v668_v25 = vrot.slane %v664_v59, 1  ;;  %v749_v63 = vrot.slane %v745_v20, 2 }
  0xbb   :  { %v777_v0 = vmul.f32 %v5520_v12, %v5657_v53  ;;  %v789_v11 = vmul.f32 %v5550_v19, %v5668_v57 }
  0xbc   :  { %v717_v8 = vsel %vm321_vm4, %v715_v58, %v716_v48  ;;  %v760_v27 = vrot.slane %v756_v62, 2  ;;  %v5766_v48 = vsel %vm87_vm2, %v85_v5, 0.0  ;;  %v5773_v58 = vsel %vm87_vm2, %v86_v21, 0.0 }
  0xbd   :  { %v770_v5 = vrot.slane %v766_v35, 2  ;;  %v227_v20 = vmul.f32 %v5584_v29, %v5773_v58  ;;  %v265_v21 = vmul.f32 %v5595_v32, %v5766_v48  ;;  %v781_v35 = vrot.slane %v777_v0, 2 }
  0xbe   :  { %638 = vrot.lane.b32.xlu0 %v637_v15, %s5417_s28  ;;  %616 = vrot.lane.b32.xlu1 %v615_v18, %s6738_s15  ;;  %v727_v15 = vrot.slane %v723_v56, 2  ;;  %v767_v18 = vmul.f32 %v5550_v19, %v5642_v47  ;;  %v737_v56 = vrot.slane %v733_v13, 2  ;;  %v761_v4 = vsel %vm321_vm4, %v759_v55, %v760_v27 }
  0xbf   :  { %v213_v13 = vmul.f32 %v5563_v22, %v5766_v48  ;;  %v104_v55 = vmul.f32 %v103_v9, %v5766_v48  ;;  %v269_v0 = vrot.slane %v265_v21, 1  ;;  %v5822_v9 = vmul.f32 %v5607_v36, %v5766_v48 }
  0xc0   :  { %v728_v59 = vsel %vm321_vm4, %v726_v40, %v727_v15  ;;  %v771_v62 = vrot.slane %v767_v18, 2  ;;  %v214_v15 = vmul.f32 %v5563_v22, %v5773_v58  ;;  %v226_v18 = vmul.f32 %v5584_v29, %v5766_v48 }
  0xc1   :  { %v788_v22 = vmul.f32 %v5520_v12, %v5668_v57  ;;  %v112_v40 = vmul.f32 %v111_v10, %v5766_v48  ;;  %v5864_v21 = vmul.f32 %v5610_v37, %v5766_v48 }
  0xc2   :  { %649 = vrot.lane.b32.xlu0 %v648_v51, %s5417_s28  ;;  %627 = vrot.lane.b32.xlu1 %v626_v54, %s6738_s15  ;;  %v5769_v51 = vstv %s5722_s26  ;;  %v670_v54 = vsel %vm172_vm3, %v668_v25, %v669_v1  ;;  %v739_v1 = vsel %vm321_vm4, %v737_v56, %v738_v34  ;;  %v266_v25 = vmul.f32 %v5595_v32, %v5773_v58 }
  0xc3   :  { %v772_v27 = vsel %vm321_vm4, %v770_v5, %v771_v62  ;;  %v239_v32 = vmul.f32 %v5598_v33, %v5766_v48  ;;  %v217_v56 = vrot.slane %v213_v13, 1  ;;  %v230_v62 = vrot.slane %v226_v18, 1 }
  0xc4   :  { %v792_v10 = vrot.slane %v788_v22, 2  ;;  %v5840_v13 = vmul.f32 %v143_v23, %v5766_v48  ;;  %v282_v23 = vrot.slane %v5822_v9, 1  ;;  %v561_v22 = vmul.f32 %v5550_v19, %v5712_v30 }
  0xc6   :  { %660 = vrot.lane.b32.xlu0 %v659_v7, %s5417_s28  ;;  %718 = vrot.lane.b32.xlu1 %v717_v8, %s6738_s15  ;;  %v778_v7 = vmul.f32 %v5550_v19, %v5657_v53  ;;  %v748_v8 = vrot.slane %v744_v44, 2  ;;  %v240_v44 = vmul.f32 %v5598_v33, %v5773_v58  ;;  %v136_v33 = vmul.f32 %v135_v16, %v5766_v48 }
  0xc7   :  { %v5835_v16 = vmul.f32 %v127_v24, %v5766_v48 }
  0xc8   :  { %v750_v34 = vsel %vm321_vm4, %v748_v8, %v749_v63  ;;  %v782_v29 = vrot.slane %v778_v7, 2  ;;  %v231_v63 = vrot.slane %v227_v20, 1  ;;  %v243_v7 = vrot.slane %v239_v32, 1 }
  0xc9   :  { %v244_v8 = vrot.slane %v240_v44, 1  ;;  %v570_v32 = vmul.f32 %v5550_v19, %v5715_v31 }
  0xca   :  { %671 = vrot.lane.b32.xlu0 %v670_v54, %s5417_s28  ;;  %729 = vrot.lane.b32.xlu1 %v728_v59, %s6738_s15  ;;  %v793_v54 = vrot.slane %v789_v11, 2  ;;  %v218_v59 = vrot.slane %v214_v15, 1  ;;  %v783_v5 = vsel %vm321_vm4, %v781_v35, %v782_v29  ;;  %v5829_v11 = vmul.f32 %v5607_v36, %v5773_v58 }
  0xcb   :  { %v5845_v15 = vmul.f32 %v151_v26, %v5766_v48  ;;  %v5853_v36 = vmul.f32 %v159_v28, %v5766_v48  ;;  %v5856_v20 = vsel %vm172_vm3, %v230_v62, %v231_v63  ;;  %v5868_v26 = vmul.f32 %v5610_v37, %v5773_v58 }
  0xcc   :  { %v5848_v18 = vsel %vm172_vm3, %v217_v56, %v218_v59  ;;  %v551_v28 = vmul.f32 %v5520_v12, %v5701_v14  ;;  %v560_v35 = vmul.f32 %v5520_v12, %v5712_v30  ;;  %v569_v29 = vmul.f32 %v5520_v12, %v5715_v31 }
  0xcd   :  { %v578_v56 = vmul.f32 %v5520_v12, %v5720_v41  ;;  %v579_v59 = vmul.f32 %v5550_v19, %v5720_v41  ;;  %v565_v62 = vrot.slane %v561_v22, 1  ;;  %v693_v22 = vmul.f32 %v5520_v12, %v5746_v6 }
  0xce   :  { %762 = vrot.lane.b32.xlu0 %v761_v4, %s5417_s28  ;;  %740 = vrot.lane.b32.xlu1 %v739_v1, %s6738_s15  ;;  %v270_v4 = vrot.slane %v266_v25, 1  ;;  %v120_v1 = vmul.f32 %v119_v17, %v5766_v48  ;;  %v794_v17 = vsel %vm321_vm4, %v792_v10, %v793_v54  ;;  %v5875_v25 = vsel %vm172_vm3, %v243_v7, %v244_v8 }
  0xcf   :  { %v555_v37 = vrot.slane %v551_v28, 1  ;;  %v564_v54 = vrot.slane %v560_v35, 1  ;;  %v573_v63 = vrot.slane %v569_v29, 1  ;;  %v583_v7 = vrot.slane %v579_v59, 1 }
  0xd0   :  { %v5859_v24 = vsel %vm172_vm3, %v269_v0, %v270_v4  ;;  %v574_v0 = vrot.slane %v570_v32, 1  ;;  %v675_v4 = vmul.f32 %v5520_v12, %v5725_v49  ;;  %v676_v8 = vmul.f32 %v5550_v19, %v5725_v49 }
  0xd1   :  { %v5918_v29 = vmul.f32 %v5615_v38, %v5766_v48  ;;  %v5922_v32 = vmul.f32 %v5615_v38, %v5773_v58  ;;  %v703_v38 = vmul.f32 %v5550_v19, %v5769_v51 }
  0xd2   :  { %773 = vrot.lane.b32.xlu0 %v772_v27, %s5417_s28  ;;  %751 = vrot.lane.b32.xlu1 %v750_v34, %s6738_s15  ;;  %v283_v27 = vrot.slane %v5829_v11, 1  ;;  %v552_v34 = vmul.f32 %v5550_v19, %v5701_v14  ;;  %v5905_v28 = vsel %vm172_vm3, %v573_v63, %v574_v0  ;;  %v680_v35 = vrot.slane %v676_v8, 2 }
  0xd3   :  { %v256_v63 = vrot.slane %v5864_v21, 1  ;;  %v697_v0 = vrot.slane %v693_v22, 2  ;;  %v5947_v8 = vmul.f32 %v94_v61, %v5766_v48  ;;  %v296_v9 = vrot.slane %v5922_v32, 1 }
  0xd4   :  { %v556_v44 = vrot.slane %v552_v34, 1  ;;  %v679_v34 = vrot.slane %v675_v4, 2  ;;  %v414_v21 = vmul.f32 %v5636_v45, %v5766_v48  ;;  %v415_v32 = vmul.f32 %v5636_v45, %v5773_v58 }
  0xd6   :  { %784 = vrot.lane.b32.xlu0 %v783_v5, %s5417_s28  ;;  %795 = vrot.lane.b32.xlu1 %v794_v17, %s5417_s28  ;;  %v5897_v10 = vsel %vm172_vm3, %v555_v37, %v556_v44  ;;  %v582_v5 = vrot.slane %v578_v56, 1  ;;  %v5902_v17 = vsel %vm172_vm3, %v564_v54, %v565_v62  ;;  %v685_v37 = vmul.f32 %v5550_v19, %v5728_v50 }
  0xd7   :  { %v694_v44 = vmul.f32 %v5550_v19, %v5746_v6  ;;  %v702_v54 = vmul.f32 %v5520_v12, %v5769_v51  ;;  %v5931_v56 = vsel %vm321_vm4, %v679_v34, %v680_v35  ;;  %v5955_v19 = vmul.f32 %v97_v2, %v5766_v48 }
  0xd8   :  { %v689_v62 = vrot.slane %v685_v37, 2  ;;  %v168_v35 = vmul.f32 %v5701_v14, %v5766_v48  ;;  %v257_v37 = vrot.slane %v5868_v26, 1  ;;  %v419_v45 = vrot.slane %v415_v32, 2 }
  0xd9   :  { %v698_v4 = vrot.slane %v694_v44, 2  ;;  %v169_v44 = vmul.f32 %v5701_v14, %v5773_v58  ;;  %v203_v14 = vmul.f32 %v5720_v41, %v5773_v58  ;;  %v499_v32 = vmul.f32 %v5520_v12, %v91_v60 }
  0xda   :  { %114 = vrot.lane.b32.xlu1 %v112_v40, %s6738_s15  ;;  %106 = vrot.lane.b32.xlu0 %v104_v55, %s6738_s15  ;;  %v684_v40 = vmul.f32 %v5520_v12, %v5728_v50  ;;  %v5910_v55 = vsel %vm172_vm3, %v582_v5, %v583_v7  ;;  %v706_v5 = vrot.slane %v702_v54, 2  ;;  %v180_v54 = vmul.f32 %v5712_v30, %v5766_v48 }
  0xdb   :  { %v5950_v34 = vsel %vm321_vm4, %v697_v0, %v698_v4  ;;  %v174_v26 = vrot.slane %v169_v44, 1  ;;  %v202_v0 = vmul.f32 %v5720_v41, %v5766_v48  ;;  %v207_v44 = vrot.slane %v203_v14, 1 }
  0xdc   :  { %v688_v59 = vrot.slane %v684_v40, 2  ;;  %v5960_v40 = vmul.f32 %v100_v3, %v5766_v48  ;;  %v318_v41 = vmul.f32 %v5725_v49, %v5773_v58  ;;  %v352_v14 = vmul.f32 %v5769_v51, %v5773_v58 }
  0xde   :  { %122 = vrot.lane.b32.xlu1 %v120_v1, %s6738_s15  ;;  %138 = vrot.lane.b32.xlu0 %v136_v33, %s5417_s28  ;;  %v5937_v7 = vsel %vm321_vm4, %v688_v59, %v689_v62  ;;  %v707_v1 = vrot.slane %v703_v38, 2  ;;  %v5942_v33 = vmul.f32 %v91_v60, %v5766_v48  ;;  %v173_v59 = vrot.slane %v168_v35, 1 }
  0xdf   :  { %v181_v62 = vmul.f32 %v5712_v30, %v5773_v58  ;;  %v184_v38 = vrot.slane %v180_v54, 1  ;;  %v317_v30 = vmul.f32 %v5725_v49, %v5766_v48  ;;  %v206_v35 = vrot.slane %v202_v0, 1 }
  0xe0   :  { %v5970_v22 = vsel %vm321_vm4, %v706_v5, %v707_v1  ;;  %v340_v49 = vmul.f32 %v5746_v6, %v5766_v48  ;;  %v351_v0 = vmul.f32 %v5769_v51, %v5766_v48  ;;  %v356_v51 = vrot.slane %v352_v14, 2 }
  0xe1   :  { %v185_v4 = vrot.slane %v181_v62, 1 }
  0xe2   :  { %130 = vrot.lane.b32.xlu1 %v5835_v16, %s6738_s15  ;;  %146 = vrot.lane.b32.xlu0 %v5840_v13, %s5417_s28  ;;  %v191_v16 = vmul.f32 %v5715_v31, %v5766_v48  ;;  %v192_v13 = vmul.f32 %v5715_v31, %v5773_v58  ;;  %v5993_v31 = vsel %vm172_vm3, %v173_v59, %v174_v26  ;;  %v323_v59 = vrot.slane %v318_v41, 2 }
  0xe3   :  { %v5998_v54 = vsel %vm172_vm3, %v184_v38, %v185_v4  ;;  %v341_v38 = vmul.f32 %v5746_v6, %v5773_v58  ;;  %v344_v6 = vrot.slane %v340_v49, 2 }
  0xe4   :  { %v195_v5 = vrot.slane %v191_v16, 1  ;;  %v196_v1 = vrot.slane %v192_v13, 1  ;;  %v322_v16 = vrot.slane %v317_v30, 2  ;;  %v330_v13 = vmul.f32 %v5728_v50, %v5773_v58 }
  0xe5   :  { %v345_v30 = vrot.slane %v341_v38, 2  ;;  %v427_v38 = vmul.f32 %v5642_v47, %v5766_v48 }
  0xe6   :  { %154 = vrot.lane.b32.xlu0 %v5845_v15, %s5417_s28  ;;  %220 = vrot.lane.b32.xlu1 %v5848_v18, %s6738_s15  ;;  %v6001_v62 = vsel %vm172_vm3, %v195_v5, %v196_v1  ;;  %v329_v15 = vmul.f32 %v5728_v50, %v5766_v48  ;;  %v6006_v18 = vsel %vm172_vm3, %v206_v35, %v207_v44  ;;  %v334_v5 = vrot.slane %v330_v13, 2 }
  0xe7   :  { %v362_v50 = vmul.f32 %v5618_v39, %v5766_v48  ;;  %v6025_v4 = vsel %vm321_vm4, %v322_v16, %v323_v59  ;;  %v363_v1 = vmul.f32 %v5618_v39, %v5773_v58  ;;  %v355_v35 = vrot.slane %v351_v0, 2 }
  0xe8   :  { %v333_v26 = vrot.slane %v329_v15, 2  ;;  %v6039_v41 = vsel %vm321_vm4, %v344_v6, %v345_v30  ;;  %v258_v39 = vsel %vm172_vm3, %v256_v63, %v257_v37  ;;  %v389_v15 = vmul.f32 %v5639_v46, %v5773_v58 }
  0xe9   :  { %v6042_v16 = vsel %vm321_vm4, %v355_v35, %v356_v51  ;;  %v366_v11 = vrot.slane %v362_v50, 2  ;;  %v428_v50 = vmul.f32 %v5642_v47, %v5773_v58  ;;  %v401_v6 = vmul.f32 %v5654_v52, %v5766_v48 }
  0xea   :  { %162 = vrot.lane.b32.xlu0 %v5853_v36, %s5417_s28  ;;  %233 = vrot.lane.b32.xlu1 %v5856_v20, %s6738_s15  ;;  %v6030_v44 = vsel %vm321_vm4, %v333_v26, %v334_v5  ;;  %v284_v36 = vsel %vm172_vm3, %v282_v23, %v283_v27  ;;  %v295_v20 = vrot.slane %v5918_v29, 1  ;;  %v304_v23 = vmul.f32 %v5627_v42, %v5766_v48 }
  0xeb   :  { %v367_v27 = vrot.slane %v363_v1, 2  ;;  %v305_v29 = vmul.f32 %v5627_v42, %v5773_v58  ;;  %v388_v42 = vmul.f32 %v5639_v46, %v5766_v48  ;;  %v418_v26 = vrot.slane %v414_v21, 2 }
  0xec   :  { %v297_v63 = vsel %vm172_vm3, %v295_v20, %v296_v9  ;;  %v308_v37 = vrot.slane %v304_v23, 1  ;;  %v393_v14 = vrot.slane %v389_v15, 2  ;;  %v402_v1 = vmul.f32 %v5654_v52, %v5773_v58 }
  0xed   :  { %v309_v59 = vrot.slane %v305_v29, 1  ;;  %v392_v0 = vrot.slane %v388_v42, 2  ;;  %v420_v30 = vsel %vm321_vm4, %v418_v26, %v419_v45  ;;  %v431_v35 = vrot.slane %v427_v38, 2 }
  0xee   :  { %272 = vrot.lane.b32.xlu0 %v5859_v24, %s5417_s28  ;;  %246 = vrot.lane.b32.xlu1 %v5875_v25, %s6738_s15  ;;  %v375_v24 = vmul.f32 %v5630_v43, %v5766_v48  ;;  %v376_v25 = vmul.f32 %v5630_v43, %v5773_v58  ;;  %v368_v43 = vsel %vm321_vm4, %v366_v11, %v367_v27  ;;  %v432_v47 = vrot.slane %v428_v50, 2 }
  0xef   :  { %v310_v46 = vsel %vm172_vm3, %v308_v37, %v309_v59  ;;  %v394_v51 = vsel %vm321_vm4, %v392_v0, %v393_v14  ;;  %v441_v20 = vmul.f32 %v5657_v53, %v5773_v58  ;;  %v406_v9 = vrot.slane %v402_v1, 2 }
  0xf0   :  { %v379_v13 = vrot.slane %v375_v24, 2  ;;  %v380_v49 = vrot.slane %v376_v25, 2  ;;  %v453_v52 = vmul.f32 %v5668_v57, %v5766_v48  ;;  %v454_v11 = vmul.f32 %v5668_v57, %v5773_v58 }
  0xf1   :  { %v433_v23 = vsel %vm321_vm4, %v431_v35, %v432_v47  ;;  %v500_v15 = vmul.f32 %v5520_v12, %v94_v61  ;;  %v501_v45 = vmul.f32 %v5520_v12, %v97_v2 }
  0xf2   :  { %285 = vrot.lane.b32.xlu0 %v284_v36, %s5417_s28  ;;  %259 = vrot.lane.b32.xlu1 %v258_v39, %s6738_s15  ;;  %v381_v5 = vsel %vm321_vm4, %v379_v13, %v380_v49  ;;  %v440_v36 = vmul.f32 %v5657_v53, %v5766_v48  ;;  %v405_v39 = vrot.slane %v401_v6, 2  ;;  %v445_v53 = vrot.slane %v441_v20, 2 }
  0xf3   :  { %v457_v24 = vrot.slane %v453_v52, 2  ;;  %v458_v25 = vrot.slane %v454_v11, 2 }
  0xf4   :  { %v444_v27 = vrot.slane %v440_v36, 2  ;;  %v407_v29 = vsel %vm321_vm4, %v405_v39, %v406_v9 }
  0xf5   :  { %v459_v48 = vsel %vm321_vm4, %v457_v24, %v458_v25  ;;  %v465_v25 = vstv %s6124_s9 }
  0xf6   :  { %298 = vrot.lane.b32.xlu0 %v297_v63, %s5417_s28  ;;  %369 = vrot.lane.b32.xlu1 %v368_v43, %s6738_s15  ;;  %v446_v57 = vsel %vm321_vm4, %v444_v27, %v445_v53 }
  0xfa   :  { %311 = vrot.lane.b32.xlu0 %v310_v46, %s5417_s28  ;;  %382 = vrot.lane.b32.xlu1 %v381_v5, %s6738_s15  ;;  %v502_v46 = vmul.f32 %v5520_v12, %v100_v3 }
  0xfe   :  { %421 = vrot.lane.b32.xlu0 %v420_v30, %s5417_s28  ;;  %395 = vrot.lane.b32.xlu1 %v394_v51, %s6738_s15 }
 0x102   :  { %434 = vrot.lane.b32.xlu0 %v433_v23, %s5417_s28  ;;  %408 = vrot.lane.b32.xlu1 %v407_v29, %s6738_s15 }
 0x106   :  { %447 = vrot.lane.b32.xlu0 %v446_v57, %s5417_s28  ;;  %460 = vrot.lane.b32.xlu1 %v459_v48, %s5417_s28 }
 0x11c   :  { %v506_v58 = vpop.permute.xlu0 %505  ;;  %v512_v21 = vpop.permute.xlu1 %511 }
 0x11d   :  { %v508_v63 = vadd.f32 %v506_v58, %v499_v32  ;;  %v514_v59 = vadd.f32 %v512_v21, %v500_v15  ;;  %v469_v32 = vstv %s6127_s10 }
 0x120   :  { %v530_v37 = vpop.permute.xlu0 %529  ;;  %v518_v42 = vpop.permute.xlu1 %517 }
 0x121   :  { %v532_v43 = vadd.f32 %v530_v37, %v508_v63  ;;  %v520_v0 = vadd.f32 %v518_v42, %v501_v45 }
 0x123   :  { %v559_v13 = vadd.f32 %v5897_v10, %v532_v43 }
 0x124   :  { %v536_v49 = vpop.permute.xlu0 %535  ;;  %v524_v26 = vpop.permute.xlu1 %523 }
 0x125   :  { %v538_v38 = vadd.f32 %v536_v49, %v514_v59  ;;  %v526_v61 = vadd.f32 %v524_v26, %v502_v46  ;;  %v861_v49 = vld [vmem:[%s6730_s3 + $0x8] sm:$0xff]  ;;  %v473_v26 = vstv %s6131_s0 }
 0x127   :  { %v568_v60 = vadd.f32 %v5902_v17, %v538_v38  ;;  %v477_v38 = vstv %s6133_s11 }
 0x128   :  { %v542_v14 = vpop.permute.xlu0 %541  ;;  %v595_v50 = vpop.permute.xlu1 %594 }
 0x129   :  { %v544_v5 = vadd.f32 %v542_v14, %v520_v0  ;;  %v597_v35 = vadd.f32 %v595_v50, %v559_v13  ;;  %v860_v13 = vld [vmem:[%s6730_s3] sm:$0xff] }
 0x12b   :  { %v577_v6 = vadd.f32 %v5905_v28, %v544_v5 }
 0x12c   :  { %v548_v1 = vpop.permute.xlu0 %547  ;;  %v606_v10 = vpop.permute.xlu1 %605 }
 0x12d   :  { %v550_v30 = vadd.f32 %v548_v1, %v526_v61  ;;  %v608_v20 = vadd.f32 %v606_v10, %v568_v60  ;;  %v4885_v60 = vpack.c.bf16 %v861_v49, %v860_v13 }
 0x12f   :  { %v586_v51 = vadd.f32 %v5910_v55, %v550_v30  ;;  %4886 = vmatprep.subr.bf16.mxu0 %v4885_v60 }
 0x130   :  { %v639_v2 = vpop.permute.xlu0 %638  ;;  %v617_v47 = vpop.permute.xlu1 %616  ;;  %4888 = vmatpush3.bf16.msra.mxu0 %v4885_v60 }
 0x131   :  { %v641_v36 = vadd.f32 %v639_v2, %v597_v35  ;;  %v619_v12 = vadd.f32 %v617_v47, %v577_v6 }
 0x133   :  { %v683_v17 = vadd.f32 %v5931_v56, %v641_v36 }
 0x134   :  { %v650_v39 = vpop.permute.xlu0 %649  ;;  %v628_v9 = vpop.permute.xlu1 %627 }
 0x135   :  { %v652_v52 = vadd.f32 %v650_v39, %v608_v20  ;;  %v630_v55 = vadd.f32 %v628_v9, %v586_v51 }
 0x137   :  { %v692_v3 = vadd.f32 %v5937_v7, %v652_v52 }
 0x138   :  { %v661_v11 = vpop.permute.xlu0 %660  ;;  %v719_v28 = vpop.permute.xlu1 %718 }
 0x139   :  { %v663_v23 = vadd.f32 %v661_v11, %v619_v12  ;;  %v721_v24 = vadd.f32 %v719_v28, %v683_v17 }
 0x13b   :  { %v701_v27 = vadd.f32 %v5950_v34, %v663_v23 }
 0x13c   :  { %v672_v29 = vpop.permute.xlu0 %671  ;;  %v730_v53 = vpop.permute.xlu1 %729 }
 0x13d   :  { %v674_v56 = vadd.f32 %v672_v29, %v630_v55  ;;  %v732_v34 = vadd.f32 %v730_v53, %v692_v3 }
 0x13f   :  { %v710_v7 = vadd.f32 %v5970_v22, %v674_v56 }
 0x140   :  { %v763_v57 = vpop.permute.xlu0 %762  ;;  %v741_v48 = vpop.permute.xlu1 %740 }
 0x141   :  { %v765_v58 = vadd.f32 %v763_v57, %v721_v24  ;;  %v743_v43 = vadd.f32 %v741_v48, %v701_v27 }
 0x143   :  { %v799_v21 = vadd.f32 %v765_v58, %v465_v25 }
 0x144   :  { %v774_v63 = vpop.permute.xlu0 %773  ;;  %v752_v37 = vpop.permute.xlu1 %751 }
 0x145   :  { %v776_v42 = vadd.f32 %v774_v63, %v732_v34  ;;  %v800_v15 = vmax.f32 %v799_v21, 0.0  ;;  %v754_v59 = vadd.f32 %v752_v37, %v710_v7 }
 0x147   :  { %v801_v22 = vadd.f32 %v776_v42, %v469_v32  ;;  %811 = vrot.lane.b32.xlu0 %v800_v15, %s5418_s13 }
 0x148   :  { %v785_v45 = vpop.permute.xlu0 %784  ;;  %v796_v0 = vpop.permute.xlu1 %795 }
 0x149   :  { %v787_v14 = vadd.f32 %v785_v45, %v743_v43  ;;  %v798_v50 = vadd.f32 %v796_v0, %v754_v59  ;;  %v802_v46 = vmax.f32 %v801_v22, 0.0 }
 0x14b   :  { %v803_v5 = vadd.f32 %v787_v14, %v473_v26  ;;  %v805_v61 = vadd.f32 %v798_v50, %v477_v38  ;;  %813 = vrot.lane.b32.xlu1 %v802_v46, %s5418_s13 }
 0x14c   :  { %v107_v6 = vpop.permute.xlu0 %106  ;;  %v115_v1 = vpop.permute.xlu1 %114 }
 0x14d   :  { %v804_v10 = vmax.f32 %v803_v5, 0.0  ;;  %v806_v30 = vmax.f32 %v805_v61, 0.0  ;;  %v109_v35 = vadd.f32 %v107_v6, %v5942_v33  ;;  %v117_v36 = vadd.f32 %v115_v1, %v5947_v8 }
 0x14f   :  { %815 = vrot.lane.b32.xlu0 %v804_v10, %s5418_s13  ;;  %817 = vrot.lane.b32.xlu1 %v806_v30, %s5418_s13 }
 0x150   :  { %v139_v51 = vpop.permute.xlu0 %138  ;;  %v123_v2 = vpop.permute.xlu1 %122 }
 0x151   :  { %v141_v47 = vadd.f32 %v139_v51, %v109_v35  ;;  %v125_v52 = vadd.f32 %v123_v2, %v5955_v19  ;;  %v862_v35 = vld [vmem:[%s6730_s3 + $0x10] sm:$0xff] }
 0x153   :  { %v177_v20 = vadd.f32 %v5993_v31, %v141_v47 }
 0x154   :  { %v147_v17 = vpop.permute.xlu0 %146  ;;  %v131_v39 = vpop.permute.xlu1 %130 }
 0x155   :  { %v149_v9 = vadd.f32 %v147_v17, %v117_v36  ;;  %v133_v33 = vadd.f32 %v131_v39, %v5960_v40 }
 0x157   :  { %v188_v12 = vadd.f32 %v5998_v54, %v149_v9  ;;  %v1001_v9 = vld [vmem:[#allocation8] sm:$0xff] }
 0x158   :  { %v155_v3 = vpop.permute.xlu0 %154  ;;  %v221_v11 = vpop.permute.xlu1 %220 }
 0x159   :  { %v157_v28 = vadd.f32 %v155_v3, %v125_v52  ;;  %v223_v8 = vadd.f32 %v221_v11, %v177_v20  ;;  %v1002_v52 = vld [vmem:[#allocation8 + $0x8] sm:$0xff] }
 0x15a   :  { %v6182_v3 = vpack.c.bf16 %v1002_v52, %v1001_v9 }
 0x15b   :  { %v199_v23 = vadd.f32 %v6001_v62, %v157_v28  ;;  %v1003_v28 = vld [vmem:[#allocation8 + $0x10] sm:$0xff] }
 0x15c   :  { %v163_v55 = vpop.permute.xlu0 %162  ;;  %v234_v27 = vpop.permute.xlu1 %233 }
 0x15d   :  { %v165_v29 = vadd.f32 %v163_v55, %v133_v33  ;;  %v236_v7 = vadd.f32 %v234_v27, %v188_v12  ;;  %v5419_v12 = vmov 0.0|0.0   ;;  %v1004_v33 = vld [vmem:[#allocation8 + $0x18] sm:$0xff]  ;;  %v5421_v55 = vmov 0.0  }
 0x15e   :  { %4893 = vmatprep.subr.bf16.mxu1 %v5419_v12  ;;  %4552 = vmatprep.mubr.msk.f32.mxu1 %vm5420_vm6, %v5421_v55 }
 0x15f   :  { %v210_v31 = vadd.f32 %v6006_v18, %v165_v29  ;;  %4895 = vmatpush3.bf16.msra.mxu1 %v6182_v3 }
 0x160   :  { %v273_v53 = vpop.permute.xlu0 %272  ;;  %v247_v56 = vpop.permute.xlu1 %246  ;;  %4896 = vmatprep.subr.bf16.mxu1 %v5419_v12 }
 0x161   :  { %v275_v24 = vadd.f32 %v273_v53, %v223_v8  ;;  %v249_v58 = vadd.f32 %v247_v56, %v199_v23  ;;  %v6188_v23 = vpack.c.bf16 %v1004_v33, %v1003_v28 }
 0x163   :  { %v326_v19 = vadd.f32 %v6025_v4, %v275_v24  ;;  %4898 = vmatpush3.bf16.msra.mxu1 %v6188_v23 }
 0x164   :  { %v286_v54 = vpop.permute.xlu0 %285  ;;  %v260_v57 = vpop.permute.xlu1 %259  ;;  %4899 = vmatprep.subr.bf16.mxu1 %v5419_v12 }
 0x165   :  { %v288_v48 = vadd.f32 %v286_v54, %v236_v7  ;;  %v262_v63 = vadd.f32 %v260_v57, %v210_v31  ;;  %v6218_v57 = vld [vmem:[%s6732_s5] ss:$0 sm:$0xff]  ;;  %s5422_s5 = smov 64  }
 0x166   :  { %4553 = vmatmul.mubr.f32.vlgmr.msra.gmra.mrb[0].mxu1 %v5421_v55 }
 0x167   :  { %v337_v40 = vadd.f32 %v6030_v44, %v288_v48  ;;  %4901 = vmatpush3.bf16.msra.mxu1 %v6182_v3  ;;  %4563 = vmatprep.mubr.msk.f32.mxu1 %vm5420_vm6, %v5421_v55 }
 0x168   :  { %v299_v62 = vpop.permute.xlu0 %298  ;;  %v370_v34 = vpop.permute.xlu1 %369  ;;  %4902 = vmatprep.subr.bf16.mxu1 %v5419_v12 }
 0x169   :  { %v301_v21 = vadd.f32 %v299_v62, %v249_v58  ;;  %v372_v43 = vadd.f32 %v370_v34, %v326_v19 }
 0x16b   :  { %v348_v18 = vadd.f32 %v6039_v41, %v301_v21  ;;  %4904 = vmatpush3.bf16.msra.mxu1 %v6188_v23 }
 0x16c   :  { %v312_v37 = vpop.permute.xlu0 %311  ;;  %v383_v42 = vpop.permute.xlu1 %382  ;;  %4911 = vmatprep.subr.bf16.mxu1 %v5419_v12 }
 0x16d   :  { %v314_v15 = vadd.f32 %v312_v37, %v262_v63  ;;  %v385_v49 = vadd.f32 %v383_v42, %v337_v40 }
 0x16f   :  { %v359_v4 = vadd.f32 %v6042_v16, %v314_v15 }
 0x170   :  { %v422_v22 = vpop.permute.xlu0 %421  ;;  %v396_v59 = vpop.permute.xlu1 %395 }
 0x171   :  { %v424_v13 = vadd.f32 %v422_v22, %v372_v43  ;;  %v398_v14 = vadd.f32 %v396_v59, %v348_v18 }
 0x173   :  { %v466_v44 = vadd.f32 %v465_v25, %v424_v13 }
 0x174   :  { %v435_v45 = vpop.permute.xlu0 %434  ;;  %v409_v0 = vpop.permute.xlu1 %408 }
 0x175   :  { %v437_v60 = vadd.f32 %v435_v45, %v385_v49  ;;  %v411_v50 = vadd.f32 %v409_v0, %v359_v4  ;;  %v467_v10 = vmax.f32 %v466_v44, 0.0 }
 0x177   :  { %v470_v41 = vadd.f32 %v469_v32, %v437_v60  ;;  %v863_v32 = vld [vmem:[%s6730_s3 + $0x18] sm:$0xff] }
 0x178   :  { %v448_v46 = vpop.permute.xlu0 %447  ;;  %v461_v5 = vpop.permute.xlu1 %460  ;;  %v4889_v2 = vpack.c.bf16 %v863_v32, %v862_v35 }
 0x179   :  { %v450_v61 = vadd.f32 %v448_v46, %v398_v14  ;;  %v463_v6 = vadd.f32 %v461_v5, %v411_v50  ;;  %v471_v51 = vmax.f32 %v470_v41, 0.0 }
 0x17a   :  { %4890 = vmatprep.subr.bf16.mxu0 %v4889_v2 }
 0x17b   :  { %v474_v16 = vadd.f32 %v473_v26, %v450_v61  ;;  %v478_v1 = vadd.f32 %v477_v38, %v463_v6  ;;  %4892 = vmatpush3.bf16.msra.mxu0 %v4889_v2 }
 0x17c   :  { %4905 = vmatprep.subr.bf16.mxu0 %v5419_v12 }
 0x17d   :  { %v475_v38 = vmax.f32 %v474_v16, 0.0  ;;  %v479_v39 = vmax.f32 %v478_v1, 0.0 }
 0x1b9   :  { %v812_v30 = vpop.permute.xlu0 %811 }
 0x1ba   :  { %v824_v25 = vsel %vm823_vm5, %v467_v10, %v812_v30 }
 0x1bb   :  { %828 = vxpose.xlu0.b32.start [1/4] (short) (narrow) %v824_v25, 64 }
 0x1bd   :  { %v814_v47 = vpop.permute.xlu1 %813 }
 0x1be   :  { %v825_v26 = vsel %vm823_vm5, %v471_v51, %v814_v47 }
 0x1bf   :  { %829 = vxpose.xlu0.b32.cont [2/4] (short) (narrow) %v825_v26, 64 }
 0x1c1   :  { %v816_v36 = vpop.permute.xlu0 %815  ;;  %v818_v17 = vpop.permute.xlu1 %817 }
 0x1c2   :  { %v826_v20 = vsel %vm823_vm5, %v475_v38, %v816_v36  ;;  %v827_v11 = vsel %vm823_vm5, %v479_v39, %v818_v17 }
 0x1c3   :  { %830 = vxpose.xlu0.b32.cont [3/4] (short) (narrow) %v826_v20, 64 }
 0x1c7   :  { %831 = vxpose.xlu0.b32.end [4/4] (short) (narrow) %v827_v11, 64 }
 0x239   :  { %v1078_v19 = vpop.f32.mrb[0].mxu1 }
 0x23a   :  { %v4554_v54 = vpop.f32.mrb[1].mxu1 }
 0x23b   :  { %v844_v27 = vpop.trf.xlu0 }
 0x23c   :  { %4532 = vmatprep.mubr.msk.f32.mxu0 %vm871_vm7, %v844_v27 }
 0x23f   :  { %v845_v29 = vpop.trf.xlu0 }
 0x240   :  { %4533 = vmatmul.mubr.msk.f32.vlgmr.msra.gmra.mrb[0].mxu0 %vm871_vm7, %v845_v29 }
 0x241   :  { %4907 = vmatpush3.bf16.msra.mxu0 %v6182_v3 }
 0x242   :  { %4908 = vmatprep.subr.bf16.mxu0 %v5419_v12 }
 0x243   :  { %v846_v8 = vpop.trf.xlu0 }
 0x244   :  { %4535 = vmatprep.mubr.msk.f32.mxu0 %vm871_vm7, %v846_v8 }
 0x245   :  { %4910 = vmatpush3.bf16.msra.mxu0 %v6188_v23 }
 0x246   :  { %4917 = vmatprep.subr.bf16.mxu0 %v5419_v12 }
 0x247   :  { %v847_v31 = vpop.trf.xlu0 }
 0x248   :  { %4536 = vmatmul.mubr.msk.f32.gmra.mrb[2].mxu0 %vm871_vm7, %v847_v31 }
 0x24b   :  { %v848_v53 = vpop.trf.xlu0 }
 0x24c   :  { %4538 = vmatprep.mubr.msk.f32.mxu0 %vm871_vm7, %v848_v53 }
 0x24f   :  { %v849_v56 = vpop.trf.xlu0 }
 0x250   :  { %4539 = vmatmul.mubr.msk.f32.gmra.mrb[4].mxu0 %vm871_vm7, %v849_v56 }
 0x253   :  { %v850_v24 = vpop.trf.xlu0 }
 0x254   :  { %4541 = vmatprep.mubr.msk.f32.mxu0 %vm871_vm7, %v850_v24 }
 0x257   :  { %v851_v7 = vpop.trf.xlu0 }
 0x258   :  { %4542 = vmatmul.mubr.msk.f32.gmra.mrb[6].mxu0 %vm871_vm7, %v851_v7 }
 0x259   :  { %4574 = vmatprep.mubr.msk.f32.mxu0 %vm5420_vm6, %v5421_v55 }
 0x313   :  { %v4534_v48 = vpop.f32.mrb[0].mxu0 }
 0x314   :  { %v6221_v58 = vadd.f32 %v4534_v48, %v6218_v57  ;;  %v962_v40 = vpop.f32.mrb[1].mxu0 }
 0x315   :  { %v963_v62 = vadd.f32 %v6218_v57, %v962_v40 }
 0x316   :  { %v1946_v43 = vrot.slane %v6221_v58, 1  ;;  %v2051_v4 = vrot.slane %v6221_v58, 2  ;;  %v2157_v13 = vrot.slane %v6221_v58, 3  ;;  %v2260_v49 = vrot.slane %v6221_v58, 4 }
 0x317   :  { %v1108_v42 = vrot.slane %v963_v62, 1  ;;  %v1213_v45 = vrot.slane %v963_v62, 2  ;;  %v1319_v0 = vrot.slane %v963_v62, 3  ;;  %v1422_v60 = vrot.slane %v963_v62, 4 }
 0x318   :  { %v1527_v14 = vrot.slane %v963_v62, 5  ;;  %v1632_v41 = vrot.slane %v963_v62, 6  ;;  %v1737_v50 = vrot.slane %v963_v62, 7  ;;  %v2365_v46 = vrot.slane %v6221_v58, 5 }
 0x319   :  { %v2470_v61 = vrot.slane %v6221_v58, 6  ;;  %v2575_v6 = vrot.slane %v6221_v58, 7 }
 0x31b   :  { %v4537_v34 = vpop.f32.mrb[2].mxu0 }
 0x31c   :  { %v6225_v21 = vadd.f32 %v4537_v34, %v6218_v57  ;;  %v972_v63 = vpop.f32.mrb[3].mxu0 }
 0x31d   :  { %v6228_v18 = vadd.f32 %v6218_v57, %v972_v63 }
 0x31e   :  { %v1006_v37 = vrot.slane %v6225_v21, 5  ;;  %v1110_v15 = vrot.slane %v6225_v21, 6  ;;  %v3621_v16 = vrot.slane %v6225_v21, 1  ;;  %v3726_v35 = vrot.slane %v6225_v21, 2 }
 0x31f   :  { %v2784_v30 = vrot.slane %v6228_v18, 1  ;;  %v2889_v25 = vrot.slane %v6228_v18, 2  ;;  %v2995_v51 = vrot.slane %v6228_v18, 3  ;;  %v3098_v2 = vrot.slane %v6228_v18, 4 }
 0x320   :  { %v1008_v22 = vsel %vm73_vm0, %v963_v62, %v1006_v37  ;;  %v6238_v59 = vsel %vm73_vm0, %v1108_v42, %v1110_v15  ;;  %v3203_v47 = vrot.slane %v6228_v18, 5 }
 0x321   :  { %v6242_v44 = vadd.f32 %v1078_v19, %v1008_v22 }
 0x323   :  { %5094 = vtanh.f32 %v6242_v44  ;;  %v4540_v5 = vpop.f32.mrb[4].mxu0 }
 0x324   :  { %v988_v1 = vadd.f32 %v4540_v5, %v6218_v57  ;;  %v982_v10 = vpop.f32.mrb[5].mxu0 }
 0x325   :  { %v983_v32 = vadd.f32 %v6218_v57, %v982_v10 }
 0x326   :  { %v2054_v26 = vrot.slane %v988_v1, 7  ;;  %v6258_v38 = vsel %vm73_vm0, %v2157_v13, %v988_v1  ;;  %v2262_v36 = vrot.slane %v988_v1, 1  ;;  %v2367_v20 = vrot.slane %v988_v1, 2 }
 0x327   :  { %v1216_v17 = vrot.slane %v983_v32, 7  ;;  %v6261_v39 = vsel %vm73_vm0, %v1319_v0, %v983_v32  ;;  %v1424_v9 = vrot.slane %v983_v32, 1  ;;  %v1529_v52 = vrot.slane %v983_v32, 2 }
 0x328   :  { %v1634_v11 = vrot.slane %v983_v32, 3  ;;  %v1739_v28 = vrot.slane %v983_v32, 4  ;;  %v1842_v33 = vrot.slane %v983_v32, 5  ;;  %v1948_v27 = vrot.slane %v983_v32, 6 }
 0x329   :  { %v6264_v29 = vsel %vm73_vm0, %v1213_v45, %v1216_v17  ;;  %v6267_v8 = vsel %vm73_vm0, %v1422_v60, %v1424_v9  ;;  %v6270_v31 = vsel %vm73_vm0, %v1527_v14, %v1529_v52  ;;  %v6273_v53 = vsel %vm73_vm0, %v2051_v4, %v2054_v26 }
 0x32a   :  { %v6276_v56 = vsel %vm73_vm0, %v1632_v41, %v1634_v11  ;;  %v6279_v24 = vsel %vm73_vm0, %v1737_v50, %v1739_v28  ;;  %v6283_v7 = vsel %vm73_vm0, %v6221_v58, %v1842_v33  ;;  %v6286_v19 = vsel %vm73_vm0, %v1946_v43, %v1948_v27 }
 0x32b   :  { %v4543_v54 = vpop.f32.mrb[6].mxu0  ;;  %v6289_v48 = vsel %vm73_vm0, %v2260_v49, %v2262_v36  ;;  %v6292_v40 = vsel %vm73_vm0, %v2365_v46, %v2367_v20  ;;  %v2472_v62 = vrot.slane %v988_v1, 3  ;;  %v2577_v34 = vrot.slane %v988_v1, 4 }
 0x32c   :  { %v998_v63 = vadd.f32 %v4543_v54, %v6218_v57  ;;  %v992_v42 = vpop.f32.mrb[7].mxu0  ;;  %v2680_v15 = vrot.slane %v988_v1, 5  ;;  %v2786_v4 = vrot.slane %v988_v1, 6  ;;  %v3832_v58 = vrot.slane %v6225_v21, 3 }
 0x32d   :  { %v5095_v22 = vpop.eup %5094  ;;  %v993_v43 = vadd.f32 %v6218_v57, %v992_v42  ;;  %v6298_v13 = vsel %vm73_vm0, %v2470_v61, %v2472_v62  ;;  %v6301_v49 = vsel %vm73_vm0, %v2575_v6, %v2577_v34  ;;  %v3308_v45 = vrot.slane %v6228_v18, 6 }
 0x32e   :  { %1092 = vrot.lane.b32.xlu1 %v5095_v22, %s5422_s5  ;;  %v6307_v0 = vsel %vm73_vm0, %v6228_v18, %v2680_v15  ;;  %v6310_v60 = vsel %vm73_vm0, %v2784_v30, %v2786_v4  ;;  %v3729_v14 = vrot.slane %v998_v63, 7  ;;  %v6313_v57 = vsel %vm73_vm0, %v3832_v58, %v998_v63 }
 0x32f   :  { %v2892_v41 = vrot.slane %v993_v43, 7  ;;  %v6316_v50 = vsel %vm73_vm0, %v2995_v51, %v993_v43  ;;  %v3100_v46 = vrot.slane %v993_v43, 1  ;;  %v3205_v5 = vrot.slane %v993_v43, 2 }
 0x330   :  { %v3310_v61 = vrot.slane %v993_v43, 3  ;;  %v3413_v6 = vrot.slane %v6228_v18, 7  ;;  %v3415_v1 = vrot.slane %v993_v43, 4  ;;  %v3518_v10 = vrot.slane %v993_v43, 5 }
 0x331   :  { %v6320_v32 = vsel %vm73_vm0, %v2889_v25, %v2892_v41  ;;  %v6323_v30 = vsel %vm73_vm0, %v3098_v2, %v3100_v46  ;;  %v6326_v26 = vsel %vm73_vm0, %v3203_v47, %v3205_v5  ;;  %v3623_v36 = vrot.slane %v993_v43, 6 }
 0x332   :  { %v6329_v51 = vsel %vm73_vm0, %v3308_v45, %v3310_v61  ;;  %v6332_v20 = vsel %vm73_vm0, %v3413_v6, %v3415_v1  ;;  %v6336_v18 = vsel %vm73_vm0, %v6225_v21, %v3518_v10  ;;  %v3935_v25 = vrot.slane %v6225_v21, 4 }
 0x333   :  { %v6342_v2 = vsel %vm73_vm0, %v3621_v16, %v3623_v36  ;;  %v6347_v47 = vsel %vm73_vm0, %v3726_v35, %v3729_v14  ;;  %v3937_v17 = vrot.slane %v998_v63, 1  ;;  %v4040_v9 = vrot.slane %v998_v63, 2 }
 0x334   :  { %v4296_v28 = vmul.f32 -1.442695, %v6242_v44 }
 0x335   :  { %v6350_v52 = vsel %vm73_vm0, %v3935_v25, %v3937_v17  ;;  %v6355_v11 = vsel %vm73_vm0, %v1006_v37, %v4040_v9 }
 0x336   :  { %5096 = vpow2.f32 %v4296_v28 }
 0x340   :  { %v5097_v16 = vpop.eup %5096 }
 0x341   :  { %v1086_v33 = vadd.f32 1.0, %v5097_v16 }
 0x343   :  { %5098 = vrcp.f32 %v1086_v33 }
 0x34d   :  { %v5099_v27 = vpop.eup %5098 }
 0x34e   :  { %v1090_v62 = vmul.f32 0.0, %v5099_v27 }
 0x3a0   :  { %v1093_v54 = vpop.permute.xlu1 %1092 }
 0x3a1   :  { %v1095_v35 = vmul.f32 %v5099_v27, %v1093_v54 }
 0x3a3   :  { %1097 = vrot.lane.b32.xlu1 %v1095_v35, %s5423_s12 }
 0x415   :  { %v1098_v34 = vpop.permute.xlu1 %1097 }
 0x416   :  { %v1100_v63 = vadd.f32 %v1098_v34, %v1090_v62 }
 0x418   :  { %5100 = vtanh.f32 %v1100_v63 }
 0x422   :  { %v5101_v21 = vpop.eup %5100 }
 0x423   :  { %1103 = vrot.lane.b32.xlu1 %v5101_v21, %s5422_s5 }
 0x495   :  { %v1104_v37 = vpop.permute.xlu1 %1103 }
 0x496   :  { %v1106_v42 = vmul.f32 %v5099_v27, %v1104_v37 }
 0x498   :  { %1114 = vrot.lane.b32.xlu1 %v1106_v42, %s5423_s12 }
 0x50a   :  { %v1115_v44 = vpop.permute.xlu1 %1114 }
 0x50b   :  { %4564 = vmatmul.mubr.msk.f32.vlgmr.msra.gmra.mrb[2].mxu1 %vm871_vm7, %v1115_v44 }
 0x50c   :  { %4913 = vmatpush3.bf16.msra.mxu1 %v6182_v3  ;;  %4585 = vmatprep.mubr.msk.f32.mxu1 %vm5420_vm6, %v5421_v55 }
 0x50d   :  { %4914 = vmatprep.subr.bf16.mxu1 %v5419_v12 }
 0x510   :  { %4916 = vmatpush3.bf16.msra.mxu1 %v6188_v23 }
 0x511   :  { %4923 = vmatprep.subr.bf16.mxu1 %v5419_v12 }
 0x5de   :  { %v1184_v15 = vpop.f32.mrb[2].mxu1 }
 0x5df   :  { %v1188_v4 = vadd.f32 %v1184_v15, %v6238_v59  ;;  %v4565_v58 = vpop.f32.mrb[3].mxu1 }
 0x5e1   :  { %5102 = vtanh.f32 %v1188_v4  ;;  %v4298_v43 = vmul.f32 -1.442695, %v1188_v4 }
 0x5e3   :  { %5104 = vpow2.f32 %v4298_v43 }
 0x5eb   :  { %v5103_v22 = vpop.eup %5102 }
 0x5ec   :  { %1198 = vrot.lane.b32.xlu1 %v5103_v22, %s5422_s5 }
 0x5ed   :  { %v5105_v45 = vpop.eup %5104 }
 0x5ee   :  { %v1192_v14 = vadd.f32 1.0, %v5105_v45 }
 0x5f0   :  { %5106 = vrcp.f32 %v1192_v14 }
 0x5fa   :  { %v5107_v41 = vpop.eup %5106 }
 0x5fb   :  { %v1196_v61 = vmul.f32 %v5107_v41, %v1100_v63 }
 0x65e   :  { %v1199_v46 = vpop.permute.xlu1 %1198 }
 0x65f   :  { %v1201_v5 = vmul.f32 %v5107_v41, %v1199_v46 }
 0x661   :  { %1203 = vrot.lane.b32.xlu1 %v1201_v5, %s5423_s12 }
 0x6d3   :  { %v1204_v6 = vpop.permute.xlu1 %1203 }
 0x6d4   :  { %v1206_v1 = vadd.f32 %v1204_v6, %v1196_v61 }
 0x6d6   :  { %5108 = vtanh.f32 %v1206_v1 }
 0x6e0   :  { %v5109_v59 = vpop.eup %5108 }
 0x6e1   :  { %1209 = vrot.lane.b32.xlu1 %v5109_v59, %s5422_s5 }
 0x753   :  { %v1210_v10 = vpop.permute.xlu1 %1209 }
 0x754   :  { %v1212_v36 = vmul.f32 %v5107_v41, %v1210_v10 }
 0x756   :  { %1220 = vrot.lane.b32.xlu1 %v1212_v36, %s5423_s12 }
 0x7c8   :  { %v1221_v25 = vpop.permute.xlu1 %1220 }
 0x7c9   :  { %4575 = vmatmul.mubr.msk.f32.vlgmr.msra.gmra.mrb[8].mxu0 %vm871_vm7, %v1221_v25 }
 0x7ca   :  { %4919 = vmatpush3.bf16.msra.mxu0 %v6182_v3  ;;  %4596 = vmatprep.mubr.msk.f32.mxu0 %vm5420_vm6, %v5421_v55 }
 0x7cb   :  { %4920 = vmatprep.subr.bf16.mxu0 %v5419_v12 }
 0x7ce   :  { %4922 = vmatpush3.bf16.msra.mxu0 %v6188_v23 }
 0x7cf   :  { %4929 = vmatprep.subr.bf16.mxu0 %v5419_v12 }
 0x89c   :  { %v1290_v17 = vpop.f32.mrb[8].mxu0 }
 0x89d   :  { %v1294_v9 = vadd.f32 %v1290_v17, %v6264_v29  ;;  %v4576_v28 = vpop.f32.mrb[9].mxu0 }
 0x89f   :  { %5110 = vtanh.f32 %v1294_v9  ;;  %v4300_v33 = vmul.f32 -1.442695, %v1294_v9 }
 0x8a1   :  { %5112 = vpow2.f32 %v4300_v33 }
 0x8a9   :  { %v5111_v16 = vpop.eup %5110 }
 0x8aa   :  { %1304 = vrot.lane.b32.xlu1 %v5111_v16, %s5422_s5 }
 0x8ab   :  { %v5113_v27 = vpop.eup %5112 }
 0x8ac   :  { %v1298_v54 = vadd.f32 1.0, %v5113_v27 }
 0x8ae   :  { %5114 = vrcp.f32 %v1298_v54 }
 0x8b8   :  { %v5115_v35 = vpop.eup %5114 }
 0x8b9   :  { %v1302_v63 = vmul.f32 %v5115_v35, %v1206_v1 }
 0x91c   :  { %v1305_v62 = vpop.permute.xlu1 %1304 }
 0x91d   :  { %v1307_v34 = vmul.f32 %v5115_v35, %v1305_v62 }
 0x91f   :  { %1309 = vrot.lane.b32.xlu1 %v1307_v34, %s5423_s12 }
 0x991   :  { %v1310_v21 = vpop.permute.xlu1 %1309 }
 0x992   :  { %v1312_v37 = vadd.f32 %v1310_v21, %v1302_v63 }
 0x994   :  { %5116 = vtanh.f32 %v1312_v37 }
 0x99e   :  { %v5117_v29 = vpop.eup %5116 }
 0x99f   :  { %1315 = vrot.lane.b32.xlu1 %v5117_v29, %s5422_s5 }
 0xa11   :  { %v1316_v42 = vpop.permute.xlu1 %1315 }
 0xa12   :  { %v1318_v44 = vmul.f32 %v5115_v35, %v1316_v42 }
 0xa14   :  { %1323 = vrot.lane.b32.xlu0 %v1318_v44, %s5423_s12 }
 0xa86   :  { %v1324_v15 = vpop.permute.xlu0 %1323 }
 0xa87   :  { %4586 = vmatmul.mubr.msk.f32.vlgmr.msra.gmra.mrb[4].mxu1 %vm871_vm7, %v1324_v15 }
 0xa88   :  { %4925 = vmatpush3.bf16.msra.mxu1 %v6182_v3  ;;  %4607 = vmatprep.mubr.msk.f32.mxu1 %vm5420_vm6, %v5421_v55 }
 0xa89   :  { %4926 = vmatprep.subr.bf16.mxu1 %v5419_v12 }
 0xa8c   :  { %4928 = vmatpush3.bf16.msra.mxu1 %v6188_v23 }
 0xa8d   :  { %4935 = vmatprep.subr.bf16.mxu1 %v5419_v12 }
 0xb5a   :  { %v1393_v4 = vpop.f32.mrb[4].mxu1 }
 0xb5b   :  { %v1397_v58 = vadd.f32 %v1393_v4, %v6261_v39  ;;  %v4587_v22 = vpop.f32.mrb[5].mxu1 }
 0xb5d   :  { %5118 = vtanh.f32 %v1397_v58  ;;  %v4302_v45 = vmul.f32 -1.442695, %v1397_v58 }
 0xb5f   :  { %5120 = vpow2.f32 %v4302_v45 }
 0xb67   :  { %v5119_v43 = vpop.eup %5118 }
 0xb68   :  { %1407 = vrot.lane.b32.xlu1 %v5119_v43, %s5422_s5 }
 0xb69   :  { %v5121_v14 = vpop.eup %5120 }
 0xb6a   :  { %v1401_v41 = vadd.f32 1.0, %v5121_v14 }
 0xb6c   :  { %5122 = vrcp.f32 %v1401_v41 }
 0xb76   :  { %v5123_v46 = vpop.eup %5122 }
 0xb77   :  { %v1405_v6 = vmul.f32 %v5123_v46, %v1312_v37 }
 0xbda   :  { %v1408_v5 = vpop.permute.xlu1 %1407 }
 0xbdb   :  { %v1410_v61 = vmul.f32 %v5123_v46, %v1408_v5 }
 0xbdd   :  { %1412 = vrot.lane.b32.xlu1 %v1410_v61, %s5423_s12 }
 0xc4f   :  { %v1413_v1 = vpop.permute.xlu1 %1412 }
 0xc50   :  { %v1415_v59 = vadd.f32 %v1413_v1, %v1405_v6 }
 0xc52   :  { %5124 = vtanh.f32 %v1415_v59 }
 0xc5c   :  { %v5125_v39 = vpop.eup %5124 }
 0xc5d   :  { %1418 = vrot.lane.b32.xlu1 %v5125_v39, %s5422_s5 }
 0xccf   :  { %v1419_v10 = vpop.permute.xlu1 %1418 }
 0xcd0   :  { %v1421_v36 = vmul.f32 %v5123_v46, %v1419_v10 }
 0xcd2   :  { %1428 = vrot.lane.b32.xlu1 %v1421_v36, %s5423_s12 }
 0xd44   :  { %v1429_v25 = vpop.permute.xlu1 %1428 }
 0xd45   :  { %4597 = vmatmul.mubr.msk.f32.vlgmr.msra.gmra.mrb[10].mxu0 %vm871_vm7, %v1429_v25 }
 0xd46   :  { %4931 = vmatpush3.bf16.msra.mxu0 %v6182_v3  ;;  %4618 = vmatprep.mubr.msk.f32.mxu0 %vm5420_vm6, %v5421_v55 }
 0xd47   :  { %4932 = vmatprep.subr.bf16.mxu0 %v5419_v12 }
 0xd4a   :  { %4934 = vmatpush3.bf16.msra.mxu0 %v6188_v23 }
 0xd4b   :  { %4941 = vmatprep.subr.bf16.mxu0 %v5419_v12 }
 0xe18   :  { %v1498_v17 = vpop.f32.mrb[10].mxu0 }
 0xe19   :  { %v1502_v9 = vadd.f32 %v1498_v17, %v6267_v8  ;;  %v4598_v28 = vpop.f32.mrb[11].mxu0 }
 0xe1b   :  { %5126 = vtanh.f32 %v1502_v9  ;;  %v4304_v33 = vmul.f32 -1.442695, %v1502_v9 }
 0xe1d   :  { %5128 = vpow2.f32 %v4304_v33 }
 0xe25   :  { %v5127_v16 = vpop.eup %5126 }
 0xe26   :  { %1512 = vrot.lane.b32.xlu1 %v5127_v16, %s5422_s5 }
 0xe27   :  { %v5129_v27 = vpop.eup %5128 }
 0xe28   :  { %v1506_v54 = vadd.f32 1.0, %v5129_v27 }
 0xe2a   :  { %5130 = vrcp.f32 %v1506_v54 }
 0xe34   :  { %v5131_v35 = vpop.eup %5130 }
 0xe35   :  { %v1510_v63 = vmul.f32 %v5131_v35, %v1415_v59 }
 0xe98   :  { %v1513_v62 = vpop.permute.xlu1 %1512 }
 0xe99   :  { %v1515_v34 = vmul.f32 %v5131_v35, %v1513_v62 }
 0xe9b   :  { %1517 = vrot.lane.b32.xlu1 %v1515_v34, %s5423_s12 }
 0xf0d   :  { %v1518_v21 = vpop.permute.xlu1 %1517 }
 0xf0e   :  { %v1520_v37 = vadd.f32 %v1518_v21, %v1510_v63 }
 0xf10   :  { %5132 = vtanh.f32 %v1520_v37 }
 0xf1a   :  { %v5133_v8 = vpop.eup %5132 }
 0xf1b   :  { %1523 = vrot.lane.b32.xlu1 %v5133_v8, %s5422_s5 }
 0xf8d   :  { %v1524_v29 = vpop.permute.xlu1 %1523 }
 0xf8e   :  { %v1526_v42 = vmul.f32 %v5131_v35, %v1524_v29 }
 0xf90   :  { %1533 = vrot.lane.b32.xlu1 %v1526_v42, %s5423_s12 }
0x1002   :  { %v1534_v44 = vpop.permute.xlu1 %1533 }
0x1003   :  { %4608 = vmatmul.mubr.msk.f32.vlgmr.msra.gmra.mrb[6].mxu1 %vm871_vm7, %v1534_v44 }
0x1004   :  { %4937 = vmatpush3.bf16.msra.mxu1 %v6182_v3  ;;  %4629 = vmatprep.mubr.msk.f32.mxu1 %vm5420_vm6, %v5421_v55 }
0x1005   :  { %4938 = vmatprep.subr.bf16.mxu1 %v5419_v12 }
0x1008   :  { %4940 = vmatpush3.bf16.msra.mxu1 %v6188_v23 }
0x1009   :  { %4947 = vmatprep.subr.bf16.mxu1 %v5419_v12 }
0x10d6   :  { %v1603_v15 = vpop.f32.mrb[6].mxu1 }
0x10d7   :  { %v1607_v4 = vadd.f32 %v1603_v15, %v6270_v31  ;;  %v4609_v58 = vpop.f32.mrb[7].mxu1 }
0x10d9   :  { %5134 = vtanh.f32 %v1607_v4  ;;  %v4306_v43 = vmul.f32 -1.442695, %v1607_v4 }
0x10db   :  { %5136 = vpow2.f32 %v4306_v43 }
0x10e3   :  { %v5135_v22 = vpop.eup %5134 }
0x10e4   :  { %1617 = vrot.lane.b32.xlu1 %v5135_v22, %s5422_s5 }
0x10e5   :  { %v5137_v45 = vpop.eup %5136 }
0x10e6   :  { %v1611_v14 = vadd.f32 1.0, %v5137_v45 }
0x10e8   :  { %5138 = vrcp.f32 %v1611_v14 }
0x10f2   :  { %v5139_v41 = vpop.eup %5138 }
0x10f3   :  { %v1615_v61 = vmul.f32 %v5139_v41, %v1520_v37 }
0x1156   :  { %v1618_v46 = vpop.permute.xlu1 %1617 }
0x1157   :  { %v1620_v5 = vmul.f32 %v5139_v41, %v1618_v46 }
0x1159   :  { %1622 = vrot.lane.b32.xlu1 %v1620_v5, %s5423_s12 }
0x11cb   :  { %v1623_v6 = vpop.permute.xlu1 %1622 }
0x11cc   :  { %v1625_v1 = vadd.f32 %v1623_v6, %v1615_v61 }
0x11ce   :  { %5140 = vtanh.f32 %v1625_v1 }
0x11d8   :  { %v5141_v31 = vpop.eup %5140 }
0x11d9   :  { %1628 = vrot.lane.b32.xlu1 %v5141_v31, %s5422_s5 }
0x124b   :  { %v1629_v59 = vpop.permute.xlu1 %1628 }
0x124c   :  { %v1631_v39 = vmul.f32 %v5139_v41, %v1629_v59 }
0x124e   :  { %1638 = vrot.lane.b32.xlu1 %v1631_v39, %s5423_s12 }
0x12c0   :  { %v1639_v10 = vpop.permute.xlu1 %1638 }
0x12c1   :  { %4619 = vmatmul.mubr.msk.f32.vlgmr.msra.gmra.mrb[12].mxu0 %vm871_vm7, %v1639_v10 }
0x12c2   :  { %4943 = vmatpush3.bf16.msra.mxu0 %v6182_v3  ;;  %4640 = vmatprep.mubr.msk.f32.mxu0 %vm5420_vm6, %v5421_v55 }
0x12c3   :  { %4944 = vmatprep.subr.bf16.mxu0 %v5419_v12 }
0x12c6   :  { %4946 = vmatpush3.bf16.msra.mxu0 %v6188_v23 }
0x12c7   :  { %4953 = vmatprep.subr.bf16.mxu0 %v5419_v12 }
0x1394   :  { %v1708_v36 = vpop.f32.mrb[12].mxu0 }
0x1395   :  { %v1712_v25 = vadd.f32 %v1708_v36, %v6276_v56  ;;  %v4620_v17 = vpop.f32.mrb[13].mxu0 }
0x1397   :  { %5142 = vtanh.f32 %v1712_v25  ;;  %v4308_v28 = vmul.f32 -1.442695, %v1712_v25 }
0x1399   :  { %5144 = vpow2.f32 %v4308_v28 }
0x13a1   :  { %v5143_v9 = vpop.eup %5142 }
0x13a2   :  { %1722 = vrot.lane.b32.xlu1 %v5143_v9, %s5422_s5 }
0x13a3   :  { %v5145_v16 = vpop.eup %5144 }
0x13a4   :  { %v1716_v33 = vadd.f32 1.0, %v5145_v16 }
0x13a6   :  { %5146 = vrcp.f32 %v1716_v33 }
0x13b0   :  { %v5147_v27 = vpop.eup %5146 }
0x13b1   :  { %v1720_v62 = vmul.f32 %v5147_v27, %v1625_v1 }
0x1414   :  { %v1723_v54 = vpop.permute.xlu1 %1722 }
0x1415   :  { %v1725_v35 = vmul.f32 %v5147_v27, %v1723_v54 }
0x1417   :  { %1727 = vrot.lane.b32.xlu1 %v1725_v35, %s5423_s12 }
0x1489   :  { %v1728_v34 = vpop.permute.xlu1 %1727 }
0x148a   :  { %v1730_v63 = vadd.f32 %v1728_v34, %v1720_v62 }
0x148c   :  { %5148 = vtanh.f32 %v1730_v63 }
0x1496   :  { %v5149_v56 = vpop.eup %5148 }
0x1497   :  { %1733 = vrot.lane.b32.xlu0 %v5149_v56, %s5422_s5 }
0x1509   :  { %v1734_v21 = vpop.permute.xlu0 %1733 }
0x150a   :  { %v1736_v37 = vmul.f32 %v5147_v27, %v1734_v21 }
0x150c   :  { %1743 = vrot.lane.b32.xlu1 %v1736_v37, %s5423_s12 }
0x157e   :  { %v1744_v8 = vpop.permute.xlu1 %1743 }
0x157f   :  { %4630 = vmatmul.mubr.msk.f32.vlgmr.msra.gmra.mrb[8].mxu1 %vm871_vm7, %v1744_v8 }
0x1580   :  { %4949 = vmatpush3.bf16.msra.mxu1 %v6182_v3  ;;  %4651 = vmatprep.mubr.msk.f32.mxu1 %vm5420_vm6, %v5421_v55 }
0x1581   :  { %4950 = vmatprep.subr.bf16.mxu1 %v5419_v12 }
0x1584   :  { %4952 = vmatpush3.bf16.msra.mxu1 %v6188_v23 }
0x1585   :  { %4959 = vmatprep.subr.bf16.mxu1 %v5419_v12 }
0x1652   :  { %v1813_v29 = vpop.f32.mrb[8].mxu1 }
0x1653   :  { %v1817_v42 = vadd.f32 %v1813_v29, %v6279_v24  ;;  %v4631_v44 = vpop.f32.mrb[9].mxu1 }
0x1655   :  { %5150 = vtanh.f32 %v1817_v42  ;;  %v4310_v4 = vmul.f32 -1.442695, %v1817_v42 }
0x1657   :  { %5152 = vpow2.f32 %v4310_v4 }
0x165f   :  { %v5151_v15 = vpop.eup %5150 }
0x1660   :  { %1827 = vrot.lane.b32.xlu0 %v5151_v15, %s5422_s5 }
0x1661   :  { %v5153_v58 = vpop.eup %5152 }
0x1662   :  { %v1821_v22 = vadd.f32 1.0, %v5153_v58 }
0x1664   :  { %5154 = vrcp.f32 %v1821_v22 }
0x166e   :  { %v5155_v43 = vpop.eup %5154 }
0x166f   :  { %v1825_v41 = vmul.f32 %v5155_v43, %v1730_v63 }
0x16d2   :  { %v1828_v45 = vpop.permute.xlu0 %1827 }
0x16d3   :  { %v1830_v14 = vmul.f32 %v5155_v43, %v1828_v45 }
0x16d5   :  { %1832 = vrot.lane.b32.xlu1 %v1830_v14, %s5423_s12 }
0x1747   :  { %v1833_v46 = vpop.permute.xlu1 %1832 }
0x1748   :  { %v1835_v5 = vadd.f32 %v1833_v46, %v1825_v41 }
0x174a   :  { %5156 = vtanh.f32 %v1835_v5 }
0x1754   :  { %v5157_v24 = vpop.eup %5156 }
0x1755   :  { %1838 = vrot.lane.b32.xlu0 %v5157_v24, %s5422_s5 }
0x17c7   :  { %v1839_v61 = vpop.permute.xlu0 %1838 }
0x17c8   :  { %v1841_v6 = vmul.f32 %v5155_v43, %v1839_v61 }
0x17ca   :  { %1846 = vrot.lane.b32.xlu1 %v1841_v6, %s5423_s12 }
0x183c   :  { %v1847_v1 = vpop.permute.xlu1 %1846 }
0x183d   :  { %4641 = vmatmul.mubr.msk.f32.vlgmr.msra.gmra.mrb[14].mxu0 %vm871_vm7, %v1847_v1 }
0x183e   :  { %4955 = vmatpush3.bf16.msra.mxu0 %v6182_v3  ;;  %4662 = vmatprep.mubr.msk.f32.mxu0 %vm5420_vm6, %v5421_v55 }
0x183f   :  { %4956 = vmatprep.subr.bf16.mxu0 %v5419_v12 }
0x1842   :  { %4958 = vmatpush3.bf16.msra.mxu0 %v6188_v23 }
0x1843   :  { %4965 = vmatprep.subr.bf16.mxu0 %v5419_v12 }
0x1910   :  { %v1916_v31 = vpop.f32.mrb[14].mxu0 }
0x1911   :  { %v1920_v59 = vadd.f32 %v1916_v31, %v6283_v7  ;;  %v4642_v39 = vpop.f32.mrb[15].mxu0 }
0x1913   :  { %5158 = vtanh.f32 %v1920_v59  ;;  %v4312_v36 = vmul.f32 -1.442695, %v1920_v59 }
0x1915   :  { %5160 = vpow2.f32 %v4312_v36 }
0x191d   :  { %v5159_v10 = vpop.eup %5158 }
0x191e   :  { %1930 = vrot.lane.b32.xlu0 %v5159_v10, %s5422_s5 }
0x191f   :  { %v5161_v25 = vpop.eup %5160 }
0x1920   :  { %v1924_v17 = vadd.f32 1.0, %v5161_v25 }
0x1922   :  { %5162 = vrcp.f32 %v1924_v17 }
0x192c   :  { %v5163_v9 = vpop.eup %5162 }
0x192d   :  { %v1928_v33 = vmul.f32 %v5163_v9, %v1835_v5 }
0x1990   :  { %v1931_v28 = vpop.permute.xlu0 %1930 }
0x1991   :  { %v1933_v16 = vmul.f32 %v5163_v9, %v1931_v28 }
0x1993   :  { %1935 = vrot.lane.b32.xlu1 %v1933_v16, %s5423_s12 }
0x1a05   :  { %v1936_v27 = vpop.permute.xlu1 %1935 }
0x1a06   :  { %v1938_v54 = vadd.f32 %v1936_v27, %v1928_v33 }
0x1a08   :  { %5164 = vtanh.f32 %v1938_v54 }
0x1a12   :  { %v5165_v7 = vpop.eup %5164 }
0x1a13   :  { %1941 = vrot.lane.b32.xlu0 %v5165_v7, %s5422_s5 }
0x1a85   :  { %v1942_v35 = vpop.permute.xlu0 %1941 }
0x1a86   :  { %v1944_v62 = vmul.f32 %v5163_v9, %v1942_v35 }
0x1a88   :  { %1952 = vrot.lane.b32.xlu1 %v1944_v62, %s5423_s12 }
0x1afa   :  { %v1953_v34 = vpop.permute.xlu1 %1952 }
0x1afb   :  { %4652 = vmatmul.mubr.msk.f32.vlgmr.msra.gmra.mrb[10].mxu1 %vm871_vm7, %v1953_v34 }
0x1afc   :  { %4961 = vmatpush3.bf16.msra.mxu1 %v6182_v3  ;;  %4673 = vmatprep.mubr.msk.f32.mxu1 %vm5420_vm6, %v5421_v55 }
0x1afd   :  { %4962 = vmatprep.subr.bf16.mxu1 %v5419_v12 }
0x1b00   :  { %4964 = vmatpush3.bf16.msra.mxu1 %v6188_v23 }
0x1b01   :  { %4971 = vmatprep.subr.bf16.mxu1 %v5419_v12 }
0x1bce   :  { %v2022_v63 = vpop.f32.mrb[10].mxu1 }
0x1bcf   :  { %v2026_v56 = vadd.f32 %v2022_v63, %v6286_v19  ;;  %v4653_v21 = vpop.f32.mrb[11].mxu1 }
0x1bd1   :  { %5166 = vtanh.f32 %v2026_v56  ;;  %v4314_v8 = vmul.f32 -1.442695, %v2026_v56 }
0x1bd3   :  { %5168 = vpow2.f32 %v4314_v8 }
0x1bdb   :  { %v5167_v37 = vpop.eup %5166 }
0x1bdc   :  { %2036 = vrot.lane.b32.xlu0 %v5167_v37, %s5422_s5 }
0x1bdd   :  { %v5169_v29 = vpop.eup %5168 }
0x1bde   :  { %v2030_v42 = vadd.f32 1.0, %v5169_v29 }
0x1be0   :  { %5170 = vrcp.f32 %v2030_v42 }
0x1bea   :  { %v5171_v44 = vpop.eup %5170 }
0x1beb   :  { %v2034_v58 = vmul.f32 %v5171_v44, %v1938_v54 }
0x1c4e   :  { %v2037_v15 = vpop.permute.xlu0 %2036 }
0x1c4f   :  { %v2039_v4 = vmul.f32 %v5171_v44, %v2037_v15 }
0x1c51   :  { %2041 = vrot.lane.b32.xlu1 %v2039_v4, %s5423_s12 }
0x1cc3   :  { %v2042_v22 = vpop.permute.xlu1 %2041 }
0x1cc4   :  { %v2044_v43 = vadd.f32 %v2042_v22, %v2034_v58 }
0x1cc6   :  { %5172 = vtanh.f32 %v2044_v43 }
0x1cd0   :  { %v5173_v19 = vpop.eup %5172 }
0x1cd1   :  { %2047 = vrot.lane.b32.xlu0 %v5173_v19, %s5422_s5 }
0x1d43   :  { %v2048_v45 = vpop.permute.xlu0 %2047 }
0x1d44   :  { %v2050_v14 = vmul.f32 %v5171_v44, %v2048_v45 }
0x1d46   :  { %2058 = vrot.lane.b32.xlu1 %v2050_v14, %s5423_s12 }
0x1db8   :  { %v2059_v41 = vpop.permute.xlu1 %2058 }
0x1db9   :  { %4663 = vmatmul.mubr.msk.f32.vlgmr.msra.gmra.mrb[16].mxu0 %vm871_vm7, %v2059_v41 }
0x1dba   :  { %4967 = vmatpush3.bf16.msra.mxu0 %v6182_v3  ;;  %4684 = vmatprep.mubr.msk.f32.mxu0 %vm5420_vm6, %v5421_v55 }
0x1dbb   :  { %4968 = vmatprep.subr.bf16.mxu0 %v5419_v12 }
0x1dbe   :  { %4970 = vmatpush3.bf16.msra.mxu0 %v6188_v23 }
0x1dbf   :  { %4977 = vmatprep.subr.bf16.mxu0 %v5419_v12 }
0x1e8c   :  { %v2128_v46 = vpop.f32.mrb[16].mxu0 }
0x1e8d   :  { %v2132_v5 = vadd.f32 %v2128_v46, %v6273_v53  ;;  %v4664_v24 = vpop.f32.mrb[17].mxu0 }
0x1e8f   :  { %5174 = vtanh.f32 %v2132_v5  ;;  %v4316_v6 = vmul.f32 -1.442695, %v2132_v5 }
0x1e91   :  { %5176 = vpow2.f32 %v4316_v6 }
0x1e99   :  { %v5175_v61 = vpop.eup %5174 }
0x1e9a   :  { %2142 = vrot.lane.b32.xlu0 %v5175_v61, %s5422_s5 }
0x1e9b   :  { %v5177_v1 = vpop.eup %5176 }
0x1e9c   :  { %v2136_v31 = vadd.f32 1.0, %v5177_v1 }
0x1e9e   :  { %5178 = vrcp.f32 %v2136_v31 }
0x1ea8   :  { %v5179_v59 = vpop.eup %5178 }
0x1ea9   :  { %v2140_v36 = vmul.f32 %v5179_v59, %v2044_v43 }
0x1f0c   :  { %v2143_v39 = vpop.permute.xlu0 %2142 }
0x1f0d   :  { %v2145_v10 = vmul.f32 %v5179_v59, %v2143_v39 }
0x1f0f   :  { %2147 = vrot.lane.b32.xlu1 %v2145_v10, %s5423_s12 }
0x1f81   :  { %v2148_v25 = vpop.permute.xlu1 %2147 }
0x1f82   :  { %v2150_v17 = vadd.f32 %v2148_v25, %v2140_v36 }
0x1f84   :  { %5180 = vtanh.f32 %v2150_v17 }
0x1f8e   :  { %v5181_v53 = vpop.eup %5180 }
0x1f8f   :  { %2153 = vrot.lane.b32.xlu0 %v5181_v53, %s5422_s5 }
0x2001   :  { %v2154_v9 = vpop.permute.xlu0 %2153 }
0x2002   :  { %v2156_v28 = vmul.f32 %v5179_v59, %v2154_v9 }
0x2004   :  { %2161 = vrot.lane.b32.xlu1 %v2156_v28, %s5423_s12 }
0x2076   :  { %v2162_v16 = vpop.permute.xlu1 %2161 }
0x2077   :  { %4674 = vmatmul.mubr.msk.f32.vlgmr.msra.gmra.mrb[12].mxu1 %vm871_vm7, %v2162_v16 }
0x2078   :  { %4973 = vmatpush3.bf16.msra.mxu1 %v6182_v3  ;;  %4695 = vmatprep.mubr.msk.f32.mxu1 %vm5420_vm6, %v5421_v55 }
0x2079   :  { %4974 = vmatprep.subr.bf16.mxu1 %v5419_v12 }
0x207c   :  { %4976 = vmatpush3.bf16.msra.mxu1 %v6188_v23 }
0x207d   :  { %4983 = vmatprep.subr.bf16.mxu1 %v5419_v12 }
0x214a   :  { %v2231_v33 = vpop.f32.mrb[12].mxu1 }
0x214b   :  { %v2235_v27 = vadd.f32 %v2231_v33, %v6258_v38  ;;  %v4675_v54 = vpop.f32.mrb[13].mxu1 }
0x214d   :  { %5182 = vtanh.f32 %v2235_v27  ;;  %v4318_v35 = vmul.f32 -1.442695, %v2235_v27 }
0x214f   :  { %5184 = vpow2.f32 %v4318_v35 }
0x2157   :  { %v5183_v7 = vpop.eup %5182 }
0x2158   :  { %2245 = vrot.lane.b32.xlu0 %v5183_v7, %s5422_s5 }
0x2159   :  { %v5185_v62 = vpop.eup %5184 }
0x215a   :  { %v2239_v34 = vadd.f32 1.0, %v5185_v62 }
0x215c   :  { %5186 = vrcp.f32 %v2239_v34 }
0x2166   :  { %v5187_v63 = vpop.eup %5186 }
0x2167   :  { %v2243_v37 = vmul.f32 %v5187_v63, %v2150_v17 }
0x21ca   :  { %v2246_v56 = vpop.permute.xlu0 %2245 }
0x21cb   :  { %v2248_v21 = vmul.f32 %v5187_v63, %v2246_v56 }
0x21cd   :  { %2250 = vrot.lane.b32.xlu1 %v2248_v21, %s5423_s12 }
0x223f   :  { %v2251_v8 = vpop.permute.xlu1 %2250 }
0x2240   :  { %v2253_v29 = vadd.f32 %v2251_v8, %v2243_v37 }
0x2242   :  { %5188 = vtanh.f32 %v2253_v29 }
0x224c   :  { %v5189_v38 = vpop.eup %5188 }
0x224d   :  { %2256 = vrot.lane.b32.xlu0 %v5189_v38, %s5422_s5 }
0x22bf   :  { %v2257_v42 = vpop.permute.xlu0 %2256 }
0x22c0   :  { %v2259_v44 = vmul.f32 %v5187_v63, %v2257_v42 }
0x22c2   :  { %2266 = vrot.lane.b32.xlu1 %v2259_v44, %s5423_s12 }
0x2334   :  { %v2267_v15 = vpop.permute.xlu1 %2266 }
0x2335   :  { %4685 = vmatmul.mubr.msk.f32.vlgmr.msra.gmra.mrb[18].mxu0 %vm871_vm7, %v2267_v15 }
0x2336   :  { %4979 = vmatpush3.bf16.msra.mxu0 %v6182_v3  ;;  %4706 = vmatprep.mubr.msk.f32.mxu0 %vm5420_vm6, %v5421_v55 }
0x2337   :  { %4980 = vmatprep.subr.bf16.mxu0 %v5419_v12 }
0x233a   :  { %4982 = vmatpush3.bf16.msra.mxu0 %v6188_v23 }
0x233b   :  { %4989 = vmatprep.subr.bf16.mxu0 %v5419_v12 }
0x2408   :  { %v2336_v4 = vpop.f32.mrb[18].mxu0 }
0x2409   :  { %v2340_v58 = vadd.f32 %v2336_v4, %v6289_v48  ;;  %v4686_v22 = vpop.f32.mrb[19].mxu0 }
0x240b   :  { %5190 = vtanh.f32 %v2340_v58  ;;  %v4320_v19 = vmul.f32 -1.442695, %v2340_v58 }
0x240d   :  { %5192 = vpow2.f32 %v4320_v19 }
0x2415   :  { %v5191_v43 = vpop.eup %5190 }
0x2416   :  { %2350 = vrot.lane.b32.xlu0 %v5191_v43, %s5422_s5 }
0x2417   :  { %v5193_v45 = vpop.eup %5192 }
0x2418   :  { %v2344_v14 = vadd.f32 1.0, %v5193_v45 }
0x241a   :  { %5194 = vrcp.f32 %v2344_v14 }
0x2424   :  { %v5195_v41 = vpop.eup %5194 }
0x2425   :  { %v2348_v24 = vmul.f32 %v5195_v41, %v2253_v29 }
0x2488   :  { %v2351_v46 = vpop.permute.xlu0 %2350 }
0x2489   :  { %v2353_v5 = vmul.f32 %v5195_v41, %v2351_v46 }
0x248b   :  { %2355 = vrot.lane.b32.xlu1 %v2353_v5, %s5423_s12 }
0x24fd   :  { %v2356_v61 = vpop.permute.xlu1 %2355 }
0x24fe   :  { %v2358_v6 = vadd.f32 %v2356_v61, %v2348_v24 }
0x2500   :  { %5196 = vtanh.f32 %v2358_v6 }
0x250a   :  { %v5197_v48 = vpop.eup %5196 }
0x250b   :  { %2361 = vrot.lane.b32.xlu0 %v5197_v48, %s5422_s5 }
0x257d   :  { %v2362_v1 = vpop.permute.xlu0 %2361 }
0x257e   :  { %v2364_v31 = vmul.f32 %v5195_v41, %v2362_v1 }
0x2580   :  { %2371 = vrot.lane.b32.xlu1 %v2364_v31, %s5423_s12 }
0x25f2   :  { %v2372_v59 = vpop.permute.xlu1 %2371 }
0x25f3   :  { %4696 = vmatmul.mubr.msk.f32.vlgmr.msra.gmra.mrb[14].mxu1 %vm871_vm7, %v2372_v59 }
0x25f4   :  { %4985 = vmatpush3.bf16.msra.mxu1 %v6182_v3  ;;  %4717 = vmatprep.mubr.msk.f32.mxu1 %vm5420_vm6, %v5421_v55 }
0x25f5   :  { %4986 = vmatprep.subr.bf16.mxu1 %v5419_v12 }
0x25f8   :  { %4988 = vmatpush3.bf16.msra.mxu1 %v6188_v23 }
0x25f9   :  { %4995 = vmatprep.subr.bf16.mxu1 %v5419_v12 }
0x26c6   :  { %v2441_v39 = vpop.f32.mrb[14].mxu1 }
0x26c7   :  { %v2445_v10 = vadd.f32 %v2441_v39, %v6292_v40  ;;  %v4697_v36 = vpop.f32.mrb[15].mxu1 }
0x26c9   :  { %5198 = vtanh.f32 %v2445_v10  ;;  %v4322_v17 = vmul.f32 -1.442695, %v2445_v10 }
0x26cb   :  { %5200 = vpow2.f32 %v4322_v17 }
0x26d3   :  { %v5199_v25 = vpop.eup %5198 }
0x26d4   :  { %2455 = vrot.lane.b32.xlu0 %v5199_v25, %s5422_s5 }
0x26d5   :  { %v5201_v53 = vpop.eup %5200 }
0x26d6   :  { %v2449_v9 = vadd.f32 1.0, %v5201_v53 }
0x26d8   :  { %5202 = vrcp.f32 %v2449_v9 }
0x26e2   :  { %v5203_v28 = vpop.eup %5202 }
0x26e3   :  { %v2453_v27 = vmul.f32 %v5203_v28, %v2358_v6 }
0x2746   :  { %v2456_v16 = vpop.permute.xlu0 %2455 }
0x2747   :  { %v2458_v33 = vmul.f32 %v5203_v28, %v2456_v16 }
0x2749   :  { %2460 = vrot.lane.b32.xlu1 %v2458_v33, %s5423_s12 }
0x27bb   :  { %v2461_v54 = vpop.permute.xlu1 %2460 }
0x27bc   :  { %v2463_v7 = vadd.f32 %v2461_v54, %v2453_v27 }
0x27be   :  { %5204 = vtanh.f32 %v2463_v7 }
0x27c8   :  { %v5205_v40 = vpop.eup %5204 }
0x27c9   :  { %2466 = vrot.lane.b32.xlu0 %v5205_v40, %s5422_s5 }
0x283b   :  { %v2467_v35 = vpop.permute.xlu0 %2466 }
0x283c   :  { %v2469_v62 = vmul.f32 %v5203_v28, %v2467_v35 }
0x283e   :  { %2476 = vrot.lane.b32.xlu1 %v2469_v62, %s5423_s12 }
0x28b0   :  { %v2477_v34 = vpop.permute.xlu1 %2476 }
0x28b1   :  { %4707 = vmatmul.mubr.msk.f32.vlgmr.msra.gmra.mrb[20].mxu0 %vm871_vm7, %v2477_v34 }
0x28b2   :  { %4991 = vmatpush3.bf16.msra.mxu0 %v6182_v3  ;;  %4728 = vmatprep.mubr.msk.f32.mxu0 %vm5420_vm6, %v5421_v55 }
0x28b3   :  { %4992 = vmatprep.subr.bf16.mxu0 %v5419_v12 }
0x28b6   :  { %4994 = vmatpush3.bf16.msra.mxu0 %v6188_v23 }
0x28b7   :  { %5001 = vmatprep.subr.bf16.mxu0 %v5419_v12 }
0x2984   :  { %v2546_v63 = vpop.f32.mrb[20].mxu0 }
0x2985   :  { %v2550_v56 = vadd.f32 %v2546_v63, %v6298_v13  ;;  %v4708_v21 = vpop.f32.mrb[21].mxu0 }
0x2987   :  { %5206 = vtanh.f32 %v2550_v56  ;;  %v4324_v8 = vmul.f32 -1.442695, %v2550_v56 }
0x2989   :  { %5208 = vpow2.f32 %v4324_v8 }
0x2991   :  { %v5207_v37 = vpop.eup %5206 }
0x2992   :  { %2560 = vrot.lane.b32.xlu0 %v5207_v37, %s5422_s5 }
0x2993   :  { %v5209_v29 = vpop.eup %5208 }
0x2994   :  { %v2554_v38 = vadd.f32 1.0, %v5209_v29 }
0x2996   :  { %5210 = vrcp.f32 %v2554_v38 }
0x29a0   :  { %v5211_v42 = vpop.eup %5210 }
0x29a1   :  { %v2558_v4 = vmul.f32 %v5211_v42, %v2463_v7 }
0x2a04   :  { %v2561_v44 = vpop.permute.xlu0 %2560 }
0x2a05   :  { %v2563_v15 = vmul.f32 %v5211_v42, %v2561_v44 }
0x2a07   :  { %2565 = vrot.lane.b32.xlu1 %v2563_v15, %s5423_s12 }
0x2a79   :  { %v2566_v58 = vpop.permute.xlu1 %2565 }
0x2a7a   :  { %v2568_v22 = vadd.f32 %v2566_v58, %v2558_v4 }
0x2a7c   :  { %5212 = vtanh.f32 %v2568_v22 }
0x2a86   :  { %v5213_v13 = vpop.eup %5212 }
0x2a87   :  { %2571 = vrot.lane.b32.xlu0 %v5213_v13, %s5422_s5 }
0x2af9   :  { %v2572_v43 = vpop.permute.xlu0 %2571 }
0x2afa   :  { %v2574_v19 = vmul.f32 %v5211_v42, %v2572_v43 }
0x2afc   :  { %2581 = vrot.lane.b32.xlu1 %v2574_v19, %s5423_s12 }
0x2b6e   :  { %v2582_v45 = vpop.permute.xlu1 %2581 }
0x2b6f   :  { %4718 = vmatmul.mubr.msk.f32.vlgmr.msra.gmra.mrb[16].mxu1 %vm871_vm7, %v2582_v45 }
0x2b70   :  { %4997 = vmatpush3.bf16.msra.mxu1 %v6182_v3  ;;  %4739 = vmatprep.mubr.msk.f32.mxu1 %vm5420_vm6, %v5421_v55 }
0x2b71   :  { %4998 = vmatprep.subr.bf16.mxu1 %v5419_v12 }
0x2b74   :  { %5000 = vmatpush3.bf16.msra.mxu1 %v6188_v23 }
0x2b75   :  { %5007 = vmatprep.subr.bf16.mxu1 %v5419_v12 }
0x2c42   :  { %v2651_v14 = vpop.f32.mrb[16].mxu1 }
0x2c43   :  { %v2655_v41 = vadd.f32 %v2651_v14, %v6301_v49  ;;  %v4719_v46 = vpop.f32.mrb[17].mxu1 }
0x2c45   :  { %5214 = vtanh.f32 %v2655_v41  ;;  %v4326_v24 = vmul.f32 -1.442695, %v2655_v41 }
0x2c47   :  { %5216 = vpow2.f32 %v4326_v24 }
0x2c4f   :  { %v5215_v5 = vpop.eup %5214 }
0x2c50   :  { %2665 = vrot.lane.b32.xlu0 %v5215_v5, %s5422_s5 }
0x2c51   :  { %v5217_v61 = vpop.eup %5216 }
0x2c52   :  { %v2659_v6 = vadd.f32 1.0, %v5217_v61 }
0x2c54   :  { %5218 = vrcp.f32 %v2659_v6 }
0x2c5e   :  { %v5219_v48 = vpop.eup %5218 }
0x2c5f   :  { %v2663_v59 = vmul.f32 %v5219_v48, %v2568_v22 }
0x2cc2   :  { %v2666_v1 = vpop.permute.xlu0 %2665 }
0x2cc3   :  { %v2668_v31 = vmul.f32 %v5219_v48, %v2666_v1 }
0x2cc5   :  { %2670 = vrot.lane.b32.xlu1 %v2668_v31, %s5423_s12 }
0x2d37   :  { %v2671_v39 = vpop.permute.xlu1 %2670 }
0x2d38   :  { %v2673_v10 = vadd.f32 %v2671_v39, %v2663_v59 }
0x2d3a   :  { %5220 = vtanh.f32 %v2673_v10 }
0x2d44   :  { %v5221_v49 = vpop.eup %5220 }
0x2d45   :  { %2676 = vrot.lane.b32.xlu0 %v5221_v49, %s5422_s5 }
0x2db7   :  { %v2677_v36 = vpop.permute.xlu0 %2676 }
0x2db8   :  { %v2679_v25 = vmul.f32 %v5219_v48, %v2677_v36 }
0x2dba   :  { %2684 = vrot.lane.b32.xlu1 %v2679_v25, %s5423_s12 }
0x2e2c   :  { %v2685_v17 = vpop.permute.xlu1 %2684 }
0x2e2d   :  { %4729 = vmatmul.mubr.msk.f32.vlgmr.msra.gmra.mrb[22].mxu0 %vm871_vm7, %v2685_v17 }
0x2e2e   :  { %5003 = vmatpush3.bf16.msra.mxu0 %v6182_v3  ;;  %4750 = vmatprep.mubr.msk.f32.mxu0 %vm5420_vm6, %v5421_v55 }
0x2e2f   :  { %5004 = vmatprep.subr.bf16.mxu0 %v5419_v12 }
0x2e32   :  { %5006 = vmatpush3.bf16.msra.mxu0 %v6188_v23 }
0x2e33   :  { %5013 = vmatprep.subr.bf16.mxu0 %v5419_v12 }
0x2f00   :  { %v2754_v53 = vpop.f32.mrb[22].mxu0 }
0x2f01   :  { %v2758_v9 = vadd.f32 %v2754_v53, %v6307_v0  ;;  %v4730_v28 = vpop.f32.mrb[23].mxu0 }
0x2f03   :  { %5222 = vtanh.f32 %v2758_v9  ;;  %v4328_v33 = vmul.f32 -1.442695, %v2758_v9 }
0x2f05   :  { %5224 = vpow2.f32 %v4328_v33 }
0x2f0d   :  { %v5223_v16 = vpop.eup %5222 }
0x2f0e   :  { %2768 = vrot.lane.b32.xlu0 %v5223_v16, %s5422_s5 }
0x2f0f   :  { %v5225_v27 = vpop.eup %5224 }
0x2f10   :  { %v2762_v54 = vadd.f32 1.0, %v5225_v27 }
0x2f12   :  { %5226 = vrcp.f32 %v2762_v54 }
0x2f1c   :  { %v5227_v7 = vpop.eup %5226 }
0x2f1d   :  { %v2766_v62 = vmul.f32 %v5227_v7, %v2673_v10 }
0x2f80   :  { %v2769_v40 = vpop.permute.xlu0 %2768 }
0x2f81   :  { %v2771_v35 = vmul.f32 %v5227_v7, %v2769_v40 }
0x2f83   :  { %2773 = vrot.lane.b32.xlu1 %v2771_v35, %s5423_s12 }
0x2ff5   :  { %v2774_v34 = vpop.permute.xlu1 %2773 }
0x2ff6   :  { %v2776_v63 = vadd.f32 %v2774_v34, %v2766_v62 }
0x2ff8   :  { %5228 = vtanh.f32 %v2776_v63 }
0x3002   :  { %v5229_v0 = vpop.eup %5228 }
0x3003   :  { %2779 = vrot.lane.b32.xlu0 %v5229_v0, %s5422_s5 }
0x3075   :  { %v2780_v56 = vpop.permute.xlu0 %2779 }
0x3076   :  { %v2782_v21 = vmul.f32 %v5227_v7, %v2780_v56 }
0x3078   :  { %2790 = vrot.lane.b32.xlu1 %v2782_v21, %s5423_s12 }
0x30ea   :  { %v2791_v37 = vpop.permute.xlu1 %2790 }
0x30eb   :  { %4740 = vmatmul.mubr.msk.f32.vlgmr.msra.gmra.mrb[18].mxu1 %vm871_vm7, %v2791_v37 }
0x30ec   :  { %5009 = vmatpush3.bf16.msra.mxu1 %v6182_v3  ;;  %4761 = vmatprep.mubr.msk.f32.mxu1 %vm5420_vm6, %v5421_v55 }
0x30ed   :  { %5010 = vmatprep.subr.bf16.mxu1 %v5419_v12 }
0x30f0   :  { %5012 = vmatpush3.bf16.msra.mxu1 %v6188_v23 }
0x30f1   :  { %5019 = vmatprep.subr.bf16.mxu1 %v5419_v12 }
0x31be   :  { %v2860_v8 = vpop.f32.mrb[18].mxu1 }
0x31bf   :  { %v2864_v29 = vadd.f32 %v2860_v8, %v6310_v60  ;;  %v4741_v38 = vpop.f32.mrb[19].mxu1 }
0x31c1   :  { %5230 = vtanh.f32 %v2864_v29  ;;  %v4330_v44 = vmul.f32 -1.442695, %v2864_v29 }
0x31c3   :  { %5232 = vpow2.f32 %v4330_v44 }
0x31cb   :  { %v5231_v42 = vpop.eup %5230 }
0x31cc   :  { %2874 = vrot.lane.b32.xlu0 %v5231_v42, %s5422_s5 }
0x31cd   :  { %v5233_v15 = vpop.eup %5232 }
0x31ce   :  { %v2868_v4 = vadd.f32 1.0, %v5233_v15 }
0x31d0   :  { %5234 = vrcp.f32 %v2868_v4 }
0x31da   :  { %v5235_v58 = vpop.eup %5234 }
0x31db   :  { %v2872_v43 = vmul.f32 %v5235_v58, %v2776_v63 }
0x323e   :  { %v2875_v22 = vpop.permute.xlu0 %2874 }
0x323f   :  { %v2877_v13 = vmul.f32 %v5235_v58, %v2875_v22 }
0x3241   :  { %2879 = vrot.lane.b32.xlu1 %v2877_v13, %s5423_s12 }
0x32b3   :  { %v2880_v19 = vpop.permute.xlu1 %2879 }
0x32b4   :  { %v2882_v45 = vadd.f32 %v2880_v19, %v2872_v43 }
0x32b6   :  { %5236 = vtanh.f32 %v2882_v45 }
0x32c0   :  { %v5237_v60 = vpop.eup %5236 }
0x32c1   :  { %2885 = vrot.lane.b32.xlu0 %v5237_v60, %s5422_s5 }
0x3333   :  { %v2886_v14 = vpop.permute.xlu0 %2885 }
0x3334   :  { %v2888_v41 = vmul.f32 %v5235_v58, %v2886_v14 }
0x3336   :  { %2896 = vrot.lane.b32.xlu1 %v2888_v41, %s5423_s12 }
0x33a8   :  { %v2897_v46 = vpop.permute.xlu1 %2896 }
0x33a9   :  { %4751 = vmatmul.mubr.msk.f32.vlgmr.msra.gmra.mrb[24].mxu0 %vm871_vm7, %v2897_v46 }
0x33aa   :  { %5015 = vmatpush3.bf16.msra.mxu0 %v6182_v3  ;;  %4772 = vmatprep.mubr.msk.f32.mxu0 %vm5420_vm6, %v5421_v55 }
0x33ab   :  { %5016 = vmatprep.subr.bf16.mxu0 %v5419_v12 }
0x33ae   :  { %5018 = vmatpush3.bf16.msra.mxu0 %v6188_v23 }
0x33af   :  { %5025 = vmatprep.subr.bf16.mxu0 %v5419_v12 }
0x347c   :  { %v2966_v5 = vpop.f32.mrb[24].mxu0 }
0x347d   :  { %v2970_v24 = vadd.f32 %v2966_v5, %v6320_v32  ;;  %v4752_v61 = vpop.f32.mrb[25].mxu0 }
0x347f   :  { %5238 = vtanh.f32 %v2970_v24  ;;  %v4332_v48 = vmul.f32 -1.442695, %v2970_v24 }
0x3481   :  { %5240 = vpow2.f32 %v4332_v48 }
0x3489   :  { %v5239_v6 = vpop.eup %5238 }
0x348a   :  { %2980 = vrot.lane.b32.xlu0 %v5239_v6, %s5422_s5 }
0x348b   :  { %v5241_v1 = vpop.eup %5240 }
0x348c   :  { %v2974_v31 = vadd.f32 1.0, %v5241_v1 }
0x348e   :  { %5242 = vrcp.f32 %v2974_v31 }
0x3498   :  { %v5243_v59 = vpop.eup %5242 }
0x3499   :  { %v2978_v49 = vmul.f32 %v5243_v59, %v2882_v45 }
0x34fc   :  { %v2981_v39 = vpop.permute.xlu0 %2980 }
0x34fd   :  { %v2983_v10 = vmul.f32 %v5243_v59, %v2981_v39 }
0x34ff   :  { %2985 = vrot.lane.b32.xlu1 %v2983_v10, %s5423_s12 }
0x3571   :  { %v2986_v36 = vpop.permute.xlu1 %2985 }
0x3572   :  { %v2988_v25 = vadd.f32 %v2986_v36, %v2978_v49 }
0x3574   :  { %5244 = vtanh.f32 %v2988_v25 }
0x357e   :  { %v5245_v32 = vpop.eup %5244 }
0x357f   :  { %2991 = vrot.lane.b32.xlu0 %v5245_v32, %s5422_s5 }
0x35f1   :  { %v2992_v17 = vpop.permute.xlu0 %2991 }
0x35f2   :  { %v2994_v53 = vmul.f32 %v5243_v59, %v2992_v17 }
0x35f4   :  { %2999 = vrot.lane.b32.xlu1 %v2994_v53, %s5423_s12 }
0x3666   :  { %v3000_v9 = vpop.permute.xlu1 %2999 }
0x3667   :  { %4762 = vmatmul.mubr.msk.f32.vlgmr.msra.gmra.mrb[20].mxu1 %vm871_vm7, %v3000_v9 }
0x3668   :  { %5021 = vmatpush3.bf16.msra.mxu1 %v6182_v3  ;;  %4783 = vmatprep.mubr.msk.f32.mxu1 %vm5420_vm6, %v5421_v55 }
0x3669   :  { %5022 = vmatprep.subr.bf16.mxu1 %v5419_v12 }
0x366c   :  { %5024 = vmatpush3.bf16.msra.mxu1 %v6188_v23 }
0x366d   :  { %5031 = vmatprep.subr.bf16.mxu1 %v5419_v12 }
0x373a   :  { %v3069_v28 = vpop.f32.mrb[20].mxu1 }
0x373b   :  { %v3073_v16 = vadd.f32 %v3069_v28, %v6316_v50  ;;  %v4763_v33 = vpop.f32.mrb[21].mxu1 }
0x373d   :  { %5246 = vtanh.f32 %v3073_v16  ;;  %v4334_v54 = vmul.f32 -1.442695, %v3073_v16 }
0x373f   :  { %5248 = vpow2.f32 %v4334_v54 }
0x3747   :  { %v5247_v27 = vpop.eup %5246 }
0x3748   :  { %3083 = vrot.lane.b32.xlu0 %v5247_v27, %s5422_s5 }
0x3749   :  { %v5249_v7 = vpop.eup %5248 }
0x374a   :  { %v3077_v40 = vadd.f32 1.0, %v5249_v7 }
0x374c   :  { %5250 = vrcp.f32 %v3077_v40 }
0x3756   :  { %v5251_v35 = vpop.eup %5250 }
0x3757   :  { %v3081_v63 = vmul.f32 %v5251_v35, %v2988_v25 }
0x37ba   :  { %v3084_v62 = vpop.permute.xlu0 %3083 }
0x37bb   :  { %v3086_v34 = vmul.f32 %v5251_v35, %v3084_v62 }
0x37bd   :  { %3088 = vrot.lane.b32.xlu1 %v3086_v34, %s5423_s12 }
0x382f   :  { %v3089_v0 = vpop.permute.xlu1 %3088 }
0x3830   :  { %v3091_v56 = vadd.f32 %v3089_v0, %v3081_v63 }
0x3832   :  { %5252 = vtanh.f32 %v3091_v56 }
0x383c   :  { %v5253_v50 = vpop.eup %5252 }
0x383d   :  { %3094 = vrot.lane.b32.xlu0 %v5253_v50, %s5422_s5 }
0x38af   :  { %v3095_v21 = vpop.permute.xlu0 %3094 }
0x38b0   :  { %v3097_v37 = vmul.f32 %v5251_v35, %v3095_v21 }
0x38b2   :  { %3104 = vrot.lane.b32.xlu1 %v3097_v37, %s5423_s12 }
0x3924   :  { %v3105_v8 = vpop.permute.xlu1 %3104 }
0x3925   :  { %4773 = vmatmul.mubr.msk.f32.vlgmr.msra.gmra.mrb[26].mxu0 %vm871_vm7, %v3105_v8 }
0x3926   :  { %5027 = vmatpush3.bf16.msra.mxu0 %v6182_v3  ;;  %4794 = vmatprep.mubr.msk.f32.mxu0 %vm5420_vm6, %v5421_v55 }
0x3927   :  { %5028 = vmatprep.subr.bf16.mxu0 %v5419_v12 }
0x392a   :  { %5030 = vmatpush3.bf16.msra.mxu0 %v6188_v23 }
0x392b   :  { %5037 = vmatprep.subr.bf16.mxu0 %v5419_v12 }
0x39f8   :  { %v3174_v29 = vpop.f32.mrb[26].mxu0 }
0x39f9   :  { %v3178_v38 = vadd.f32 %v3174_v29, %v6323_v30  ;;  %v4774_v42 = vpop.f32.mrb[27].mxu0 }
0x39fb   :  { %5254 = vtanh.f32 %v3178_v38  ;;  %v4336_v15 = vmul.f32 -1.442695, %v3178_v38 }
0x39fd   :  { %5256 = vpow2.f32 %v4336_v15 }
0x3a05   :  { %v5255_v44 = vpop.eup %5254 }
0x3a06   :  { %3188 = vrot.lane.b32.xlu0 %v5255_v44, %s5422_s5 }
0x3a07   :  { %v5257_v4 = vpop.eup %5256 }
0x3a08   :  { %v3182_v58 = vadd.f32 1.0, %v5257_v4 }
0x3a0a   :  { %5258 = vrcp.f32 %v3182_v58 }
0x3a14   :  { %v5259_v22 = vpop.eup %5258 }
0x3a15   :  { %v3186_v19 = vmul.f32 %v5259_v22, %v3091_v56 }
0x3a78   :  { %v3189_v13 = vpop.permute.xlu0 %3188 }
0x3a79   :  { %v3191_v43 = vmul.f32 %v5259_v22, %v3189_v13 }
0x3a7b   :  { %3193 = vrot.lane.b32.xlu1 %v3191_v43, %s5423_s12 }
0x3aed   :  { %v3194_v45 = vpop.permute.xlu1 %3193 }
0x3aee   :  { %v3196_v60 = vadd.f32 %v3194_v45, %v3186_v19 }
0x3af0   :  { %5260 = vtanh.f32 %v3196_v60 }
0x3afa   :  { %v5261_v30 = vpop.eup %5260 }
0x3afb   :  { %3199 = vrot.lane.b32.xlu0 %v5261_v30, %s5422_s5 }
0x3b6d   :  { %v3200_v14 = vpop.permute.xlu0 %3199 }
0x3b6e   :  { %v3202_v41 = vmul.f32 %v5259_v22, %v3200_v14 }
0x3b70   :  { %3209 = vrot.lane.b32.xlu1 %v3202_v41, %s5423_s12 }
0x3be2   :  { %v3210_v46 = vpop.permute.xlu1 %3209 }
0x3be3   :  { %4784 = vmatmul.mubr.msk.f32.vlgmr.msra.gmra.mrb[22].mxu1 %vm871_vm7, %v3210_v46 }
0x3be4   :  { %5033 = vmatpush3.bf16.msra.mxu1 %v6182_v3  ;;  %4805 = vmatprep.mubr.msk.f32.mxu1 %vm5420_vm6, %v5421_v55 }
0x3be5   :  { %5034 = vmatprep.subr.bf16.mxu1 %v5419_v12 }
0x3be8   :  { %5036 = vmatpush3.bf16.msra.mxu1 %v6188_v23 }
0x3be9   :  { %5043 = vmatprep.subr.bf16.mxu1 %v5419_v12 }
0x3cb6   :  { %v3279_v5 = vpop.f32.mrb[22].mxu1 }
0x3cb7   :  { %v3283_v24 = vadd.f32 %v3279_v5, %v6326_v26  ;;  %v4785_v61 = vpop.f32.mrb[23].mxu1 }
0x3cb9   :  { %5262 = vtanh.f32 %v3283_v24  ;;  %v4338_v48 = vmul.f32 -1.442695, %v3283_v24 }
0x3cbb   :  { %5264 = vpow2.f32 %v4338_v48 }
0x3cc3   :  { %v5263_v6 = vpop.eup %5262 }
0x3cc4   :  { %3293 = vrot.lane.b32.xlu0 %v5263_v6, %s5422_s5 }
0x3cc5   :  { %v5265_v1 = vpop.eup %5264 }
0x3cc6   :  { %v3287_v31 = vadd.f32 1.0, %v5265_v1 }
0x3cc8   :  { %5266 = vrcp.f32 %v3287_v31 }
0x3cd2   :  { %v5267_v59 = vpop.eup %5266 }
0x3cd3   :  { %v3291_v49 = vmul.f32 %v5267_v59, %v3196_v60 }
0x3d36   :  { %v3294_v39 = vpop.permute.xlu0 %3293 }
0x3d37   :  { %v3296_v10 = vmul.f32 %v5267_v59, %v3294_v39 }
0x3d39   :  { %3298 = vrot.lane.b32.xlu1 %v3296_v10, %s5423_s12 }
0x3dab   :  { %v3299_v36 = vpop.permute.xlu1 %3298 }
0x3dac   :  { %v3301_v25 = vadd.f32 %v3299_v36, %v3291_v49 }
0x3dae   :  { %5268 = vtanh.f32 %v3301_v25 }
0x3db8   :  { %v5269_v26 = vpop.eup %5268 }
0x3db9   :  { %3304 = vrot.lane.b32.xlu0 %v5269_v26, %s5422_s5 }
0x3e2b   :  { %v3305_v32 = vpop.permute.xlu0 %3304 }
0x3e2c   :  { %v3307_v17 = vmul.f32 %v5267_v59, %v3305_v32 }
0x3e2e   :  { %3314 = vrot.lane.b32.xlu1 %v3307_v17, %s5423_s12 }
0x3ea0   :  { %v3315_v53 = vpop.permute.xlu1 %3314 }
0x3ea1   :  { %4795 = vmatmul.mubr.msk.f32.vlgmr.msra.gmra.mrb[28].mxu0 %vm871_vm7, %v3315_v53 }
0x3ea2   :  { %5039 = vmatpush3.bf16.msra.mxu0 %v6182_v3  ;;  %4816 = vmatprep.mubr.msk.f32.mxu0 %vm5420_vm6, %v5421_v55 }
0x3ea3   :  { %5040 = vmatprep.subr.bf16.mxu0 %v5419_v12 }
0x3ea6   :  { %5042 = vmatpush3.bf16.msra.mxu0 %v6188_v23 }
0x3ea7   :  { %5049 = vmatprep.subr.bf16.mxu0 %v5419_v12 }
0x3f74   :  { %v3384_v9 = vpop.f32.mrb[28].mxu0 }
0x3f75   :  { %v3388_v28 = vadd.f32 %v3384_v9, %v6329_v51  ;;  %v4796_v16 = vpop.f32.mrb[29].mxu0 }
0x3f77   :  { %5270 = vtanh.f32 %v3388_v28  ;;  %v4340_v27 = vmul.f32 -1.442695, %v3388_v28 }
0x3f79   :  { %5272 = vpow2.f32 %v4340_v27 }
0x3f81   :  { %v5271_v33 = vpop.eup %5270 }
0x3f82   :  { %3398 = vrot.lane.b32.xlu0 %v5271_v33, %s5422_s5 }
0x3f83   :  { %v5273_v54 = vpop.eup %5272 }
0x3f84   :  { %v3392_v7 = vadd.f32 1.0, %v5273_v54 }
0x3f86   :  { %5274 = vrcp.f32 %v3392_v7 }
0x3f90   :  { %v5275_v40 = vpop.eup %5274 }
0x3f91   :  { %v3396_v34 = vmul.f32 %v5275_v40, %v3301_v25 }
0x3ff4   :  { %v3399_v35 = vpop.permute.xlu0 %3398 }
0x3ff5   :  { %v3401_v62 = vmul.f32 %v5275_v40, %v3399_v35 }
0x3ff7   :  { %3403 = vrot.lane.b32.xlu1 %v3401_v62, %s5423_s12 }
0x4069   :  { %v3404_v63 = vpop.permute.xlu1 %3403 }
0x406a   :  { %v3406_v0 = vadd.f32 %v3404_v63, %v3396_v34 }
0x406c   :  { %5276 = vtanh.f32 %v3406_v0 }
0x4076   :  { %v5277_v51 = vpop.eup %5276 }
0x4077   :  { %3409 = vrot.lane.b32.xlu0 %v5277_v51, %s5422_s5 }
0x40e9   :  { %v3410_v56 = vpop.permute.xlu0 %3409 }
0x40ea   :  { %v3412_v50 = vmul.f32 %v5275_v40, %v3410_v56 }
0x40ec   :  { %3419 = vrot.lane.b32.xlu1 %v3412_v50, %s5423_s12 }
0x415e   :  { %v3420_v21 = vpop.permute.xlu1 %3419 }
0x415f   :  { %4806 = vmatmul.mubr.msk.f32.vlgmr.msra.gmra.mrb[24].mxu1 %vm871_vm7, %v3420_v21 }
0x4160   :  { %5045 = vmatpush3.bf16.msra.mxu1 %v6182_v3  ;;  %4827 = vmatprep.mubr.msk.f32.mxu1 %vm5420_vm6, %v5421_v55 }
0x4161   :  { %5046 = vmatprep.subr.bf16.mxu1 %v5419_v12 }
0x4164   :  { %5048 = vmatpush3.bf16.msra.mxu1 %v6188_v23 }
0x4165   :  { %5055 = vmatprep.subr.bf16.mxu1 %v5419_v12 }
0x4232   :  { %v3489_v37 = vpop.f32.mrb[24].mxu1 }
0x4233   :  { %v3493_v8 = vadd.f32 %v3489_v37, %v6332_v20  ;;  %v4807_v29 = vpop.f32.mrb[25].mxu1 }
0x4235   :  { %5278 = vtanh.f32 %v3493_v8  ;;  %v4342_v42 = vmul.f32 -1.442695, %v3493_v8 }
0x4237   :  { %5280 = vpow2.f32 %v4342_v42 }
0x423f   :  { %v5279_v38 = vpop.eup %5278 }
0x4240   :  { %3503 = vrot.lane.b32.xlu0 %v5279_v38, %s5422_s5 }
0x4241   :  { %v5281_v44 = vpop.eup %5280 }
0x4242   :  { %v3497_v15 = vadd.f32 1.0, %v5281_v44 }
0x4244   :  { %5282 = vrcp.f32 %v3497_v15 }
0x424e   :  { %v5283_v4 = vpop.eup %5282 }
0x424f   :  { %v3501_v13 = vmul.f32 %v5283_v4, %v3406_v0 }
0x42b2   :  { %v3504_v58 = vpop.permute.xlu0 %3503 }
0x42b3   :  { %v3506_v22 = vmul.f32 %v5283_v4, %v3504_v58 }
0x42b5   :  { %3508 = vrot.lane.b32.xlu1 %v3506_v22, %s5423_s12 }
0x4327   :  { %v3509_v43 = vpop.permute.xlu1 %3508 }
0x4328   :  { %v3511_v19 = vadd.f32 %v3509_v43, %v3501_v13 }
0x432a   :  { %5284 = vtanh.f32 %v3511_v19 }
0x4334   :  { %v5285_v20 = vpop.eup %5284 }
0x4335   :  { %3514 = vrot.lane.b32.xlu0 %v5285_v20, %s5422_s5 }
0x43a7   :  { %v3515_v45 = vpop.permute.xlu0 %3514 }
0x43a8   :  { %v3517_v60 = vmul.f32 %v5283_v4, %v3515_v45 }
0x43aa   :  { %3522 = vrot.lane.b32.xlu1 %v3517_v60, %s5423_s12 }
0x441c   :  { %v3523_v30 = vpop.permute.xlu1 %3522 }
0x441d   :  { %4817 = vmatmul.mubr.msk.f32.vlgmr.msra.gmra.mrb[30].mxu0 %vm871_vm7, %v3523_v30 }
0x441e   :  { %5051 = vmatpush3.bf16.msra.mxu0 %v6182_v3  ;;  %4838 = vmatprep.mubr.msk.f32.mxu0 %vm5420_vm6, %v5421_v55 }
0x441f   :  { %5052 = vmatprep.subr.bf16.mxu0 %v5419_v12 }
0x4422   :  { %5054 = vmatpush3.bf16.msra.mxu0 %v6188_v23 }
0x4423   :  { %5061 = vmatprep.subr.bf16.mxu0 %v5419_v12 }
0x44f0   :  { %v3592_v14 = vpop.f32.mrb[30].mxu0 }
0x44f1   :  { %v3596_v41 = vadd.f32 %v3592_v14, %v6336_v18  ;;  %v4818_v46 = vpop.f32.mrb[31].mxu0 }
0x44f3   :  { %5286 = vtanh.f32 %v3596_v41  ;;  %v4344_v24 = vmul.f32 -1.442695, %v3596_v41 }
0x44f5   :  { %5288 = vpow2.f32 %v4344_v24 }
0x44fd   :  { %v5287_v5 = vpop.eup %5286 }
0x44fe   :  { %3606 = vrot.lane.b32.xlu0 %v5287_v5, %s5422_s5 }
0x44ff   :  { %v5289_v61 = vpop.eup %5288 }
0x4500   :  { %v3600_v6 = vadd.f32 1.0, %v5289_v61 }
0x4502   :  { %5290 = vrcp.f32 %v3600_v6 }
0x450c   :  { %v5291_v48 = vpop.eup %5290 }
0x450d   :  { %v3604_v59 = vmul.f32 %v5291_v48, %v3511_v19 }
0x4570   :  { %v3607_v1 = vpop.permute.xlu0 %3606 }
0x4571   :  { %v3609_v31 = vmul.f32 %v5291_v48, %v3607_v1 }
0x4573   :  { %3611 = vrot.lane.b32.xlu1 %v3609_v31, %s5423_s12 }
0x45e5   :  { %v3612_v39 = vpop.permute.xlu1 %3611 }
0x45e6   :  { %v3614_v10 = vadd.f32 %v3612_v39, %v3604_v59 }
0x45e8   :  { %5292 = vtanh.f32 %v3614_v10 }
0x45f2   :  { %v5293_v18 = vpop.eup %5292 }
0x45f3   :  { %3617 = vrot.lane.b32.xlu0 %v5293_v18, %s5422_s5 }
0x4665   :  { %v3618_v49 = vpop.permute.xlu0 %3617 }
0x4666   :  { %v3620_v36 = vmul.f32 %v5291_v48, %v3618_v49 }
0x4668   :  { %3627 = vrot.lane.b32.xlu1 %v3620_v36, %s5423_s12 }
0x46da   :  { %v3628_v25 = vpop.permute.xlu1 %3627 }
0x46db   :  { %4828 = vmatmul.mubr.msk.f32.vlgmr.msra.gmra.mrb[26].mxu1 %vm871_vm7, %v3628_v25 }
0x46dc   :  { %5057 = vmatpush3.bf16.msra.mxu1 %v6182_v3  ;;  %4849 = vmatprep.mubr.msk.f32.mxu1 %vm5420_vm6, %v5421_v55 }
0x46dd   :  { %5058 = vmatprep.subr.bf16.mxu1 %v5419_v12 }
0x46e0   :  { %5060 = vmatpush3.bf16.msra.mxu1 %v6188_v23 }
0x46e1   :  { %5067 = vmatprep.subr.bf16.mxu1 %v5419_v12 }
0x47ae   :  { %v3697_v26 = vpop.f32.mrb[26].mxu1 }
0x47af   :  { %v3701_v32 = vadd.f32 %v3697_v26, %v6342_v2  ;;  %v4829_v17 = vpop.f32.mrb[27].mxu1 }
0x47b1   :  { %5294 = vtanh.f32 %v3701_v32  ;;  %v4346_v9 = vmul.f32 -1.442695, %v3701_v32 }
0x47b3   :  { %5296 = vpow2.f32 %v4346_v9 }
0x47bb   :  { %v5295_v53 = vpop.eup %5294 }
0x47bc   :  { %3711 = vrot.lane.b32.xlu0 %v5295_v53, %s5422_s5 }
0x47bd   :  { %v5297_v28 = vpop.eup %5296 }
0x47be   :  { %v3705_v16 = vadd.f32 1.0, %v5297_v28 }
0x47c0   :  { %5298 = vrcp.f32 %v3705_v16 }
0x47ca   :  { %v5299_v33 = vpop.eup %5298 }
0x47cb   :  { %v3709_v7 = vmul.f32 %v5299_v33, %v3614_v10 }
0x482e   :  { %v3712_v27 = vpop.permute.xlu0 %3711 }
0x482f   :  { %v3714_v54 = vmul.f32 %v5299_v33, %v3712_v27 }
0x4831   :  { %3716 = vrot.lane.b32.xlu1 %v3714_v54, %s5423_s12 }
0x48a3   :  { %v3717_v40 = vpop.permute.xlu1 %3716 }
0x48a4   :  { %v3719_v35 = vadd.f32 %v3717_v40, %v3709_v7 }
0x48a6   :  { %5300 = vtanh.f32 %v3719_v35 }
0x48b0   :  { %v5301_v2 = vpop.eup %5300 }
0x48b1   :  { %3722 = vrot.lane.b32.xlu0 %v5301_v2, %s5422_s5 }
0x4923   :  { %v3723_v62 = vpop.permute.xlu0 %3722 }
0x4924   :  { %v3725_v34 = vmul.f32 %v5299_v33, %v3723_v62 }
0x4926   :  { %3733 = vrot.lane.b32.xlu1 %v3725_v34, %s5423_s12 }
0x4998   :  { %v3734_v63 = vpop.permute.xlu1 %3733 }
0x4999   :  { %4839 = vmatmul.mubr.msk.f32.vlgmr.msra.gmra.mrb[32].mxu0 %vm871_vm7, %v3734_v63 }
0x499a   :  { %5063 = vmatpush3.bf16.msra.mxu0 %v6182_v3  ;;  %4860 = vmatprep.mubr.msk.f32.mxu0 %vm5420_vm6, %v5421_v55 }
0x499b   :  { %5064 = vmatprep.subr.bf16.mxu0 %v5419_v12 }
0x499e   :  { %5066 = vmatpush3.bf16.msra.mxu0 %v6188_v23 }
0x499f   :  { %5073 = vmatprep.subr.bf16.mxu0 %v5419_v12 }
0x4a6c   :  { %v3803_v0 = vpop.f32.mrb[32].mxu0 }
0x4a6d   :  { %v3807_v51 = vadd.f32 %v3803_v0, %v6347_v47  ;;  %v4840_v56 = vpop.f32.mrb[33].mxu0 }
0x4a6e   :  { %v4144_v56 = vld [vmem:[%s6733_s6 + $0x8] sm:$0xff] }
0x4a6f   :  { %5302 = vtanh.f32 %v3807_v51  ;;  %v4348_v21 = vmul.f32 -1.442695, %v3807_v51 }
0x4a71   :  { %5304 = vpow2.f32 %v4348_v21 }
0x4a79   :  { %v5303_v50 = vpop.eup %5302 }
0x4a7a   :  { %3817 = vrot.lane.b32.xlu0 %v5303_v50, %s5422_s5  ;;  %v4145_v50 = vld [vmem:[%s6733_s6 + $0x10] sm:$0xff] }
0x4a7b   :  { %v5305_v37 = vpop.eup %5304 }
0x4a7c   :  { %v3811_v8 = vadd.f32 1.0, %v5305_v37  ;;  %v4146_v37 = vld [vmem:[%s6733_s6 + $0x18] sm:$0xff] }
0x4a7e   :  { %5306 = vrcp.f32 %v3811_v8  ;;  %v5077_v8 = vpack.c.bf16 %v4146_v37, %v4145_v50 }
0x4a88   :  { %v5307_v29 = vpop.eup %5306 }
0x4a89   :  { %v3815_v44 = vmul.f32 %v5307_v29, %v3719_v35 }
0x4aec   :  { %v3818_v38 = vpop.permute.xlu0 %3817 }
0x4aed   :  { %v3820_v42 = vmul.f32 %v5307_v29, %v3818_v38 }
0x4aef   :  { %3822 = vrot.lane.b32.xlu1 %v3820_v42, %s5423_s12 }
0x4b61   :  { %v3823_v15 = vpop.permute.xlu1 %3822 }
0x4b62   :  { %v3825_v4 = vadd.f32 %v3823_v15, %v3815_v44  ;;  %v4355_v15 = vld [vmem:[%s6734_s7] ss:$0 sm:$0xff] }
0x4b64   :  { %5308 = vtanh.f32 %v3825_v4 }
0x4b6e   :  { %v5309_v47 = vpop.eup %5308 }
0x4b6f   :  { %3828 = vrot.lane.b32.xlu0 %v5309_v47, %s5422_s5 }
0x4be1   :  { %v3829_v58 = vpop.permute.xlu0 %3828 }
0x4be2   :  { %v3831_v22 = vmul.f32 %v5307_v29, %v3829_v58 }
0x4be4   :  { %3836 = vrot.lane.b32.xlu1 %v3831_v22, %s5423_s12 }
0x4c56   :  { %v3837_v13 = vpop.permute.xlu1 %3836 }
0x4c57   :  { %4850 = vmatmul.mubr.msk.f32.vlgmr.msra.gmra.mrb[28].mxu1 %vm871_vm7, %v3837_v13 }
0x4c58   :  { %5069 = vmatpush3.bf16.msra.mxu1 %v6182_v3  ;;  %4871 = vmatprep.mubr.msk.f32.mxu1 %vm5420_vm6, %v5421_v55 }
0x4c59   :  { %5070 = vmatprep.subr.bf16.mxu1 %v5419_v12 }
0x4c5c   :  { %5072 = vmatpush3.bf16.msra.mxu1 %v6188_v23 }
0x4d2a   :  { %v3906_v43 = vpop.f32.mrb[28].mxu1 }
0x4d2b   :  { %v3910_v19 = vadd.f32 %v3906_v43, %v6313_v57  ;;  %v4851_v20 = vpop.f32.mrb[29].mxu1 }
0x4d2d   :  { %5310 = vtanh.f32 %v3910_v19  ;;  %v4350_v60 = vmul.f32 -1.442695, %v3910_v19 }
0x4d2f   :  { %5312 = vpow2.f32 %v4350_v60 }
0x4d37   :  { %v5311_v45 = vpop.eup %5310 }
0x4d38   :  { %3920 = vrot.lane.b32.xlu0 %v5311_v45, %s5422_s5 }
0x4d39   :  { %v5313_v30 = vpop.eup %5312 }
0x4d3a   :  { %v3914_v14 = vadd.f32 1.0, %v5313_v30 }
0x4d3c   :  { %5314 = vrcp.f32 %v3914_v14 }
0x4d46   :  { %v5315_v3 = vpop.eup %5314 }
0x4d47   :  { %v3918_v5 = vmul.f32 %v5315_v3, %v3825_v4 }
0x4daa   :  { %v3921_v41 = vpop.permute.xlu0 %3920 }
0x4dab   :  { %v3923_v46 = vmul.f32 %v5315_v3, %v3921_v41 }
0x4dad   :  { %3925 = vrot.lane.b32.xlu1 %v3923_v46, %s5423_s12 }
0x4e1f   :  { %v3926_v23 = vpop.permute.xlu1 %3925 }
0x4e20   :  { %v3928_v24 = vadd.f32 %v3926_v23, %v3918_v5 }
0x4e22   :  { %5316 = vtanh.f32 %v3928_v24 }
0x4e2c   :  { %v5317_v57 = vpop.eup %5316 }
0x4e2d   :  { %3931 = vrot.lane.b32.xlu0 %v5317_v57, %s5422_s5 }
0x4e9f   :  { %v3932_v61 = vpop.permute.xlu0 %3931 }
0x4ea0   :  { %v3934_v6 = vmul.f32 %v5315_v3, %v3932_v61 }
0x4ea2   :  { %3941 = vrot.lane.b32.xlu1 %v3934_v6, %s5423_s12 }
0x4f14   :  { %v3942_v48 = vpop.permute.xlu1 %3941 }
0x4f15   :  { %4861 = vmatmul.mubr.msk.f32.vlgmr.msra.gmra.mrb[34].mxu0 %vm871_vm7, %v3942_v48 }
0x4f16   :  { %4882 = vmatprep.mubr.msk.f32.mxu0 %vm5420_vm6, %v5421_v55 }
0x4fe8   :  { %v4011_v1 = vpop.f32.mrb[34].mxu0 }
0x4fe9   :  { %v4015_v31 = vadd.f32 %v4011_v1, %v6350_v52  ;;  %v4862_v59 = vpop.f32.mrb[35].mxu0 }
0x4feb   :  { %5318 = vtanh.f32 %v4015_v31  ;;  %v4352_v10 = vmul.f32 -1.442695, %v4015_v31 }
0x4fed   :  { %5320 = vpow2.f32 %v4352_v10 }
0x4ff5   :  { %v5319_v39 = vpop.eup %5318 }
0x4ff6   :  { %4025 = vrot.lane.b32.xlu0 %v5319_v39, %s5422_s5 }
0x4ff7   :  { %v5321_v18 = vpop.eup %5320 }
0x4ff8   :  { %v4019_v49 = vadd.f32 1.0, %v5321_v18 }
0x4ffa   :  { %5322 = vrcp.f32 %v4019_v49 }
0x5004   :  { %v5323_v36 = vpop.eup %5322 }
0x5005   :  { %v4023_v32 = vmul.f32 %v5323_v36, %v3928_v24 }
0x5068   :  { %v4026_v25 = vpop.permute.xlu0 %4025 }
0x5069   :  { %v4028_v26 = vmul.f32 %v5323_v36, %v4026_v25 }
0x506b   :  { %4030 = vrot.lane.b32.xlu1 %v4028_v26, %s5423_s12 }
0x50dd   :  { %v4031_v55 = vpop.permute.xlu1 %4030 }
0x50de   :  { %v4033_v17 = vadd.f32 %v4031_v55, %v4023_v32 }
0x50e0   :  { %5324 = vtanh.f32 %v4033_v17 }
0x50ea   :  { %v5325_v52 = vpop.eup %5324 }
0x50eb   :  { %4036 = vrot.lane.b32.xlu0 %v5325_v52, %s5422_s5 }
0x515d   :  { %v4037_v53 = vpop.permute.xlu0 %4036 }
0x515e   :  { %v4039_v9 = vmul.f32 %v5323_v36, %v4037_v53 }
0x5160   :  { %4044 = vrot.lane.b32.xlu1 %v4039_v9, %s5423_s12 }
0x51d2   :  { %v4045_v28 = vpop.permute.xlu1 %4044 }
0x51d3   :  { %4872 = vmatmul.mubr.msk.f32.vlgmr.msra.gmra.mrb[30].mxu1 %vm871_vm7, %v4045_v28 }
0x52a6   :  { %v4114_v16 = vpop.f32.mrb[30].mxu1 }
0x52a7   :  { %v4118_v33 = vadd.f32 %v4114_v16, %v6355_v11  ;;  %v4873_v27 = vpop.f32.mrb[31].mxu1  ;;  %v4143_v11 = vld [vmem:[%s6733_s6] sm:$0xff]  ;;  %s5424_s6 = smov [#allocation9]  }
0x52a8   :  { %v5074_v21 = vpack.c.bf16 %v4144_v56, %v4143_v11  ;;  %s4237_s26 = sshll.u32 %s5424_s6, 4  ;;  %s4238_s26 = int_to_ptr.vmem [resolvable:$true] %s4237_s26 }
0x52a9   :  { %5326 = vtanh.f32 %v4118_v33  ;;  %v4354_v7 = vmul.f32 -1.442695, %v4118_v33  ;;  %s5380_s9 = scalar_lea.vmem %s4238_s26, 32  ;;  %p5385_p5 = scmp.lt.s32.totalorder %s4238_s26, %s4238_s26 }
0x52aa   :  { %5075 = vmatpush3.bf16.msra.mxu0 %v5074_v21  ;;  %p5381_p4 = scmp.ne.s32.totalorder %s4238_s26, %s5380_s9  ;;  %p5386_p6 = scmp.lt.s32.totalorder %s5380_s9, %s5380_s9 }
0x52ab   :  { %5328 = vpow2.f32 %v4354_v7  ;;  %5076 = vmatprep.subr.bf16.mxu0 %v5419_v12 }
0x52ac   :  { %p5387_p7 = por %p5386_p6, %p5385_p5 }
0x52ae   :  { %5078 = vmatpush3.bf16.msra.mxu0 %v5077_v8  ;;  %p5388_p8 = pnand %p5387_p7, %p5381_p4 }
0x52b3   :  { %v5327_v54 = vpop.eup %5326 }
0x52b4   :  { %4128 = vrot.lane.b32.xlu0 %v5327_v54, %s5422_s5 }
0x52b5   :  { %v5329_v40 = vpop.eup %5328 }
0x52b6   :  { %v4122_v35 = vadd.f32 1.0, %v5329_v40 }
0x52b8   :  { %5330 = vrcp.f32 %v4122_v35 }
0x52c2   :  { %v5331_v2 = vpop.eup %5330 }
0x52c3   :  { %v4126_v63 = vmul.f32 %v5331_v2, %v4033_v17 }
0x5326   :  { %v4129_v62 = vpop.permute.xlu0 %4128 }
0x5327   :  { %v4131_v34 = vmul.f32 %v5331_v2, %v4129_v62 }
0x5329   :  { %4133 = vrot.lane.b32.xlu1 %v4131_v34, %s5423_s12 }
0x539b   :  { %v4134_v0 = vpop.permute.xlu1 %4133 }
0x539c   :  { %v4136_v51 = vadd.f32 %v4134_v0, %v4126_v63 }
0x539e   :  { %5332 = vtanh.f32 %v4136_v51 }
0x53a8   :  { %v5333_v29 = vpop.eup %5332 }
0x53a9   :  { %4139 = vrot.lane.b32.xlu0 %v5333_v29, %s5422_s5 }
0x541b   :  { %v4140_v38 = vpop.permute.xlu0 %4139 }
0x541c   :  { %v4142_v42 = vmul.f32 %v5331_v2, %v4140_v38 }
0x541e   :  { %4155 = vrot.lane.b32.xlu1 %v4142_v42, %s5423_s12 }
0x5490   :  { %v4156_v44 = vpop.permute.xlu1 %4155 }
0x5491   :  { %4883 = vmatmul.mubr.msk.f32.vlgmr.msra.gmra.mrb[36].mxu0 %vm871_vm7, %v4156_v44 }
0x5564   :  { %v4225_v4 = vpop.f32.mrb[36].mxu0 }
0x5565   :  { %v4226_v12 = vadd.f32 %v4355_v15, %v4225_v4  ;;  %v4884_v47 = vpop.f32.mrb[37].mxu0 }
0x5567   :  { %4230 = vst.msk [vmem:[#allocation9] sm:$0x3] %vm4229_vm8, %v4226_v12 }
0x5568   :  { %5391 = shalt.err (!%p5388_p8)
}
0x5569   :  { %s5392_s11 = scalar_lea.hbm %s6735_s8, 32 }
0x556a   :  { %p5393_p9 = scmp.ne.s32.totalorder %s6735_s8, %s5392_s11  ;;  %p5396_p10 = scmp.lt.u32.totalorder %s5392_s11, %s6735_s8 }
0x556c   :  { %p5398_p11 = pnand %p5396_p10, %p5393_p9 }
0x556e   :  { %5401 = shalt.err (!%p5398_p11)
}
0x556f   :  { %4240 = dma.vmem_to_hbm [thread:$0]  %s4238_s26, 32, %s6735_s8, [#allocation4]  }
0x5570   :  { %5408 = dma.done.wait [#allocation4], 32  }
0x5571   :  { %5409 = vsyncadd [#allocation4], 4294967264 }
0x5572   :  { %4244 = vsyncpa [#allocation3], 1 }
0x5573   :  { %4245 = vsyncpa [#allocation4], 1 }
0x5574   :  { %4246 = vsyncpa [#allocation5], 1 }
0x5575   :  { %4247 = vsyncpa [#allocation7], 1 }

</bundles_post_ra>
